<compile_context>
chip_gen: v6e
topology: v6e:2x2x1
jax: 0.10.0
libtpu: 0.0.40
codegen_flags: <defaults>
</compile_context>

<pallas_src>
import functools

import jax
import jax.numpy as jnp
from jax.experimental import pallas as pl
from jax.experimental.pallas import tpu as pltpu


def _split_f32_dot(a, b01):
    """a @ b01 for a 0/1 matrix b01, robust to the MXU's f32 emulation mode.

    Splitting `a` into a bf16-exact high part plus residual keeps every product
    exact even if the f32 matmul is lowered as bf16 multi-pass; accumulation
    happens in f32.  Cost: one extra small matmul on an otherwise idle MXU.
    """
    a_hi = a.astype(jnp.bfloat16).astype(jnp.float32)
    a_lo = a - a_hi
    return (jnp.dot(a_hi, b01, preferred_element_type=jnp.float32)
            + jnp.dot(a_lo, b01, preferred_element_type=jnp.float32))


def litanfis_kernel(x_ref, expand_ref, mean_ref, inv2var_ref, lit_a_ref, lit_b_ref,
                    sum_mat_ref, tsk_w_ref, tsk_b_ref,
                    pack_y_ref, pack_recon_ref, pack_ent_ref, out_bias_ref,
                    out_ref, *, in_features, rules):
    F, R = in_features, rules
    FR = F * R

    x = x_ref[...]                                   # (TB, F)

    # ---- lane-dense expansion of x on the (otherwise idle) MXU --------------
    # xe[:, f*R + r] = x[:, f]; replaces the HBM-resident jnp.repeat copy.
    xe = _split_f32_dot(x, expand_ref[...])          # (TB, FR)

    # ---- membership values, lane-dense over all (feature, rule) pairs -------
    d = xe - mean_ref[...]
    g = jnp.exp(-(d * d) * inv2var_ref[...])         # EUP
    m = g * lit_a_ref[...] + lit_b_ref[...]          # == g*lit + (1-g)*(1-lit)
    logm = jnp.log(m + 1e-10)                        # EUP

    # ---- per-rule reductions over features -----------------------------------
    # MAX: log2(F) lane-rotate butterflies on the XLU.  Lane c holds
    # (feature c//R, rule c%R); rolls by multiples of R keep residue classes
    # closed, so every lane ends with its rule's max over features.
    max_full = logm
    shift = R
    while shift < FR:
        max_full = jnp.maximum(max_full, pltpu.roll(max_full, shift, 1))
        shift *= 2
    # SUM: residue-class 0/1 matrix on the MXU (frees 4 of the 8 XLU rolls on
    # the 2-XLU chips); result is R-periodic across lanes like max_full.
    sum_logm = _split_f32_dot(logm, sum_mat_ref[...])     # (TB, FR)

    # log firing strength  (reference: exp(sum(logm - max)) * exp(max))
    logf_full = sum_logm - float(F - 1) * max_full
    firing_full = jnp.exp(logf_full)                      # EUP, R-periodic lanes

    # entropy of the un-normalized firing strength; reuses logf instead of
    # log(firing) (identical unless firing underflows, where torch would NaN).
    ent_full = -firing_full * logf_full

    # ---- L1 normalization over rules (F.normalize(p=1, dim=1)) ---------------
    if R > 1:
        # firing_full is exactly R-periodic, so the sum over all FR lanes is
        # F * (sum over rules); avoids a narrow lane slice.
        denom = jnp.sum(jnp.abs(firing_full), axis=1, keepdims=True) * (1.0 / F)
        inv_denom = 1.0 / jnp.maximum(denom, 1e-12)
        yn_full = firing_full * inv_denom
    else:
        yn_full = firing_full
    # TODO(synk): nn.Dropout is identity in eval mode; training-mode dropout not implemented.

    # ---- TSK head (MXU); columns pre-permuted output-major (c = o*R + r) -----
    tsk = (jnp.dot(x, tsk_w_ref[...], preferred_element_type=jnp.float32)
           + tsk_b_ref[...])                              # (TB, FR), cols >= R*O are 0
    weighted = tsk * yn_full

    # ---- pack y / reconstructed_X / entropy into one 128-lane slab -----------
    # Three small matmuls on the idle MXU replace three narrow masked stores
    # with one unmasked full-lane store; the wrapper splits the slab.
    slab = (jnp.dot(weighted, pack_y_ref[...], preferred_element_type=jnp.float32)
            + jnp.dot(yn_full, pack_recon_ref[...], preferred_element_type=jnp.float32)
            + jnp.dot(ent_full, pack_ent_ref[...], preferred_element_type=jnp.float32)
            + out_bias_ref[...])
    out_ref[...] = slab


def litanfis_forward(x, params, *, rules, out_features, batch_tile=256):
    B, F = x.shape
    R, O = rules, out_features
    FR, RO = F * R, R * O
    SLAB = 128   # lane-dense packed output: [y (O) | recon (F) | entropy (R) | pad]

    # Residue-class reductions assume a power-of-two feature count and a
    # lane-aligned flattened width (F=16, R=8 -> FR=128 for this config).
    assert F & (F - 1) == 0, "in_features must be a power of two"
    assert FR % 128 == 0, "in_features*rules must be a multiple of 128 lanes"
    assert RO <= FR, "rules*out_features must fit inside the flattened lane layout"
    assert O + F + R <= SLAB, "packed outputs must fit one 128-lane slab"

    # Batch tile: sweep 256..2048 per generation; keep >= 2 grid steps on v7x so
    # dimension_semantics=("parallel",) can shard across its two TensorCores.
    TB = min(batch_tile, B)
    assert B % TB == 0 and TB % 8 == 0, "batch must tile cleanly into (TB % 8 == 0) blocks"

    f32 = jnp.float32
    # ---- batch-invariant precompute (hoisted off the per-tile EUP/VPU path) --
    mean_flat = params["mean"].reshape(1, FR).astype(f32)
    inv2var_flat = (1.0 / (2.0 * params["std"] * params["std"])).reshape(1, FR).astype(f32)
    lit = jax.nn.sigmoid(params["literal"].astype(f32)).reshape(1, FR)
    lit_a = 2.0 * lit - 1.0
    lit_b = 1.0 - lit

    # 0/1 expansion matrix: E[f, f*R + r] = 1   (xe = x @ E)
    expand = jnp.repeat(jnp.eye(F, dtype=f32), R, axis=1)                 # (F, FR)
    # residue-class sum matrix: S[c', c] = 1 iff c' == c (mod R)
    lane = jnp.arange(FR)
    sum_mat = (lane[:, None] % R == lane[None, :] % R).astype(f32)        # (FR, FR)

    # tsk weights: columns reordered rule-major -> output-major (c = o*R + r)
    # and zero-padded to FR lanes so they align with the R-periodic firing lanes.
    tsk_w2 = params["tsk_w"].reshape(F, R, O).transpose(0, 2, 1).reshape(F, RO)
    tsk_b2 = params["tsk_b"].reshape(1, R, O).transpose(0, 2, 1).reshape(1, RO)
    tsk_w_pad = jnp.zeros((F, FR), f32).at[:, :RO].set(tsk_w2.astype(f32))
    tsk_b_pad = jnp.zeros((1, FR), f32).at[:, :RO].set(tsk_b2.astype(f32))

    # output-packing matrices: slab = weighted@P_y + yn@P_recon + ent@P_ent + bias
    o_idx = jnp.arange(O)
    r_idx = jnp.arange(R)
    rows_y = (o_idx[:, None] * R + r_idx[None, :]).reshape(-1)
    cols_y = jnp.repeat(o_idx, R)
    pack_y = jnp.zeros((FR, SLAB), f32).at[rows_y, cols_y].set(1.0)
    pack_recon = jnp.zeros((FR, SLAB), f32).at[:R, O:O + F].set(params["dec_w"].astype(f32))
    pack_ent = jnp.zeros((FR, SLAB), f32).at[r_idx, O + F + r_idx].set(1.0)
    out_bias = jnp.zeros((1, SLAB), f32).at[:, O:O + F].set(params["dec_b"].astype(f32))

    kernel = functools.partial(litanfis_kernel, in_features=F, rules=R)

    def batched(shape):
        return pl.BlockSpec(shape, lambda i: (i, 0))

    def const(shape):
        return pl.BlockSpec(shape, lambda i: (0, 0))

    in_specs = [
        batched((TB, F)),     # x
        const((F, FR)),       # expansion matrix
        const((1, FR)),       # mean
        const((1, FR)),       # 1/(2*std^2)
        const((1, FR)),       # lit_a = 2*sigmoid(literal)-1
        const((1, FR)),       # lit_b = 1-sigmoid(literal)
        const((FR, FR)),      # residue-class sum matrix
        const((F, FR)),       # tsk_w (output-major, padded)
        const((1, FR)),       # tsk_b (output-major, padded)
        const((FR, SLAB)),    # pack_y
        const((FR, SLAB)),    # pack_recon (embeds dec_w)
        const((FR, SLAB)),    # pack_ent
        const((1, SLAB)),     # out_bias (embeds dec_b)
    ]

    flops = (2 * B * F * FR * 3           # expansion (hi+lo) + tsk matmuls
             + 2 * B * FR * FR * 2        # residue-class sum (hi+lo)
             + 2 * B * FR * SLAB * 3      # output-packing matmuls
             + 20 * B * FR)               # elementwise
    transcendentals = 3 * B * FR
    bytes_accessed = 4 * (B * (F + SLAB)
                          + 2 * F * FR + FR * FR + 3 * FR * SLAB + 6 * FR + 2 * SLAB)

    out = pl.pallas_call(
        kernel,
        grid=(B // TB,),
        in_specs=in_specs,
        out_specs=batched((TB, SLAB)),
        out_shape=jax.ShapeDtypeStruct((B, SLAB), f32),
        compiler_params=pltpu.CompilerParams(
            dimension_semantics=("parallel",),
            # Re-derived for v7x's 64 MiB physical VMEM: dominant double-buffered
            # stream is the (TB, 128) slab (~0.25 MiB at TB=256); 32 MiB leaves
            # large headroom on every generation.
            vmem_limit_bytes=32 * 1024 * 1024,
        ),
        cost_estimate=pl.CostEstimate(
            flops=flops,
            transcendentals=transcendentals,
            bytes_accessed=bytes_accessed,
        ),
    )(x, expand, mean_flat, inv2var_flat, lit_a, lit_b, sum_mat,
      tsk_w_pad, tsk_b_pad, pack_y, pack_recon, pack_ent, out_bias)

    y = out[:, :O]
    recon = out[:, O:O + F]
    ent = out[:, O + F:O + F + R]
    return y, recon, ent


def litanfis_reference(x, p, *, rules, out_features):
    """Pure-JAX reference mirroring the PyTorch forward (eval mode)."""
    lit = jax.nn.sigmoid(p["literal"])
    g = jnp.exp(-((x[:, :, None] - p["mean"][None]) ** 2) / (2.0 * p["std"][None] ** 2))
    m = g * lit[None] + (1.0 - g) * (1.0 - lit[None])
    logm = jnp.log(m + 1e-10)
    mx = jnp.max(logm, axis=1, keepdims=True)
    firing = jnp.exp(jnp.sum(logm - mx, axis=1)) * jnp.exp(mx[:, 0, :])
    ent = -firing * jnp.log(firing)
    if rules > 1:
        yn = firing / jnp.maximum(jnp.sum(jnp.abs(firing), axis=1, keepdims=True), 1e-12)
    else:
        yn = firing
    recon = yn @ p["dec_w"] + p["dec_b"][0]
    t = (x @ p["tsk_w"] + p["tsk_b"][0]).reshape(-1, rules, out_features)
    y = jnp.sum(t * yn[:, :, None], axis=1)
    return y, recon, ent


if __name__ == "__main__":
    # LitAnfis(in_features=16, rules=8, out_features=4, binary=False); batch tiled 256.
    B, F, R, O = 512, 16, 8, 4

    key = jax.random.PRNGKey(0)
    k = jax.random.split(key, 8)
    params = {
        "mean":    jax.random.uniform(k[0], (F, R), jnp.float32),          # torch.rand
        "std":     jax.random.uniform(k[1], (F, R), jnp.float32),          # torch.rand
        "literal": 0.1 * jax.random.normal(k[2], (F, R), jnp.float32),     # torch.randn * 0.1
        "tsk_w":   0.2 * jax.random.normal(k[3], (F, R * O), jnp.float32), # tsk_linear W (pre-transposed)
        "tsk_b":   0.1 * jax.random.normal(k[4], (1, R * O), jnp.float32),
        "dec_w":   0.2 * jax.random.normal(k[5], (R, F), jnp.float32),     # decoder_linear W (pre-transposed)
        "dec_b":   0.1 * jax.random.normal(k[6], (1, F), jnp.float32),
    }
    x = jax.random.normal(k[7], (B, F), jnp.float32)

    fwd = jax.jit(functools.partial(litanfis_forward, rules=R, out_features=O))
    y, recon, ent = fwd(x, params)
    jax.block_until_ready((y, recon, ent))

    y_ref, recon_ref, ent_ref = litanfis_reference(x, params, rules=R, out_features=O)
    ok = (
        jnp.allclose(y, y_ref, rtol=1e-4, atol=1e-5)
        and jnp.allclose(recon, recon_ref, rtol=1e-4, atol=1e-5)
        and jnp.allclose(ent, ent_ref, rtol=1e-4, atol=1e-5)
    )
    assert ok, "Pallas kernel output mismatch vs JAX reference"
    print("KERNEL_OK")
</pallas_src>

<mosaic_0001>
module attributes {stable_mosaic.version = 11 : i64} {
  func.func @litanfis_kernel(%arg0: i32, %arg1: memref<256x16xf32, #tpu.memory_space<vmem>>, %arg2: memref<16x128xf32, #tpu.memory_space<vmem>>, %arg3: memref<1x128xf32, #tpu.memory_space<vmem>>, %arg4: memref<1x128xf32, #tpu.memory_space<vmem>>, %arg5: memref<1x128xf32, #tpu.memory_space<vmem>>, %arg6: memref<1x128xf32, #tpu.memory_space<vmem>>, %arg7: memref<128x128xf32, #tpu.memory_space<vmem>>, %arg8: memref<16x128xf32, #tpu.memory_space<vmem>>, %arg9: memref<1x128xf32, #tpu.memory_space<vmem>>, %arg10: memref<128x128xf32, #tpu.memory_space<vmem>>, %arg11: memref<128x128xf32, #tpu.memory_space<vmem>>, %arg12: memref<128x128xf32, #tpu.memory_space<vmem>>, %arg13: memref<1x128xf32, #tpu.memory_space<vmem>>, %arg14: memref<256x128xf32, #tpu.memory_space<vmem>>) attributes {dimension_semantics = [#tpu.dimension_semantics<parallel>], iteration_bounds = array<i64: 2>, scalar_prefetch = 0 : i64, scratch_operands = 0 : i64, tpu.core_type = #tpu.core_type<tc>, window_params = [{transform_indices = @transform_0, window_bounds = array<i64: 256, 16>}, {pipeline_mode = #tpu.pipeline_mode<synchronous>, transform_indices = @transform_1, window_bounds = array<i64: 16, 128>}, {pipeline_mode = #tpu.pipeline_mode<synchronous>, transform_indices = @transform_2, window_bounds = array<i64: 1, 128>}, {pipeline_mode = #tpu.pipeline_mode<synchronous>, transform_indices = @transform_3, window_bounds = array<i64: 1, 128>}, {pipeline_mode = #tpu.pipeline_mode<synchronous>, transform_indices = @transform_4, window_bounds = array<i64: 1, 128>}, {pipeline_mode = #tpu.pipeline_mode<synchronous>, transform_indices = @transform_5, window_bounds = array<i64: 1, 128>}, {pipeline_mode = #tpu.pipeline_mode<synchronous>, transform_indices = @transform_6, window_bounds = array<i64: 128, 128>}, {pipeline_mode = #tpu.pipeline_mode<synchronous>, transform_indices = @transform_7, window_bounds = array<i64: 16, 128>}, {pipeline_mode = #tpu.pipeline_mode<synchronous>, transform_indices = @transform_8, window_bounds = array<i64: 1, 128>}, {pipeline_mode = #tpu.pipeline_mode<synchronous>, transform_indices = @transform_9, window_bounds = array<i64: 128, 128>}, {pipeline_mode = #tpu.pipeline_mode<synchronous>, transform_indices = @transform_10, window_bounds = array<i64: 128, 128>}, {pipeline_mode = #tpu.pipeline_mode<synchronous>, transform_indices = @transform_11, window_bounds = array<i64: 128, 128>}, {pipeline_mode = #tpu.pipeline_mode<synchronous>, transform_indices = @transform_12, window_bounds = array<i64: 1, 128>}, {transform_indices = @transform_13, window_bounds = array<i64: 256, 128>}]} {
    %c0 = arith.constant 0 : index
    %c0_0 = arith.constant 0 : index
    %0 = vector.load %arg1[%c0, %c0_0] : memref<256x16xf32, #tpu.memory_space<vmem>>, vector<256x16xf32>
    %c0_1 = arith.constant 0 : index
    %c0_2 = arith.constant 0 : index
    %1 = vector.load %arg2[%c0_1, %c0_2] : memref<16x128xf32, #tpu.memory_space<vmem>>, vector<16x128xf32>
    %2 = arith.truncf %0 : vector<256x16xf32> to vector<256x16xbf16>
    %3 = arith.extf %2 : vector<256x16xbf16> to vector<256x16xf32>
    %4 = arith.subf %0, %3 : vector<256x16xf32>
    %cst = arith.constant dense<0.000000e+00> : vector<256x128xf32>
    %5 = tpu.matmul %3, %1, %cst {dimension_numbers = #tpu.dot_dimension_numbers<[1], [0], [0], [1], [0, 0, 1, 1], [], []>} : vector<256x16xf32>, vector<16x128xf32>, vector<256x128xf32> -> vector<256x128xf32>
    %cst_3 = arith.constant dense<0.000000e+00> : vector<256x128xf32>
    %6 = tpu.matmul %4, %1, %cst_3 {dimension_numbers = #tpu.dot_dimension_numbers<[1], [0], [0], [1], [0, 0, 1, 1], [], []>} : vector<256x16xf32>, vector<16x128xf32>, vector<256x128xf32> -> vector<256x128xf32>
    %7 = arith.addf %5, %6 : vector<256x128xf32>
    %c0_4 = arith.constant 0 : index
    %c0_5 = arith.constant 0 : index
    %8 = vector.load %arg3[%c0_4, %c0_5] : memref<1x128xf32, #tpu.memory_space<vmem>>, vector<1x128xf32>
    %9 = vector.broadcast %8 : vector<1x128xf32> to vector<256x128xf32>
    %10 = arith.subf %7, %9 : vector<256x128xf32>
    %11 = arith.mulf %10, %10 : vector<256x128xf32>
    %cst_6 = arith.constant 0.000000e+00 : f32
    %12 = vector.broadcast %cst_6 : f32 to vector<256x128xf32>
    %13 = arith.subf %12, %11 : vector<256x128xf32>
    %c0_7 = arith.constant 0 : index
    %c0_8 = arith.constant 0 : index
    %14 = vector.load %arg4[%c0_7, %c0_8] : memref<1x128xf32, #tpu.memory_space<vmem>>, vector<1x128xf32>
    %15 = vector.broadcast %14 : vector<1x128xf32> to vector<256x128xf32>
    %16 = arith.mulf %13, %15 : vector<256x128xf32>
    %17 = math.exp %16 : vector<256x128xf32>
    %c0_9 = arith.constant 0 : index
    %c0_10 = arith.constant 0 : index
    %18 = vector.load %arg5[%c0_9, %c0_10] : memref<1x128xf32, #tpu.memory_space<vmem>>, vector<1x128xf32>
    %19 = vector.broadcast %18 : vector<1x128xf32> to vector<256x128xf32>
    %20 = arith.mulf %17, %19 : vector<256x128xf32>
    %c0_11 = arith.constant 0 : index
    %c0_12 = arith.constant 0 : index
    %21 = vector.load %arg6[%c0_11, %c0_12] : memref<1x128xf32, #tpu.memory_space<vmem>>, vector<1x128xf32>
    %22 = vector.broadcast %21 : vector<1x128xf32> to vector<256x128xf32>
    %23 = arith.addf %20, %22 : vector<256x128xf32>
    %cst_13 = arith.constant 1.000000e-10 : f32
    %24 = vector.broadcast %cst_13 : f32 to vector<256x128xf32>
    %25 = arith.addf %23, %24 : vector<256x128xf32>
    %26 = math.log %25 : vector<256x128xf32>
    %c8_i32 = arith.constant 8 : i32
    %27 = tpu.dynamic_rotate %26 by %c8_i32 dim 1 : vector<256x128xf32>, i32 -> vector<256x128xf32>
    %28 = arith.maximumf %26, %27 : vector<256x128xf32>
    %c16_i32 = arith.constant 16 : i32
    %29 = tpu.dynamic_rotate %28 by %c16_i32 dim 1 : vector<256x128xf32>, i32 -> vector<256x128xf32>
    %30 = arith.maximumf %28, %29 : vector<256x128xf32>
    %c32_i32 = arith.constant 32 : i32
    %31 = tpu.dynamic_rotate %30 by %c32_i32 dim 1 : vector<256x128xf32>, i32 -> vector<256x128xf32>
    %32 = arith.maximumf %30, %31 : vector<256x128xf32>
    %c64_i32 = arith.constant 64 : i32
    %33 = tpu.dynamic_rotate %32 by %c64_i32 dim 1 : vector<256x128xf32>, i32 -> vector<256x128xf32>
    %34 = arith.maximumf %32, %33 : vector<256x128xf32>
    %c0_14 = arith.constant 0 : index
    %c0_15 = arith.constant 0 : index
    %35 = vector.load %arg7[%c0_14, %c0_15] : memref<128x128xf32, #tpu.memory_space<vmem>>, vector<128x128xf32>
    %36 = arith.truncf %26 : vector<256x128xf32> to vector<256x128xbf16>
    %37 = arith.extf %36 : vector<256x128xbf16> to vector<256x128xf32>
    %38 = arith.subf %26, %37 : vector<256x128xf32>
    %cst_16 = arith.constant dense<0.000000e+00> : vector<256x128xf32>
    %39 = tpu.matmul %37, %35, %cst_16 {dimension_numbers = #tpu.dot_dimension_numbers<[1], [0], [0], [1], [0, 0, 1, 1], [], []>} : vector<256x128xf32>, vector<128x128xf32>, vector<256x128xf32> -> vector<256x128xf32>
    %cst_17 = arith.constant dense<0.000000e+00> : vector<256x128xf32>
    %40 = tpu.matmul %38, %35, %cst_17 {dimension_numbers = #tpu.dot_dimension_numbers<[1], [0], [0], [1], [0, 0, 1, 1], [], []>} : vector<256x128xf32>, vector<128x128xf32>, vector<256x128xf32> -> vector<256x128xf32>
    %41 = arith.addf %39, %40 : vector<256x128xf32>
    %cst_18 = arith.constant 1.500000e+01 : f32
    %42 = vector.broadcast %cst_18 : f32 to vector<256x128xf32>
    %43 = arith.mulf %42, %34 : vector<256x128xf32>
    %44 = arith.subf %41, %43 : vector<256x128xf32>
    %45 = math.exp %44 : vector<256x128xf32>
    %cst_19 = arith.constant 0.000000e+00 : f32
    %46 = vector.broadcast %cst_19 : f32 to vector<256x128xf32>
    %47 = arith.subf %46, %45 : vector<256x128xf32>
    %48 = arith.mulf %47, %44 : vector<256x128xf32>
    %49 = math.absf %45 : vector<256x128xf32>
    %cst_20 = arith.constant dense<0.000000e+00> : vector<256xf32>
    %50 = vector.multi_reduction <add>, %49, %cst_20 [1] : vector<256x128xf32> to vector<256xf32>
    %51 = vector.shape_cast %50 : vector<256xf32> to vector<256x1xf32>
    %cst_21 = arith.constant 6.250000e-02 : f32
    %52 = vector.broadcast %cst_21 : f32 to vector<256x1xf32>
    %53 = arith.mulf %51, %52 : vector<256x1xf32>
    %cst_22 = arith.constant 9.99999996E-13 : f32
    %54 = vector.broadcast %cst_22 : f32 to vector<256x1xf32>
    %55 = arith.maximumf %53, %54 : vector<256x1xf32>
    %cst_23 = arith.constant 1.000000e+00 : f32
    %56 = vector.broadcast %cst_23 : f32 to vector<256x1xf32>
    %57 = arith.divf %56, %55 : vector<256x1xf32>
    %58 = vector.broadcast %57 : vector<256x1xf32> to vector<256x128xf32>
    %59 = arith.mulf %45, %58 : vector<256x128xf32>
    %c0_24 = arith.constant 0 : index
    %c0_25 = arith.constant 0 : index
    %60 = vector.load %arg8[%c0_24, %c0_25] : memref<16x128xf32, #tpu.memory_space<vmem>>, vector<16x128xf32>
    %cst_26 = arith.constant dense<0.000000e+00> : vector<256x128xf32>
    %61 = tpu.matmul %0, %60, %cst_26 {dimension_numbers = #tpu.dot_dimension_numbers<[1], [0], [0], [1], [0, 0, 1, 1], [], []>} : vector<256x16xf32>, vector<16x128xf32>, vector<256x128xf32> -> vector<256x128xf32>
    %c0_27 = arith.constant 0 : index
    %c0_28 = arith.constant 0 : index
    %62 = vector.load %arg9[%c0_27, %c0_28] : memref<1x128xf32, #tpu.memory_space<vmem>>, vector<1x128xf32>
    %63 = vector.broadcast %62 : vector<1x128xf32> to vector<256x128xf32>
    %64 = arith.addf %61, %63 : vector<256x128xf32>
    %65 = arith.mulf %64, %59 : vector<256x128xf32>
    %c0_29 = arith.constant 0 : index
    %c0_30 = arith.constant 0 : index
    %66 = vector.load %arg10[%c0_29, %c0_30] : memref<128x128xf32, #tpu.memory_space<vmem>>, vector<128x128xf32>
    %cst_31 = arith.constant dense<0.000000e+00> : vector<256x128xf32>
    %67 = tpu.matmul %65, %66, %cst_31 {dimension_numbers = #tpu.dot_dimension_numbers<[1], [0], [0], [1], [0, 0, 1, 1], [], []>} : vector<256x128xf32>, vector<128x128xf32>, vector<256x128xf32> -> vector<256x128xf32>
    %c0_32 = arith.constant 0 : index
    %c0_33 = arith.constant 0 : index
    %68 = vector.load %arg11[%c0_32, %c0_33] : memref<128x128xf32, #tpu.memory_space<vmem>>, vector<128x128xf32>
    %cst_34 = arith.constant dense<0.000000e+00> : vector<256x128xf32>
    %69 = tpu.matmul %59, %68, %cst_34 {dimension_numbers = #tpu.dot_dimension_numbers<[1], [0], [0], [1], [0, 0, 1, 1], [], []>} : vector<256x128xf32>, vector<128x128xf32>, vector<256x128xf32> -> vector<256x128xf32>
    %70 = arith.addf %67, %69 : vector<256x128xf32>
    %c0_35 = arith.constant 0 : index
    %c0_36 = arith.constant 0 : index
    %71 = vector.load %arg12[%c0_35, %c0_36] : memref<128x128xf32, #tpu.memory_space<vmem>>, vector<128x128xf32>
    %cst_37 = arith.constant dense<0.000000e+00> : vector<256x128xf32>
    %72 = tpu.matmul %48, %71, %cst_37 {dimension_numbers = #tpu.dot_dimension_numbers<[1], [0], [0], [1], [0, 0, 1, 1], [], []>} : vector<256x128xf32>, vector<128x128xf32>, vector<256x128xf32> -> vector<256x128xf32>
    %73 = arith.addf %70, %72 : vector<256x128xf32>
    %c0_38 = arith.constant 0 : index
    %c0_39 = arith.constant 0 : index
    %74 = vector.load %arg13[%c0_38, %c0_39] : memref<1x128xf32, #tpu.memory_space<vmem>>, vector<1x128xf32>
    %75 = vector.broadcast %74 : vector<1x128xf32> to vector<256x128xf32>
    %76 = arith.addf %73, %75 : vector<256x128xf32>
    %c0_40 = arith.constant 0 : index
    %c0_41 = arith.constant 0 : index
    %77 = vector.load %arg14[%c0_40, %c0_41] : memref<256x128xf32, #tpu.memory_space<vmem>>, vector<256x128xf32>
    tpu.vector_store %arg14[%c0_40, %c0_41], %76 {strides = array<i32>} : memref<256x128xf32, #tpu.memory_space<vmem>>, vector<256x128xf32>,
    return
  }
  func.func @transform_0(%arg0: i32) -> (i32, i32) {
    %c0_i32 = arith.constant 0 : i32
    %c0_i32_0 = arith.constant 0 : i32
    return %arg0, %c0_i32 : i32, i32
  }
  func.func @transform_1(%arg0: i32) -> (i32, i32) {
    %c0_i32 = arith.constant 0 : i32
    %c0_i32_0 = arith.constant 0 : i32
    %c0_i32_1 = arith.constant 0 : i32
    return %c0_i32, %c0_i32_0 : i32, i32
  }
  func.func @transform_2(%arg0: i32) -> (i32, i32) {
    %c0_i32 = arith.constant 0 : i32
    %c0_i32_0 = arith.constant 0 : i32
    %c0_i32_1 = arith.constant 0 : i32
    return %c0_i32, %c0_i32_0 : i32, i32
  }
  func.func @transform_3(%arg0: i32) -> (i32, i32) {
    %c0_i32 = arith.constant 0 : i32
    %c0_i32_0 = arith.constant 0 : i32
    %c0_i32_1 = arith.constant 0 : i32
    return %c0_i32, %c0_i32_0 : i32, i32
  }
  func.func @transform_4(%arg0: i32) -> (i32, i32) {
    %c0_i32 = arith.constant 0 : i32
    %c0_i32_0 = arith.constant 0 : i32
    %c0_i32_1 = arith.constant 0 : i32
    return %c0_i32, %c0_i32_0 : i32, i32
  }
  func.func @transform_5(%arg0: i32) -> (i32, i32) {
    %c0_i32 = arith.constant 0 : i32
    %c0_i32_0 = arith.constant 0 : i32
    %c0_i32_1 = arith.constant 0 : i32
    return %c0_i32, %c0_i32_0 : i32, i32
  }
  func.func @transform_6(%arg0: i32) -> (i32, i32) {
    %c0_i32 = arith.constant 0 : i32
    %c0_i32_0 = arith.constant 0 : i32
    %c0_i32_1 = arith.constant 0 : i32
    return %c0_i32, %c0_i32_0 : i32, i32
  }
  func.func @transform_7(%arg0: i32) -> (i32, i32) {
    %c0_i32 = arith.constant 0 : i32
    %c0_i32_0 = arith.constant 0 : i32
    %c0_i32_1 = arith.constant 0 : i32
    return %c0_i32, %c0_i32_0 : i32, i32
  }
  func.func @transform_8(%arg0: i32) -> (i32, i32) {
    %c0_i32 = arith.constant 0 : i32
    %c0_i32_0 = arith.constant 0 : i32
    %c0_i32_1 = arith.constant 0 : i32
    return %c0_i32, %c0_i32_0 : i32, i32
  }
  func.func @transform_9(%arg0: i32) -> (i32, i32) {
    %c0_i32 = arith.constant 0 : i32
    %c0_i32_0 = arith.constant 0 : i32
    %c0_i32_1 = arith.constant 0 : i32
    return %c0_i32, %c0_i32_0 : i32, i32
  }
  func.func @transform_10(%arg0: i32) -> (i32, i32) {
    %c0_i32 = arith.constant 0 : i32
    %c0_i32_0 = arith.constant 0 : i32
    %c0_i32_1 = arith.constant 0 : i32
    return %c0_i32, %c0_i32_0 : i32, i32
  }
  func.func @transform_11(%arg0: i32) -> (i32, i32) {
    %c0_i32 = arith.constant 0 : i32
    %c0_i32_0 = arith.constant 0 : i32
    %c0_i32_1 = arith.constant 0 : i32
    return %c0_i32, %c0_i32_0 : i32, i32
  }
  func.func @transform_12(%arg0: i32) -> (i32, i32) {
    %c0_i32 = arith.constant 0 : i32
    %c0_i32_0 = arith.constant 0 : i32
    %c0_i32_1 = arith.constant 0 : i32
    return %c0_i32, %c0_i32_0 : i32, i32
  }
  func.func @transform_13(%arg0: i32) -> (i32, i32) {
    %c0_i32 = arith.constant 0 : i32
    %c0_i32_0 = arith.constant 0 : i32
    return %arg0, %c0_i32 : i32, i32
  }
}

</mosaic_0001>

<bundles_post_ra>
// kernel: litanfis_forward.1
= control target key start
LH: loop header
LB: loop body
LE: loop exit
PB: predicated region body
PF: predicated region fallthrough
CT: control target
= control target key end

     0   :  { %s5596_s25 = smov 0   ;;  %s7687_s0 = inlined_call_operand.vmem [shape: f32[512,16], index: 0, kind: input, shape index: {}]   ;;  %s7688_s1 = inlined_call_operand.vmem [shape: f32[16,128], index: 1, kind: input, shape index: {}]   ;;  %s7689_s2 = inlined_call_operand.vmem [shape: f32[1,128], index: 2, kind: input, shape index: {}]   ;;  %s7690_s3 = inlined_call_operand.vmem [shape: f32[1,128], index: 3, kind: input, shape index: {}]   ;;  %s7691_s4 = inlined_call_operand.vmem [shape: f32[1,128], index: 4, kind: input, shape index: {}]   ;;  %s7692_s5 = inlined_call_operand.vmem [shape: f32[1,128], index: 5, kind: input, shape index: {}]   ;;  %s7693_s6 = inlined_call_operand.vmem [shape: f32[128,128], index: 6, kind: input, shape index: {}]   ;;  %s7694_s7 = inlined_call_operand.vmem [shape: f32[16,128], index: 7, kind: input, shape index: {}]   ;;  %s7695_s8 = inlined_call_operand.vmem [shape: f32[1,128], index: 8, kind: input, shape index: {}]   ;;  %s7696_s9 = inlined_call_operand.vmem [shape: f32[128,128], index: 9, kind: input, shape index: {}]   ;;  %s7697_s10 = inlined_call_operand.vmem [shape: f32[128,128], index: 10, kind: input, shape index: {}]   ;;  %s7698_s11 = inlined_call_operand.vmem [shape: f32[128,128], index: 11, kind: input, shape index: {}]   ;;  %s7699_s12 = inlined_call_operand.vmem [shape: f32[1,128], index: 12, kind: input, shape index: {}]   ;;  %s7700_s13 = inlined_call_operand.vmem [shape: f32[512,128], index: 13, kind: output, shape index: {}]  }
   0x1 LB: > { %s4203_s26 = sadd.s32 4294967295, %s5520_s25   ;;  %p4207_p0 = scmp.ge.s32.totalorder %s5520_s25, 1  ;;  %s5520_s25 = sphi %s5596_s25, %s23_s25  }
   0x2   : > { %p388_p1 = scmp.lt.s32.totalorder %s5520_s25, 3 }
   0x4   : > { %p389_p2 = pnand %p4207_p0, %p388_p1 }
   0x6   : > { %392 = sbr.rel (%p389_p2) target bundleno = 1273 (0x4f9), region = 72 }
   0xb   : > { %v477_v0 = vld [vmem:[%s7688_s1 + $0x8] sm:$0xff]  ;;  %v476_v1 = vld [vmem:[%s7688_s1] sm:$0xff]  ;;  %s4208_s14 = sshll.u32 %s4203_s26, 5  ;;  %vm558_vm0 = vcmask 130048   ;;  %s5522_s20 = smov 8  }
   0xc   : > { %4710 = vmatprep.subr.mxu1 %v477_v0  ;;  %4658 = vmatprep.subr.mxu0 %v477_v0  ;;  %p433_p3 = scmp.lt.s32.totalorder %s4208_s14, 63  ;;  %s5523_s21 = smov 16  }
   0xd   : > { %4711 = vmatpush3.msra.mxu1 %v477_v0  ;;  %4659 = vmatpush3.msra.mxu0 %v477_v0  ;;  %s5524_s22 = smov 32   ;;  %s5525_s28 = smov 64  }
   0xe   : > { %4712 = vmatprep.subr.mxu1 %v476_v1  ;;  %s7824_s14 = smov (!%p433_p3, %s4208_s14), 63  ;;  %4660 = vmatprep.subr.mxu0 %v476_v1 }
   0xf   : > { %4713 = vmatpush3.msra.mxu1 %v476_v1  ;;  %4661 = vmatpush3.msra.mxu0 %v476_v1  ;;  %s4209_s15 = sshll.u32 %s7824_s14, 3 }
  0x10   : > { %s5618_s18 = scalar_lea.vmem %s7687_s0, %s4209_s15  ;;  %s7572_s17 = scalar_lea.vmem %s7700_s13, %s4209_s15 }
  0x11   : > { %v444_v2 = vld [vmem:[%s5618_s18] sm:$0xff]  ;;  %v445_v3 = vld [vmem:[%s5618_s18 + $0x8] sm:$0xff]  ;;  %v446_v4 = vld [vmem:[%s5618_s18 + $0x10] sm:$0xff] }
  0x12   : > { %v478_v5 = vpack.c.bf16 %v445_v3, %v444_v2  ;;  %v447_v6 = vld [vmem:[%s5618_s18 + $0x18] sm:$0xff]  ;;  %v448_v7 = vld [vmem:[%s5618_s18 + $0x20] sm:$0xff]  ;;  %v449_v8 = vld [vmem:[%s5618_s18 + $0x28] sm:$0xff] }
  0x13   : > { %v479_v9 = vpack.c.bf16 %v447_v6, %v446_v4  ;;  %v480_v10 = vpack.c.bf16 %v449_v8, %v448_v7  ;;  %v450_v11 = vld [vmem:[%s5618_s18 + $0x30] sm:$0xff]  ;;  %v451_v12 = vld [vmem:[%s5618_s18 + $0x38] sm:$0xff]  ;;  %v452_v22 = vld [vmem:[%s5618_s18 + $0x40] sm:$0xff] }
  0x14   : > { %v494_v13 = vunpack.c.l.bf16 %v478_v5  ;;  %v495_v14 = vunpack.c.h.bf16 %v478_v5  ;;  %v481_v20 = vpack.c.bf16 %v451_v12, %v450_v11  ;;  %v453_v23 = vld [vmem:[%s5618_s18 + $0x48] sm:$0xff]  ;;  %v454_v29 = vld [vmem:[%s5618_s18 + $0x50] sm:$0xff]  ;;  %v455_v30 = vld [vmem:[%s5618_s18 + $0x58] sm:$0xff] }
  0x15   : > { %v496_v15 = vunpack.c.l.bf16 %v479_v9  ;;  %v497_v16 = vunpack.c.h.bf16 %v479_v9  ;;  %v498_v19 = vunpack.c.l.bf16 %v480_v10  ;;  %v499_v25 = vunpack.c.h.bf16 %v480_v10  ;;  %v456_v36 = vld [vmem:[%s5618_s18 + $0x60] sm:$0xff]  ;;  %v457_v37 = vld [vmem:[%s5618_s18 + $0x68] sm:$0xff]  ;;  %v458_v43 = vld [vmem:[%s5618_s18 + $0x70] sm:$0xff] }
  0x16   : > { %4714 = vmatprep.mubr.msk.f32.mxu1 %vm558_vm0, %v494_v13  ;;  %v526_v17 = vsub.f32 %v444_v2, %v494_v13  ;;  %v527_v18 = vsub.f32 %v445_v3, %v495_v14  ;;  %v500_v27 = vunpack.c.l.bf16 %v481_v20  ;;  %v482_v28 = vpack.c.bf16 %v453_v23, %v452_v22  ;;  %v459_v44 = vld [vmem:[%s5618_s18 + $0x78] sm:$0xff]  ;;  %v460_v50 = vld [vmem:[%s5618_s18 + $0x80] sm:$0xff]  ;;  %v461_v51 = vld [vmem:[%s5618_s18 + $0x88] sm:$0xff] }
  0x17   : > { %4715 = vmatmul.mubr.msk.f32.vlgmr.msra.gmra.mxu1 %vm558_vm0, %v495_v14  ;;  %v528_v21 = vsub.f32 %v446_v4, %v496_v15  ;;  %v529_v24 = vsub.f32 %v447_v6, %v497_v16  ;;  %v530_v26 = vsub.f32 %v448_v7, %v498_v19  ;;  %v531_v31 = vsub.f32 %v449_v8, %v499_v25  ;;  %v462_v57 = vld [vmem:[%s5618_s18 + $0x90] sm:$0xff]  ;;  %v463_v58 = vld [vmem:[%s5618_s18 + $0x98] sm:$0xff]  ;;  %v464_v0 = vld [vmem:[%s5618_s18 + $0xa0] sm:$0xff] }
  0x18   : > { %4662 = vmatprep.mubr.msk.f32.mxu0 %vm558_vm0, %v526_v17  ;;  %4717 = vmatprep.mubr.msk.f32.mxu1 %vm558_vm0, %v496_v15  ;;  %v501_v32 = vunpack.c.h.bf16 %v481_v20  ;;  %v532_v33 = vsub.f32 %v450_v11, %v500_v27  ;;  %v502_v34 = vunpack.c.l.bf16 %v482_v28  ;;  %v483_v35 = vpack.c.bf16 %v455_v30, %v454_v29  ;;  %v465_v1 = vld [vmem:[%s5618_s18 + $0xa8] sm:$0xff]  ;;  %v466_v7 = vld [vmem:[%s5618_s18 + $0xb0] sm:$0xff]  ;;  %v467_v8 = vld [vmem:[%s5618_s18 + $0xb8] sm:$0xff] }
  0x19   : > { %4663 = vmatmul.mubr.msk.f32.vlgmr.msra.gmra.mxu0 %vm558_vm0, %v527_v18  ;;  %v503_v39 = vunpack.c.h.bf16 %v482_v28  ;;  %v484_v42 = vpack.c.bf16 %v457_v37, %v456_v36  ;;  %v485_v49 = vpack.c.bf16 %v459_v44, %v458_v43  ;;  %v486_v56 = vpack.c.bf16 %v461_v51, %v460_v50  ;;  %v468_v14 = vld [vmem:[%s5618_s18 + $0xc0] sm:$0xff]  ;;  %v469_v15 = vld [vmem:[%s5618_s18 + $0xc8] sm:$0xff] }
  0x1a   : > { %4665 = vmatprep.mubr.msk.f32.mxu0 %vm558_vm0, %v528_v21  ;;  %v533_v38 = vsub.f32 %v451_v12, %v501_v32  ;;  %v534_v40 = vsub.f32 %v452_v22, %v502_v34  ;;  %v504_v41 = vunpack.c.l.bf16 %v483_v35  ;;  %v505_v46 = vunpack.c.h.bf16 %v483_v35  ;;  %v470_v21 = vld [vmem:[%s5618_s18 + $0xd0] sm:$0xff]  ;;  %v471_v22 = vld [vmem:[%s5618_s18 + $0xd8] sm:$0xff]  ;;  %v472_v28 = vld [vmem:[%s5618_s18 + $0xe0] sm:$0xff] }
  0x1b   : > { %4718 = vmatmul.mubr.msk.f32.gmra.mxu1 %vm558_vm0, %v497_v16  ;;  %v535_v45 = vsub.f32 %v453_v23, %v503_v39  ;;  %v506_v48 = vunpack.c.l.bf16 %v484_v42  ;;  %v507_v53 = vunpack.c.h.bf16 %v484_v42  ;;  %v508_v55 = vunpack.c.l.bf16 %v485_v49  ;;  %v474_v35 = vld [vmem:[%s5618_s18 + $0xf0] sm:$0xff] }
  0x1c   : > { %4720 = vmatprep.mubr.msk.f32.mxu1 %vm558_vm0, %v498_v19  ;;  %v536_v47 = vsub.f32 %v454_v29, %v504_v41  ;;  %v537_v52 = vsub.f32 %v455_v30, %v505_v46  ;;  %v509_v60 = vunpack.c.h.bf16 %v485_v49  ;;  %v510_v62 = vunpack.c.l.bf16 %v486_v56  ;;  %v473_v29 = vld [vmem:[%s5618_s18 + $0xe8] sm:$0xff] }
  0x1d   : > { %4666 = vmatmul.mubr.msk.f32.gmra.mxu0 %vm558_vm0, %v529_v24  ;;  %v538_v54 = vsub.f32 %v456_v36, %v506_v48  ;;  %v539_v59 = vsub.f32 %v457_v37, %v507_v53  ;;  %v540_v61 = vsub.f32 %v458_v43, %v508_v55  ;;  %v487_v63 = vpack.c.bf16 %v463_v58, %v462_v57  ;;  %v475_v36 = vld [vmem:[%s5618_s18 + $0xf8] sm:$0xff] }
  0x1e   : > { %4668 = vmatprep.mubr.msk.f32.mxu0 %vm558_vm0, %v530_v26  ;;  %v541_v2 = vsub.f32 %v459_v44, %v509_v60  ;;  %v511_v3 = vunpack.c.h.bf16 %v486_v56  ;;  %v542_v4 = vsub.f32 %v460_v50, %v510_v62  ;;  %v488_v6 = vpack.c.bf16 %v465_v1, %v464_v0  ;;  %v1980_v50 = vld [vmem:[%s7693_s6 + $0x78] sm:$0xff]  ;;  %v1974_v56 = vld [vmem:[%s7693_s6 + $0x48] sm:$0xff] }
  0x1f   : > { %4721 = vmatmul.mubr.msk.f32.gmra.mxu1 %vm558_vm0, %v499_v25  ;;  %v512_v5 = vunpack.c.l.bf16 %v487_v63  ;;  %v513_v10 = vunpack.c.h.bf16 %v487_v63  ;;  %v489_v13 = vpack.c.bf16 %v467_v8, %v466_v7  ;;  %v490_v20 = vpack.c.bf16 %v469_v15, %v468_v14  ;;  %4842 = vmatprep.subr.mxu1 %v1980_v50  ;;  %v1967_v63 = vld [vmem:[%s7693_s6 + $0x10] sm:$0xff] }
  0x20   : > { %4723 = vmatprep.mubr.msk.f32.mxu1 %vm558_vm0, %v500_v27  ;;  %v543_v9 = vsub.f32 %v461_v51, %v511_v3  ;;  %v514_v12 = vunpack.c.l.bf16 %v488_v6  ;;  %v515_v17 = vunpack.c.h.bf16 %v488_v6  ;;  %v491_v27 = vpack.c.bf16 %v471_v22, %v470_v21  ;;  %4762 = vmatprep.subr.mxu0 %v1980_v50  ;;  %v1979_v51 = vld [vmem:[%s7693_s6 + $0x70] sm:$0xff] }
  0x21   : > { %4669 = vmatmul.mubr.msk.f32.gmra.mxu0 %vm558_vm0, %v531_v31  ;;  %v544_v11 = vsub.f32 %v462_v57, %v512_v5  ;;  %v545_v16 = vsub.f32 %v463_v58, %v513_v10  ;;  %v516_v19 = vunpack.c.l.bf16 %v489_v13  ;;  %v517_v24 = vunpack.c.h.bf16 %v489_v13  ;;  %4843 = vmatpush3.msra.mxu1 %v1980_v50  ;;  %v1973_v57 = vld [vmem:[%s7693_s6 + $0x40] sm:$0xff]  ;;  %v1972_v58 = vld [vmem:[%s7693_s6 + $0x38] sm:$0xff] }
  0x22   : > { %4671 = vmatprep.mubr.msk.f32.mxu0 %vm558_vm0, %v532_v33  ;;  %v546_v18 = vsub.f32 %v464_v0, %v514_v12  ;;  %v547_v23 = vsub.f32 %v465_v1, %v515_v17  ;;  %v518_v26 = vunpack.c.l.bf16 %v490_v20  ;;  %v519_v31 = vunpack.c.h.bf16 %v490_v20  ;;  %4763 = vmatpush3.msra.mxu0 %v1980_v50  ;;  %v1966_v0 = vld [vmem:[%s7693_s6 + $0x8] sm:$0xff]  ;;  %v1965_v1 = vld [vmem:[%s7693_s6] sm:$0xff] }
  0x23   : > { %4724 = vmatmul.mubr.msk.f32.gmra.mxu1 %vm558_vm0, %v501_v32  ;;  %v548_v25 = vsub.f32 %v466_v7, %v516_v19  ;;  %v549_v30 = vsub.f32 %v467_v8, %v517_v24  ;;  %v520_v33 = vunpack.c.l.bf16 %v491_v27  ;;  %4844 = vmatprep.subr.mxu1 %v1979_v51 }
  0x24   : > { %4726 = vmatprep.mubr.msk.f32.mxu1 %vm558_vm0, %v502_v34  ;;  %v550_v32 = vsub.f32 %v468_v14, %v518_v26  ;;  %v492_v34 = vpack.c.bf16 %v473_v29, %v472_v28  ;;  %v551_v37 = vsub.f32 %v469_v15, %v519_v31  ;;  %4764 = vmatprep.subr.mxu0 %v1979_v51 }
  0x25   : > { %4672 = vmatmul.mubr.msk.f32.gmra.mxu0 %vm558_vm0, %v533_v38  ;;  %v521_v38 = vunpack.c.h.bf16 %v491_v27  ;;  %4845 = vmatpush3.msra.mxu1 %v1979_v51 }
  0x26   : > { %4674 = vmatprep.mubr.msk.f32.mxu0 %vm558_vm0, %v534_v40  ;;  %v522_v40 = vunpack.c.l.bf16 %v492_v34  ;;  %v523_v43 = vunpack.c.h.bf16 %v492_v34  ;;  %4765 = vmatpush3.msra.mxu0 %v1979_v51 }
  0x27   : > { %4727 = vmatmul.mubr.msk.f32.gmra.mxu1 %vm558_vm0, %v503_v39  ;;  %v552_v39 = vsub.f32 %v470_v21, %v520_v33  ;;  %v553_v42 = vsub.f32 %v471_v22, %v521_v38 }
  0x28   : > { %4729 = vmatprep.mubr.msk.f32.mxu1 %vm558_vm0, %v504_v41  ;;  %v493_v41 = vpack.c.bf16 %v475_v36, %v474_v35  ;;  %v554_v44 = vsub.f32 %v472_v28, %v522_v40 }
  0x29   : > { %4675 = vmatmul.mubr.msk.f32.gmra.mxu0 %vm558_vm0, %v535_v45 }
  0x2a   : > { %4677 = vmatprep.mubr.msk.f32.mxu0 %vm558_vm0, %v536_v47  ;;  %v524_v45 = vunpack.c.l.bf16 %v493_v41  ;;  %v525_v47 = vunpack.c.h.bf16 %v493_v41 }
  0x2b   : > { %4730 = vmatmul.mubr.msk.f32.gmra.mxu1 %vm558_vm0, %v505_v46  ;;  %v555_v46 = vsub.f32 %v473_v29, %v523_v43 }
  0x2c   : > { %4732 = vmatprep.mubr.msk.f32.mxu1 %vm558_vm0, %v506_v48  ;;  %v556_v48 = vsub.f32 %v474_v35, %v524_v45  ;;  %v557_v49 = vsub.f32 %v475_v36, %v525_v47 }
  0x2d   : > { %4678 = vmatmul.mubr.msk.f32.gmra.mxu0 %vm558_vm0, %v537_v52  ;;  %v1978_v52 = vld [vmem:[%s7693_s6 + $0x68] sm:$0xff] }
  0x2e   : > { %4680 = vmatprep.mubr.msk.f32.mxu0 %vm558_vm0, %v538_v54  ;;  %4846 = vmatprep.subr.mxu1 %v1978_v52  ;;  %v1976_v54 = vld [vmem:[%s7693_s6 + $0x58] sm:$0xff] }
  0x2f   : > { %4733 = vmatmul.mubr.msk.f32.gmra.mxu1 %vm558_vm0, %v507_v53  ;;  %4766 = vmatprep.subr.mxu0 %v1978_v52  ;;  %v1977_v53 = vld [vmem:[%s7693_s6 + $0x60] sm:$0xff] }
  0x30   : > { %4735 = vmatprep.mubr.msk.f32.mxu1 %vm558_vm0, %v508_v55  ;;  %4847 = vmatpush3.msra.mxu1 %v1978_v52  ;;  %v1975_v55 = vld [vmem:[%s7693_s6 + $0x50] sm:$0xff] }
  0x31   : > { %4681 = vmatmul.mubr.msk.f32.gmra.mxu0 %vm558_vm0, %v539_v59  ;;  %4848 = vmatprep.subr.mxu1 %v1977_v53  ;;  %v1971_v59 = vld [vmem:[%s7693_s6 + $0x30] sm:$0xff] }
  0x32   : > { %4683 = vmatprep.mubr.msk.f32.mxu0 %vm558_vm0, %v540_v61  ;;  %4767 = vmatpush3.msra.mxu0 %v1978_v52  ;;  %v1969_v61 = vld [vmem:[%s7693_s6 + $0x20] sm:$0xff] }
  0x33   : > { %4736 = vmatmul.mubr.msk.f32.gmra.mxu1 %vm558_vm0, %v509_v60  ;;  %4768 = vmatprep.subr.mxu0 %v1977_v53  ;;  %v1970_v60 = vld [vmem:[%s7693_s6 + $0x28] sm:$0xff] }
  0x34   : > { %4738 = vmatprep.mubr.msk.f32.mxu1 %vm558_vm0, %v510_v62  ;;  %4849 = vmatpush3.msra.mxu1 %v1977_v53  ;;  %v1968_v62 = vld [vmem:[%s7693_s6 + $0x18] sm:$0xff] }
  0x35   : > { %4684 = vmatmul.mubr.msk.f32.gmra.mxu0 %vm558_vm0, %v541_v2  ;;  %4850 = vmatprep.subr.mxu1 %v1976_v54 }
  0x36   : > { %4686 = vmatprep.mubr.msk.f32.mxu0 %vm558_vm0, %v542_v4  ;;  %4769 = vmatpush3.msra.mxu0 %v1977_v53  ;;  %v5767_v4 = vld [vmem:[%s7689_s2] ss:$0 sm:$0xff] }
  0x37   : > { %4739 = vmatmul.mubr.msk.f32.gmra.mxu1 %vm558_vm0, %v511_v3  ;;  %4770 = vmatprep.subr.mxu0 %v1976_v54 }
  0x38   : > { %4741 = vmatprep.mubr.msk.f32.mxu1 %vm558_vm0, %v512_v5  ;;  %4851 = vmatpush3.msra.mxu1 %v1976_v54 }
  0x39   : > { %4687 = vmatmul.mubr.msk.f32.gmra.mxu0 %vm558_vm0, %v543_v9  ;;  %4852 = vmatprep.subr.mxu1 %v1975_v55 }
  0x3a   : > { %4689 = vmatprep.mubr.msk.f32.mxu0 %vm558_vm0, %v544_v11  ;;  %4771 = vmatpush3.msra.mxu0 %v1976_v54 }
  0x3b   : > { %4742 = vmatmul.mubr.msk.f32.gmra.mxu1 %vm558_vm0, %v513_v10  ;;  %4772 = vmatprep.subr.mxu0 %v1975_v55 }
  0x3c   : > { %4744 = vmatprep.mubr.msk.f32.mxu1 %vm558_vm0, %v514_v12  ;;  %4853 = vmatpush3.msra.mxu1 %v1975_v55 }
  0x3d   : > { %4690 = vmatmul.mubr.msk.f32.gmra.mxu0 %vm558_vm0, %v545_v16  ;;  %4854 = vmatprep.subr.mxu1 %v1974_v56  ;;  %v5774_v16 = vld [vmem:[%s7690_s3] ss:$0 sm:$0xff] }
  0x3e   : > { %4692 = vmatprep.mubr.msk.f32.mxu0 %vm558_vm0, %v546_v18  ;;  %4773 = vmatpush3.msra.mxu0 %v1975_v55 }
  0x3f   : > { %4745 = vmatmul.mubr.msk.f32.gmra.mxu1 %vm558_vm0, %v515_v17  ;;  %4774 = vmatprep.subr.mxu0 %v1974_v56 }
  0x40   : > { %4747 = vmatprep.mubr.msk.f32.mxu1 %vm558_vm0, %v516_v19  ;;  %4855 = vmatpush3.msra.mxu1 %v1974_v56 }
  0x41   : > { %4693 = vmatmul.mubr.msk.f32.gmra.mxu0 %vm558_vm0, %v547_v23  ;;  %4856 = vmatprep.subr.mxu1 %v1973_v57 }
  0x42   : > { %4695 = vmatprep.mubr.msk.f32.mxu0 %vm558_vm0, %v548_v25  ;;  %4775 = vmatpush3.msra.mxu0 %v1974_v56 }
  0x43   : > { %4748 = vmatmul.mubr.msk.f32.gmra.mxu1 %vm558_vm0, %v517_v24  ;;  %4776 = vmatprep.subr.mxu0 %v1973_v57 }
  0x44   : > { %4750 = vmatprep.mubr.msk.f32.mxu1 %vm558_vm0, %v518_v26  ;;  %4857 = vmatpush3.msra.mxu1 %v1973_v57 }
  0x45   : > { %4696 = vmatmul.mubr.msk.f32.gmra.mxu0 %vm558_vm0, %v549_v30  ;;  %4858 = vmatprep.subr.mxu1 %v1972_v58 }
  0x46   : > { %4698 = vmatprep.mubr.msk.f32.mxu0 %vm558_vm0, %v550_v32  ;;  %4777 = vmatpush3.msra.mxu0 %v1973_v57 }
  0x47   : > { %4751 = vmatmul.mubr.msk.f32.gmra.mxu1 %vm558_vm0, %v519_v31  ;;  %4778 = vmatprep.subr.mxu0 %v1972_v58 }
  0x48   : > { %4753 = vmatprep.mubr.msk.f32.mxu1 %vm558_vm0, %v520_v33  ;;  %4859 = vmatpush3.msra.mxu1 %v1972_v58 }
  0x49   : > { %4699 = vmatmul.mubr.msk.f32.gmra.mxu0 %vm558_vm0, %v551_v37  ;;  %4860 = vmatprep.subr.mxu1 %v1971_v59 }
  0x4a   : > { %4701 = vmatprep.mubr.msk.f32.mxu0 %vm558_vm0, %v552_v39  ;;  %4779 = vmatpush3.msra.mxu0 %v1972_v58 }
  0x4b   : > { %4754 = vmatmul.mubr.msk.f32.gmra.mxu1 %vm558_vm0, %v521_v38  ;;  %4780 = vmatprep.subr.mxu0 %v1971_v59 }
  0x4c   : > { %4756 = vmatprep.mubr.msk.f32.mxu1 %vm558_vm0, %v522_v40  ;;  %4861 = vmatpush3.msra.mxu1 %v1971_v59 }
  0x4d   : > { %4702 = vmatmul.mubr.msk.f32.gmra.mxu0 %vm558_vm0, %v553_v42  ;;  %4862 = vmatprep.subr.mxu1 %v1970_v60 }
  0x4e   : > { %4704 = vmatprep.mubr.msk.f32.mxu0 %vm558_vm0, %v554_v44  ;;  %4781 = vmatpush3.msra.mxu0 %v1971_v59 }
  0x4f   : > { %4757 = vmatmul.mubr.msk.f32.gmra.mxu1 %vm558_vm0, %v523_v43  ;;  %4782 = vmatprep.subr.mxu0 %v1970_v60 }
  0x50   : > { %4759 = vmatprep.mubr.msk.f32.mxu1 %vm558_vm0, %v524_v45  ;;  %4863 = vmatpush3.msra.mxu1 %v1970_v60 }
  0x51   : > { %4705 = vmatmul.mubr.msk.f32.gmra.mxu0 %vm558_vm0, %v555_v46  ;;  %4864 = vmatprep.subr.mxu1 %v1969_v61 }
  0x52   : > { %4707 = vmatprep.mubr.msk.f32.mxu0 %vm558_vm0, %v556_v48  ;;  %4783 = vmatpush3.msra.mxu0 %v1970_v60 }
  0x53   : > { %4760 = vmatmul.mubr.msk.f32.gmra.mxu1 %vm558_vm0, %v525_v47  ;;  %4784 = vmatprep.subr.mxu0 %v1969_v61 }
  0x54   : > { %4865 = vmatpush3.msra.mxu1 %v1969_v61  ;;  %4785 = vmatpush3.msra.mxu0 %v1969_v61 }
  0x55   : > { %4708 = vmatmul.mubr.msk.f32.gmra.mxu0 %vm558_vm0, %v557_v49  ;;  %4866 = vmatprep.subr.mxu1 %v1968_v62 }
  0x56   : > { %4786 = vmatprep.subr.mxu0 %v1968_v62  ;;  %4867 = vmatpush3.msra.mxu1 %v1968_v62 }
  0x57   : > { %4787 = vmatpush3.msra.mxu0 %v1968_v62  ;;  %4868 = vmatprep.subr.mxu1 %v1967_v63 }
  0x58   : > { %4788 = vmatprep.subr.mxu0 %v1967_v63  ;;  %4869 = vmatpush3.msra.mxu1 %v1967_v63 }
  0x59   : > { %4789 = vmatpush3.msra.mxu0 %v1967_v63  ;;  %4870 = vmatprep.subr.mxu1 %v1966_v0 }
  0x5a   : > { %4790 = vmatprep.subr.mxu0 %v1966_v0  ;;  %4871 = vmatpush3.msra.mxu1 %v1966_v0 }
  0x5b   : > { %4791 = vmatpush3.msra.mxu0 %v1966_v0  ;;  %4872 = vmatprep.subr.mxu1 %v1965_v1 }
  0x5c   : > { %4792 = vmatprep.subr.mxu0 %v1965_v1  ;;  %4873 = vmatpush3.msra.mxu1 %v1965_v1 }
  0x5d   : > { %4793 = vmatpush3.msra.mxu0 %v1965_v1 }
  0xd7   : > { %v4716_v2 = vpop.f32.mrf.mxu1 }
  0xd9   : > { %v4664_v3 = vpop.f32.mrf.mxu0  ;;  %v1042_v5 = vpop.f32.mrf.mxu1 }
  0xda   : > { %v1048_v6 = vadd.f32 %v4716_v2, %v4664_v3 }
  0xdb   : > { %v721_v7 = vpop.f32.mrf.mxu0  ;;  %v4719_v8 = vpop.f32.mrf.mxu1 }
  0xdc   : > { %v1209_v9 = vsub.f32 %v1048_v6, %v5767_v4  ;;  %v1043_v10 = vadd.f32 %v1042_v5, %v721_v7 }
  0xdd   : > { %v4667_v11 = vpop.f32.mrf.mxu0  ;;  %v1052_v12 = vpop.f32.mrf.mxu1 }
  0xde   : > { %v1241_v13 = vmul.f32 %v1209_v9, %v1209_v9  ;;  %v1208_v14 = vsub.f32 %v1043_v10, %v5767_v4  ;;  %v1058_v15 = vadd.f32 %v4719_v8, %v4667_v11 }
  0xdf   : > { %v731_v17 = vpop.f32.mrf.mxu0  ;;  %v4722_v18 = vpop.f32.mrf.mxu1 }
  0xe0   : > { %v1273_v19 = vsub.f32 0.0, %v1241_v13  ;;  %v1240_v20 = vmul.f32 %v1208_v14, %v1208_v14  ;;  %v1211_v21 = vsub.f32 %v1058_v15, %v5767_v4  ;;  %v1053_v22 = vadd.f32 %v1052_v12, %v731_v17 }
  0xe1   : > { %v4670_v23 = vpop.f32.mrf.mxu0  ;;  %v1062_v24 = vpop.f32.mrf.mxu1 }
  0xe2   : > { %v1312_v25 = vmul.f32 %v5774_v16, %v1273_v19  ;;  %v1272_v26 = vsub.f32 0.0, %v1240_v20  ;;  %v1243_v27 = vmul.f32 %v1211_v21, %v1211_v21  ;;  %v1210_v28 = vsub.f32 %v1053_v22, %v5767_v4 }
  0xe3   : > { %v1068_v29 = vadd.f32 %v4722_v18, %v4670_v23  ;;  %v741_v30 = vpop.f32.mrf.mxu0  ;;  %v4725_v31 = vpop.f32.mrf.mxu1 }
  0xe4   : > { %v1345_v32 = vmul.f32 1.442695, %v1312_v25  ;;  %v1311_v33 = vmul.f32 %v5774_v16, %v1272_v26  ;;  %v1275_v34 = vsub.f32 0.0, %v1243_v27  ;;  %v1242_v35 = vmul.f32 %v1210_v28, %v1210_v28 }
  0xe5   : > { %v1213_v36 = vsub.f32 %v1068_v29, %v5767_v4  ;;  %v1063_v37 = vadd.f32 %v1062_v24, %v741_v30  ;;  %v4673_v38 = vpop.f32.mrf.mxu0  ;;  %v1072_v39 = vpop.f32.mrf.mxu1  ;;  %v5797_v30 = vld [vmem:[%s7691_s4] ss:$0 sm:$0xff] }
  0xe6   : > { %5226 = vpow2.f32 %v1345_v32  ;;  %v1314_v40 = vmul.f32 %v5774_v16, %v1275_v34  ;;  %v1274_v41 = vsub.f32 0.0, %v1242_v35  ;;  %v1343_v42 = vmul.f32 1.442695, %v1311_v33 }
  0xe7   : > { %v1245_v43 = vmul.f32 %v1213_v36, %v1213_v36  ;;  %v1212_v44 = vsub.f32 %v1063_v37, %v5767_v4  ;;  %v1078_v45 = vadd.f32 %v4725_v31, %v4673_v38  ;;  %v751_v46 = vpop.f32.mrf.mxu0  ;;  %v4728_v47 = vpop.f32.mrf.mxu1 }
  0xe8   : > { %v1349_v48 = vmul.f32 1.442695, %v1314_v40  ;;  %v1313_v49 = vmul.f32 %v5774_v16, %v1274_v41  ;;  %v1073_v50 = vadd.f32 %v1072_v39, %v751_v46  ;;  %5228 = vpow2.f32 %v1343_v42  ;;  %v5804_v39 = vld [vmem:[%s7692_s5] ss:$0 sm:$0xff] }
  0xe9   : > { %v1277_v51 = vsub.f32 0.0, %v1245_v43  ;;  %v1244_v52 = vmul.f32 %v1212_v44, %v1212_v44  ;;  %v1215_v53 = vsub.f32 %v1078_v45, %v5767_v4  ;;  %v4676_v54 = vpop.f32.mrf.mxu0  ;;  %v1082_v55 = vpop.f32.mrf.mxu1 }
  0xea   : > { %v1347_v56 = vmul.f32 1.442695, %v1313_v49  ;;  %v1214_v57 = vsub.f32 %v1073_v50, %v5767_v4  ;;  %v1088_v58 = vadd.f32 %v4728_v47, %v4676_v54  ;;  %5230 = vpow2.f32 %v1349_v48 }
  0xeb   : > { %v1316_v59 = vmul.f32 %v5774_v16, %v1277_v51  ;;  %v1276_v60 = vsub.f32 0.0, %v1244_v52  ;;  %v1247_v61 = vmul.f32 %v1215_v53, %v1215_v53  ;;  %v761_v62 = vpop.f32.mrf.mxu0  ;;  %v4731_v63 = vpop.f32.mrf.mxu1 }
  0xec   : > { %v1246_v0 = vmul.f32 %v1214_v57, %v1214_v57  ;;  %v1217_v1 = vsub.f32 %v1088_v58, %v5767_v4  ;;  %v1083_v2 = vadd.f32 %v1082_v55, %v761_v62  ;;  %5232 = vpow2.f32 %v1347_v56 }
  0xed   : > { %v1353_v3 = vmul.f32 1.442695, %v1316_v59  ;;  %v1315_v5 = vmul.f32 %v5774_v16, %v1276_v60  ;;  %v1279_v6 = vsub.f32 0.0, %v1247_v61  ;;  %v4679_v7 = vpop.f32.mrf.mxu0  ;;  %v1092_v8 = vpop.f32.mrf.mxu1 }
  0xee   : > { %v1278_v9 = vsub.f32 0.0, %v1246_v0  ;;  %v1249_v10 = vmul.f32 %v1217_v1, %v1217_v1  ;;  %v1216_v11 = vsub.f32 %v1083_v2, %v5767_v4  ;;  %v1098_v12 = vadd.f32 %v4731_v63, %v4679_v7 }
  0xef   : > { %5234 = vpow2.f32 %v1353_v3  ;;  %v1351_v13 = vmul.f32 1.442695, %v1315_v5  ;;  %v1318_v14 = vmul.f32 %v5774_v16, %v1279_v6  ;;  %v771_v15 = vpop.f32.mrf.mxu0  ;;  %v4734_v17 = vpop.f32.mrf.mxu1 }
  0xf0   : > { %v1317_v18 = vmul.f32 %v5774_v16, %v1278_v9  ;;  %v1281_v19 = vsub.f32 0.0, %v1249_v10  ;;  %v1248_v20 = vmul.f32 %v1216_v11, %v1216_v11  ;;  %v1219_v21 = vsub.f32 %v1098_v12, %v5767_v4 }
  0xf1   : > { %5236 = vpow2.f32 %v1351_v13  ;;  %v1357_v22 = vmul.f32 1.442695, %v1318_v14  ;;  %v1093_v23 = vadd.f32 %v1092_v8, %v771_v15  ;;  %v4682_v24 = vpop.f32.mrf.mxu0  ;;  %v1102_v25 = vpop.f32.mrf.mxu1 }
  0xf2   : > { %v1355_v26 = vmul.f32 1.442695, %v1317_v18  ;;  %v1320_v27 = vmul.f32 %v5774_v16, %v1281_v19  ;;  %v1280_v28 = vsub.f32 0.0, %v1248_v20  ;;  %v1251_v29 = vmul.f32 %v1219_v21, %v1219_v21 }
  0xf3   : > { %v5227_v31 = vpop.eup %5226  ;;  %5238 = vpow2.f32 %v1357_v22  ;;  %v1218_v32 = vsub.f32 %v1093_v23, %v5767_v4  ;;  %v1108_v33 = vadd.f32 %v4734_v17, %v4682_v24  ;;  %v781_v34 = vpop.f32.mrf.mxu0 }
  0xf4   : > { %v4737_v35 = vpop.f32.mrf.mxu1  ;;  %5240 = vpow2.f32 %v1355_v26  ;;  %v1361_v36 = vmul.f32 1.442695, %v1320_v27  ;;  %v1319_v37 = vmul.f32 %v5774_v16, %v1280_v28  ;;  %v1283_v38 = vsub.f32 0.0, %v1251_v29 }
  0xf5   : > { %v1250_v40 = vmul.f32 %v1218_v32, %v1218_v32  ;;  %v1221_v41 = vsub.f32 %v1108_v33, %v5767_v4  ;;  %v1103_v42 = vadd.f32 %v1102_v25, %v781_v34  ;;  %v4685_v43 = vpop.f32.mrf.mxu0  ;;  %v1415_v45 = vmul.f32 %v5227_v31, %v5797_v30  ;;  %v5229_v55 = vpop.eup %5228 }
  0xf6   : > { %v1112_v44 = vpop.f32.mrf.mxu1  ;;  %5242 = vpow2.f32 %v1361_v36  ;;  %v1359_v46 = vmul.f32 1.442695, %v1319_v37  ;;  %v1322_v47 = vmul.f32 %v5774_v16, %v1283_v38  ;;  %v1118_v48 = vadd.f32 %v4737_v35, %v4685_v43 }
  0xf7   : > { %v1282_v49 = vsub.f32 0.0, %v1250_v40  ;;  %v1253_v50 = vmul.f32 %v1221_v41, %v1221_v41  ;;  %v1220_v51 = vsub.f32 %v1103_v42, %v5767_v4  ;;  %v791_v52 = vpop.f32.mrf.mxu0  ;;  %v1454_v54 = vadd.f32 %v5804_v39, %v1415_v45  ;;  %v5812_v59 = vpop.eup %5230 }
  0xf8   : > { %v4740_v53 = vpop.f32.mrf.mxu1  ;;  %5244 = vpow2.f32 %v1359_v46  ;;  %v1365_v56 = vmul.f32 1.442695, %v1322_v47  ;;  %v1223_v57 = vsub.f32 %v1118_v48, %v5767_v4  ;;  %v1113_v58 = vadd.f32 %v1112_v44, %v791_v52 }
  0xf9   : > { %v1321_v60 = vmul.f32 %v5774_v16, %v1282_v49  ;;  %v1285_v61 = vsub.f32 0.0, %v1253_v50  ;;  %v1252_v62 = vmul.f32 %v1220_v51, %v1220_v51  ;;  %v4688_v63 = vpop.f32.mrf.mxu0  ;;  %v1486_v1 = vadd.f32 1e-10, %v1454_v54  ;;  %v5815_v2 = vpop.eup %5232 }
  0xfa   : > { %v1122_v0 = vpop.f32.mrf.mxu1  ;;  %5246 = vpow2.f32 %v1365_v56  ;;  %v1255_v3 = vmul.f32 %v1223_v57, %v1223_v57  ;;  %v1222_v5 = vsub.f32 %v1113_v58, %v5767_v4  ;;  %v1128_v6 = vadd.f32 %v4740_v53, %v4688_v63 }
  0xfb   : > { %v1363_v7 = vmul.f32 1.442695, %v1321_v60  ;;  %v1324_v8 = vmul.f32 %v5774_v16, %v1285_v61  ;;  %v1284_v9 = vsub.f32 0.0, %v1252_v62  ;;  %v801_v10 = vpop.f32.mrf.mxu0  ;;  %5248 = vlog2.f32 %v1486_v1 }
  0xfc   : > { %v4743_v11 = vpop.f32.mrf.mxu1  ;;  %v5819_v12 = vpop.eup %5234  ;;  %v1287_v13 = vsub.f32 0.0, %v1255_v3  ;;  %v1254_v14 = vmul.f32 %v1222_v5, %v1222_v5  ;;  %v1225_v15 = vsub.f32 %v1128_v6, %v5767_v4  ;;  %v1123_v17 = vadd.f32 %v1122_v0, %v801_v10 }
  0xfd   : > { %5250 = vpow2.f32 %v1363_v7  ;;  %v1369_v18 = vmul.f32 1.442695, %v1324_v8  ;;  %v1323_v19 = vmul.f32 %v5774_v16, %v1284_v9  ;;  %v4691_v20 = vpop.f32.mrf.mxu0  ;;  %v1414_v22 = vmul.f32 %v5229_v55, %v5797_v30 }
  0xfe   : > { %v1132_v21 = vpop.f32.mrf.mxu1  ;;  %v5824_v23 = vpop.eup %5236  ;;  %v1326_v24 = vmul.f32 %v5774_v16, %v1287_v13  ;;  %v1286_v25 = vsub.f32 0.0, %v1254_v14  ;;  %v1257_v26 = vmul.f32 %v1225_v15, %v1225_v15  ;;  %v1224_v27 = vsub.f32 %v1123_v17, %v5767_v4 }
  0xff   : > { %5252 = vpow2.f32 %v1369_v18  ;;  %v1367_v28 = vmul.f32 1.442695, %v1323_v19  ;;  %v1138_v29 = vadd.f32 %v4743_v11, %v4691_v20  ;;  %v811_v31 = vpop.f32.mrf.mxu0  ;;  %v1453_v33 = vadd.f32 %v5804_v39, %v1414_v22 }
 0x100   : > { %v4746_v32 = vpop.f32.mrf.mxu1  ;;  %v5829_v34 = vpop.eup %5238  ;;  %v1373_v35 = vmul.f32 1.442695, %v1326_v24  ;;  %v1325_v36 = vmul.f32 %v5774_v16, %v1286_v25  ;;  %v1289_v37 = vsub.f32 0.0, %v1257_v26  ;;  %v1256_v38 = vmul.f32 %v1224_v27, %v1224_v27 }
 0x101   : > { %v5832_v40 = vpop.eup %5240  ;;  %5254 = vpow2.f32 %v1367_v28  ;;  %v1227_v41 = vsub.f32 %v1138_v29, %v5767_v4  ;;  %v1133_v42 = vadd.f32 %v1132_v21, %v811_v31  ;;  %v4694_v43 = vpop.f32.mrf.mxu0  ;;  %v1485_v45 = vadd.f32 1e-10, %v1453_v33 }
 0x102   : > { %v1142_v44 = vpop.f32.mrf.mxu1  ;;  %5256 = vpow2.f32 %v1373_v35  ;;  %v1371_v46 = vmul.f32 1.442695, %v1325_v36  ;;  %v1328_v47 = vmul.f32 %v5774_v16, %v1289_v37  ;;  %v1288_v48 = vsub.f32 0.0, %v1256_v38 }
 0x103   : > { %v5836_v49 = vpop.eup %5242  ;;  %v1259_v50 = vmul.f32 %v1227_v41, %v1227_v41  ;;  %v1226_v51 = vsub.f32 %v1133_v42, %v5767_v4  ;;  %v1148_v52 = vadd.f32 %v4746_v32, %v4694_v43  ;;  %v821_v53 = vpop.f32.mrf.mxu0  ;;  %5258 = vlog2.f32 %v1485_v45 }
 0x104   : > { %v4749_v54 = vpop.f32.mrf.mxu1  ;;  %5260 = vpow2.f32 %v1371_v46  ;;  %v1377_v55 = vmul.f32 1.442695, %v1328_v47  ;;  %v1327_v56 = vmul.f32 %v5774_v16, %v1288_v48  ;;  %v1143_v57 = vadd.f32 %v1142_v44, %v821_v53 }
 0x105   : > { %v5840_v58 = vpop.eup %5244  ;;  %v1291_v60 = vsub.f32 0.0, %v1259_v50  ;;  %v1258_v61 = vmul.f32 %v1226_v51, %v1226_v51  ;;  %v1229_v62 = vsub.f32 %v1148_v52, %v5767_v4  ;;  %v4697_v63 = vpop.f32.mrf.mxu0  ;;  %v1417_v1 = vmul.f32 %v5812_v59, %v5797_v30 }
 0x106   : > { %v1152_v0 = vpop.f32.mrf.mxu1  ;;  %5262 = vpow2.f32 %v1377_v55  ;;  %v1375_v3 = vmul.f32 1.442695, %v1327_v56  ;;  %v1228_v5 = vsub.f32 %v1143_v57, %v5767_v4  ;;  %v1158_v6 = vadd.f32 %v4749_v54, %v4697_v63 }
 0x107   : > { %v5846_v7 = vpop.eup %5246  ;;  %v1330_v8 = vmul.f32 %v5774_v16, %v1291_v60  ;;  %v1290_v9 = vsub.f32 0.0, %v1258_v61  ;;  %v1261_v10 = vmul.f32 %v1229_v62, %v1229_v62  ;;  %v831_v11 = vpop.f32.mrf.mxu0  ;;  %v1456_v14 = vadd.f32 %v5804_v39, %v1417_v1 }
 0x108   : > { %v4752_v13 = vpop.f32.mrf.mxu1  ;;  %v5249_v15 = vpop.eup %5248  ;;  %5264 = vpow2.f32 %v1375_v3  ;;  %v1260_v17 = vmul.f32 %v1228_v5, %v1228_v5  ;;  %v1231_v59 = vsub.f32 %v1158_v6, %v5767_v4  ;;  %v1153_v18 = vadd.f32 %v1152_v0, %v831_v11 }
 0x109   : > { %v1381_v19 = vmul.f32 1.442695, %v1330_v8  ;;  %v1329_v20 = vmul.f32 %v5774_v16, %v1290_v9  ;;  %v1293_v21 = vsub.f32 0.0, %v1261_v10  ;;  %v4700_v22 = vpop.f32.mrf.mxu0  ;;  %v5852_v24 = vmul.f32 0.6931472, %v5249_v15 }
 0x10a   : > { %v1162_v25 = vpop.f32.mrf.mxu1  ;;  %v5854_v26 = vpop.eup %5250  ;;  %v1292_v27 = vsub.f32 0.0, %v1260_v17  ;;  %v1263_v28 = vmul.f32 %v1231_v59, %v1231_v59  ;;  %v1230_v29 = vsub.f32 %v1153_v18, %v5767_v4  ;;  %v1168_v31 = vadd.f32 %v4752_v13, %v4700_v22 }
 0x10b   : > { %5266 = vpow2.f32 %v1381_v19  ;;  %v1379_v32 = vmul.f32 1.442695, %v1329_v20  ;;  %v1332_v33 = vmul.f32 %v5774_v16, %v1293_v21  ;;  %1583 = vrot.lane.b32.xlu0 %v5852_v24, %s5522_s20  ;;  %v841_v35 = vpop.f32.mrf.mxu0  ;;  %v1488_v37 = vadd.f32 1e-10, %v1456_v14 }
 0x10c   : > { %v4755_v36 = vpop.f32.mrf.mxu1  ;;  %v5860_v38 = vpop.eup %5252  ;;  %v1331_v41 = vmul.f32 %v5774_v16, %v1292_v27  ;;  %v1295_v42 = vsub.f32 0.0, %v1263_v28  ;;  %v1262_v43 = vmul.f32 %v1230_v29, %v1230_v29  ;;  %v1233_v44 = vsub.f32 %v1168_v31, %v5767_v4 }
 0x10d   : > { %5268 = vpow2.f32 %v1379_v32  ;;  %v1385_v45 = vmul.f32 1.442695, %v1332_v33  ;;  %v1163_v46 = vadd.f32 %v1162_v25, %v841_v35  ;;  %v4703_v47 = vpop.f32.mrf.mxu0  ;;  %v1416_v50 = vmul.f32 %v5815_v2, %v5797_v30 }
 0x10e   : > { %v1172_v48 = vpop.f32.mrf.mxu1  ;;  %v5866_v51 = vpop.eup %5254  ;;  %v1383_v52 = vmul.f32 1.442695, %v1331_v41  ;;  %v1334_v53 = vmul.f32 %v5774_v16, %v1295_v42  ;;  %v1294_v54 = vsub.f32 0.0, %v1262_v43  ;;  %v1265_v55 = vmul.f32 %v1233_v44, %v1233_v44 }
 0x10f   : > { %v5869_v56 = vpop.eup %5256  ;;  %5270 = vpow2.f32 %v1385_v45  ;;  %v1232_v57 = vsub.f32 %v1163_v46, %v5767_v4  ;;  %v1178_v60 = vadd.f32 %v4755_v36, %v4703_v47  ;;  %v851_v61 = vpop.f32.mrf.mxu0  ;;  %v1455_v63 = vadd.f32 %v5804_v39, %v1416_v50 }
 0x110   : > { %v4758_v62 = vpop.f32.mrf.mxu1  ;;  %v5259_v0 = vpop.eup %5258  ;;  %5272 = vpow2.f32 %v1383_v52  ;;  %v1389_v2 = vmul.f32 1.442695, %v1334_v53  ;;  %v1333_v1 = vmul.f32 %v5774_v16, %v1294_v54  ;;  %v1297_v3 = vsub.f32 0.0, %v1265_v55 }
 0x111   : > { %v5874_v5 = vpop.eup %5260  ;;  %v1264_v6 = vmul.f32 %v1232_v57, %v1232_v57  ;;  %v1235_v8 = vsub.f32 %v1178_v60, %v5767_v4  ;;  %v5877_v9 = vmul.f32 0.6931472, %v5259_v0  ;;  %5274 = vlog2.f32 %v1488_v37  ;;  %v4706_v10 = vpop.f32.mrf.mxu0 }
 0x112   : > { %v1182_v11 = vpop.f32.mrf.mxu1  ;;  %5276 = vpow2.f32 %v1389_v2  ;;  %v1387_v13 = vmul.f32 1.442695, %v1333_v1  ;;  %v1336_v14 = vmul.f32 %v5774_v16, %v1297_v3  ;;  %v1173_v15 = vadd.f32 %v1172_v48, %v851_v61 }
 0x113   : > { %v5880_v17 = vpop.eup %5262  ;;  %v1296_v59 = vsub.f32 0.0, %v1264_v6  ;;  %v1267_v18 = vmul.f32 %v1235_v8, %v1235_v8  ;;  %1581 = vrot.lane.b32.xlu0 %v5877_v9, %s5522_s20  ;;  %v1981_v19 = vpack.c.bf16 %v5852_v24, %v5877_v9  ;;  %v1188_v20 = vadd.f32 %v4758_v62, %v4706_v10  ;;  %v861_v21 = vpop.f32.mrf.mxu0 }
 0x114   : > { %5278 = vpow2.f32 %v1387_v13  ;;  %v1393_v22 = vmul.f32 1.442695, %v1336_v14  ;;  %v1234_v25 = vsub.f32 %v1173_v15, %v5767_v4  ;;  %v1487_v27 = vadd.f32 1e-10, %v1455_v63  ;;  %v4761_v28 = vpop.f32.mrf.mxu1 }
 0x115   : > { %v5887_v29 = vpop.eup %5264  ;;  %v1335_v31 = vmul.f32 %v5774_v16, %v1296_v59  ;;  %v1299_v32 = vsub.f32 0.0, %v1267_v18  ;;  %v1997_v33 = vunpack.c.l.bf16 %v1981_v19  ;;  %v1998_v35 = vunpack.c.h.bf16 %v1981_v19  ;;  %v4709_v36 = vpop.f32.mrf.mxu0 }
 0x116   : > { %5280 = vpow2.f32 %v1393_v22  ;;  %v1266_v37 = vmul.f32 %v1234_v25, %v1234_v25  ;;  %v1237_v41 = vsub.f32 %v1188_v20, %v5767_v4  ;;  %v1183_v42 = vadd.f32 %v1182_v11, %v861_v21  ;;  %v1192_v54 = vpop.f32.mrf.mxu1 }
 0x117   : > { %v1391_v43 = vmul.f32 1.442695, %v1335_v31  ;;  %v1338_v44 = vmul.f32 %v5774_v16, %v1299_v32  ;;  %v2030_v45 = vsub.f32 %v5852_v24, %v1998_v35  ;;  %4874 = vmatprep.mubr.f32.mxu1 %v1997_v33  ;;  %v2029_v46 = vsub.f32 %v5877_v9, %v1997_v33  ;;  %v871_v53 = vpop.f32.mrf.mxu0 }
 0x118   : > { %v5894_v47 = vpop.eup %5266  ;;  %v1298_v48 = vsub.f32 0.0, %v1266_v37  ;;  %v1269_v50 = vmul.f32 %v1237_v41, %v1237_v41  ;;  %4875 = vmatmul.mubr.f32.vlgmr.msra.gmra.mxu1 %v1998_v35  ;;  %5282 = vlog2.f32 %v1487_v27  ;;  %v1236_v52 = vsub.f32 %v1183_v42, %v5767_v4 }
 0x119   : > { %5284 = vpow2.f32 %v1391_v43  ;;  %v1397_v55 = vmul.f32 1.442695, %v1338_v44  ;;  %4794 = vmatprep.mubr.f32.mxu0 %v2029_v46  ;;  %v1418_v57 = vmul.f32 %v5824_v23, %v5797_v30  ;;  %v1198_v60 = vadd.f32 %v4761_v28, %v4709_v36 }
 0x11a   : > { %v5899_v61 = vpop.eup %5268  ;;  %v1337_v62 = vmul.f32 %v5774_v16, %v1298_v48  ;;  %v1301_v63 = vsub.f32 0.0, %v1269_v50  ;;  %v1268_v0 = vmul.f32 %v1236_v52, %v1236_v52  ;;  %4795 = vmatmul.mubr.f32.vlgmr.msra.gmra.mxu0 %v2030_v45  ;;  %v1419_v2 = vmul.f32 %v5819_v12, %v5797_v30 }
 0x11b   : > { %5286 = vpow2.f32 %v1397_v55  ;;  %v1457_v1 = vadd.f32 %v5804_v39, %v1418_v57  ;;  %v1239_v3 = vsub.f32 %v1198_v60, %v5767_v4  ;;  %v1193_v6 = vadd.f32 %v1192_v54, %v871_v53 }
 0x11c   : > { %v5906_v8 = vpop.eup %5270  ;;  %v1395_v23 = vmul.f32 1.442695, %v1337_v62  ;;  %v1340_v10 = vmul.f32 %v5774_v16, %v1301_v63  ;;  %v1300_v11 = vsub.f32 0.0, %v1268_v0  ;;  %v1458_v13 = vadd.f32 %v5804_v39, %v1419_v2 }
 0x11d   : > { %v5910_v14 = vpop.eup %5272  ;;  %v1489_v15 = vadd.f32 1e-10, %v1457_v1  ;;  %v1271_v59 = vmul.f32 %v1239_v3, %v1239_v3  ;;  %v1238_v12 = vsub.f32 %v1193_v6, %v5767_v4  ;;  %v1420_v18 = vmul.f32 %v5832_v40, %v5797_v30 }
 0x11e   : > { %v5275_v19 = vpop.eup %5274  ;;  %5288 = vpow2.f32 %v1395_v23  ;;  %v1401_v20 = vmul.f32 1.442695, %v1340_v10  ;;  %v1339_v21 = vmul.f32 %v5774_v16, %v1300_v11  ;;  %v1490_v22 = vadd.f32 1e-10, %v1458_v13 }
 0x11f   : > { %v5916_v25 = vpop.eup %5276  ;;  %v5918_v27 = vmul.f32 0.6931472, %v5275_v19  ;;  %5290 = vlog2.f32 %v1489_v15  ;;  %v1303_v28 = vsub.f32 0.0, %v1271_v59  ;;  %v1270_v31 = vmul.f32 %v1238_v12, %v1238_v12 }
 0x120   : > { %5292 = vpow2.f32 %v1401_v20  ;;  %v1399_v32 = vmul.f32 1.442695, %v1339_v21  ;;  %v1459_v4 = vadd.f32 %v5804_v39, %v1420_v18  ;;  %v1421_v40 = vmul.f32 %v5829_v34, %v5797_v30 }
 0x121   : > { %v5923_v33 = vpop.eup %5278  ;;  %1587 = vrot.lane.b32.xlu1 %v5918_v27, %s5522_s20  ;;  %v1342_v35 = vmul.f32 %v5774_v16, %v1303_v28  ;;  %5294 = vlog2.f32 %v1490_v22  ;;  %v1302_v36 = vsub.f32 0.0, %v1270_v31  ;;  %v1422_v37 = vmul.f32 %v5840_v58, %v5797_v30 }
 0x122   : > { %5296 = vpow2.f32 %v1399_v32  ;;  %v1491_v41 = vadd.f32 1e-10, %v1459_v4  ;;  %v1460_v42 = vadd.f32 %v5804_v39, %v1421_v40  ;;  %v1423_v43 = vmul.f32 %v5836_v49, %v5797_v30 }
 0x123   : > { %v5933_v34 = vpop.eup %5280  ;;  %v1405_v44 = vmul.f32 1.442695, %v1342_v35  ;;  %v1341_v45 = vmul.f32 %v5774_v16, %v1302_v36  ;;  %v1461_v46 = vadd.f32 %v5804_v39, %v1422_v37  ;;  %v1424_v48 = vmul.f32 %v5854_v26, %v5797_v30 }
 0x124   : > { %5298 = vlog2.f32 %v1491_v41  ;;  %v1492_v50 = vadd.f32 1e-10, %v1460_v42  ;;  %v1462_v58 = vadd.f32 %v5804_v39, %v1423_v43  ;;  %v1425_v52 = vmul.f32 %v5846_v7, %v5797_v30 }
 0x125   : > { %v5283_v53 = vpop.eup %5282  ;;  %5300 = vpow2.f32 %v1405_v44  ;;  %v1493_v49 = vadd.f32 1e-10, %v1461_v46  ;;  %v1463_v54 = vadd.f32 %v5804_v39, %v1424_v48  ;;  %v5948_v60 = vmul.f32 1.442695, %v1341_v45 }
 0x126   : > { %v5943_v55 = vpop.eup %5284  ;;  %v5945_v16 = vmul.f32 0.6931472, %v5283_v53  ;;  %5302 = vlog2.f32 %v1492_v50  ;;  %v1494_v57 = vadd.f32 1e-10, %v1462_v58  ;;  %v1464_v26 = vadd.f32 %v5804_v39, %v1425_v52 }
 0x127   : > { %v1495_v62 = vadd.f32 1e-10, %v1463_v54  ;;  %v1426_v63 = vmul.f32 %v5866_v51, %v5797_v30  ;;  %v1427_v7 = vmul.f32 %v5860_v38, %v5797_v30  ;;  %5304 = vlog2.f32 %v1493_v49 }
 0x128   : > { %v5954_v0 = vpop.eup %5286  ;;  %1585 = vrot.lane.b32.xlu1 %v5945_v16, %s5522_s20  ;;  %v1982_v2 = vpack.c.bf16 %v5918_v27, %v5945_v16  ;;  %v1496_v1 = vadd.f32 1e-10, %v1464_v26  ;;  %v1428_v3 = vmul.f32 %v5874_v5, %v5797_v30  ;;  %5306 = vlog2.f32 %v1494_v57 }
 0x129   : > { %v1465_v6 = vadd.f32 %v5804_v39, %v1426_v63  ;;  %v1466_v51 = vadd.f32 %v5804_v39, %v1427_v7  ;;  %v1429_v38 = vmul.f32 %v5869_v56, %v5797_v30  ;;  %5308 = vlog2.f32 %v1495_v62 }
 0x12a   : > { %v1999_v23 = vunpack.c.l.bf16 %v1982_v2  ;;  %v2000_v10 = vunpack.c.h.bf16 %v1982_v2  ;;  %v1467_v11 = vadd.f32 %v5804_v39, %v1428_v3  ;;  %5310 = vlog2.f32 %v1496_v1 }
 0x12b   : > { %v5967_v13 = vpop.eup %5288  ;;  %v1497_v15 = vadd.f32 1e-10, %v1465_v6  ;;  %v1498_v59 = vadd.f32 1e-10, %v1466_v51  ;;  %v1468_v5 = vadd.f32 %v5804_v39, %v1429_v38  ;;  %v1430_v56 = vmul.f32 %v5887_v29, %v5797_v30 }
 0x12c   : > { %v5291_v12 = vpop.eup %5290  ;;  %4877 = vmatprep.mubr.f32.mxu1 %v1999_v23  ;;  %v2031_v18 = vsub.f32 %v5945_v16, %v1999_v23  ;;  %v2032_v19 = vsub.f32 %v5918_v27, %v2000_v10  ;;  %v1499_v20 = vadd.f32 1e-10, %v1467_v11  ;;  %v1431_v31 = vmul.f32 %v5880_v17, %v5797_v30 }
 0x12d   : > { %v5974_v21 = vpop.eup %5292  ;;  %v5976_v22 = vmul.f32 0.6931472, %v5291_v12  ;;  %4878 = vmatmul.mubr.f32.gmra.mxu1 %v2000_v10  ;;  %5312 = vlog2.f32 %v1497_v15  ;;  %v1500_v28 = vadd.f32 1e-10, %v1468_v5  ;;  %v1469_v4 = vadd.f32 %v5804_v39, %v1430_v56 }
 0x12e   : > { %v5295_v32 = vpop.eup %5294  ;;  %4797 = vmatprep.mubr.f32.mxu0 %v2031_v18  ;;  %5314 = vlog2.f32 %v1498_v59  ;;  %v1432_v40 = vmul.f32 %v5899_v61, %v5797_v30  ;;  %v1433_v29 = vmul.f32 %v5894_v47, %v5797_v30  ;;  %v1470_v17 = vadd.f32 %v5804_v39, %v1431_v31 }
 0x12f   : > { %v5985_v35 = vpop.eup %5296  ;;  %1589 = vrot.lane.b32.xlu0 %v5976_v22, %s5522_s20  ;;  %v5989_v36 = vmul.f32 0.6931472, %v5295_v32  ;;  %4798 = vmatmul.mubr.f32.gmra.mxu0 %v2032_v19  ;;  %5316 = vlog2.f32 %v1499_v20  ;;  %v1434_v37 = vmul.f32 %v5910_v14, %v5797_v30  ;;  %v1501_v41 = vadd.f32 1e-10, %v1469_v4 }
 0x130   : > { %5318 = vlog2.f32 %v1500_v28  ;;  %v1471_v61 = vadd.f32 %v5804_v39, %v1432_v40  ;;  %v1472_v47 = vadd.f32 %v5804_v39, %v1433_v29  ;;  %v1502_v44 = vadd.f32 1e-10, %v1470_v17 }
 0x131   : > { %v5299_v42 = vpop.eup %5298  ;;  %1591 = vrot.lane.b32.xlu1 %v5989_v36, %s5522_s20  ;;  %v1983_v43 = vpack.c.bf16 %v5989_v36, %v5976_v22  ;;  %v1473_v45 = vadd.f32 %v5804_v39, %v1434_v37  ;;  %v1435_v46 = vmul.f32 %v5906_v8, %v5797_v30  ;;  %5320 = vlog2.f32 %v1501_v41 }
 0x132   : > { %v6003_v14 = vpop.eup %5300  ;;  %v6005_v48 = vmul.f32 0.6931472, %v5299_v42  ;;  %v1503_v50 = vadd.f32 1e-10, %v1471_v61  ;;  %v1504_v58 = vadd.f32 1e-10, %v1472_v47  ;;  %5322 = vlog2.f32 %v1502_v44 }
 0x133   : > { %v5303_v52 = vpop.eup %5302  ;;  %v2001_v53 = vunpack.c.l.bf16 %v1983_v43  ;;  %v2002_v49 = vunpack.c.h.bf16 %v1983_v43  ;;  %v1505_v54 = vadd.f32 1e-10, %v1473_v45  ;;  %v1474_v8 = vadd.f32 %v5804_v39, %v1435_v46 }
 0x134   : > { %1593 = vrot.lane.b32.xlu0 %v6005_v48, %s5522_s20  ;;  %v6009_v57 = vmul.f32 0.6931472, %v5303_v52  ;;  %5324 = vlog2.f32 %v1503_v50  ;;  %v1436_v26 = vmul.f32 %v5923_v33, %v5797_v30  ;;  %v5305_v62 = vpop.eup %5304  ;;  %v1437_v2 = vmul.f32 %v5916_v25, %v5797_v30 }
 0x135   : > { %4880 = vmatprep.mubr.f32.mxu1 %v2001_v53  ;;  %v2033_v63 = vsub.f32 %v5976_v22, %v2001_v53  ;;  %v2034_v7 = vsub.f32 %v5989_v36, %v2002_v49  ;;  %5326 = vlog2.f32 %v1504_v58  ;;  %v5307_v1 = vpop.eup %5306  ;;  %v6022_v6 = vmul.f32 0.6931472, %v5305_v62 }
 0x136   : > { %4881 = vmatmul.mubr.f32.gmra.mxu1 %v2002_v49  ;;  %1595 = vrot.lane.b32.xlu1 %v6009_v57, %s5522_s20  ;;  %v1984_v3 = vpack.c.bf16 %v6009_v57, %v6005_v48  ;;  %5328 = vlog2.f32 %v1505_v54  ;;  %v1506_v33 = vadd.f32 1e-10, %v1474_v8  ;;  %v5309_v51 = vpop.eup %5308  ;;  %v6024_v38 = vmul.f32 0.6931472, %v5307_v1 }
 0x137   : > { %4800 = vmatprep.mubr.f32.mxu0 %v2033_v63  ;;  %v1475_v23 = vadd.f32 %v5804_v39, %v1436_v26  ;;  %v1476_v25 = vadd.f32 %v5804_v39, %v1437_v2  ;;  %v1438_v10 = vmul.f32 %v5943_v55, %v5797_v30  ;;  %v5311_v11 = vpop.eup %5310  ;;  %v6032_v5 = vmul.f32 0.6931472, %v5309_v51 }
 0x138   : > { %4801 = vmatmul.mubr.f32.gmra.mxu0 %v2034_v7  ;;  %v2003_v15 = vunpack.c.l.bf16 %v1984_v3  ;;  %1597 = vrot.lane.b32.xlu0 %v6022_v6, %s5522_s20  ;;  %v2004_v59 = vunpack.c.h.bf16 %v1984_v3  ;;  %5330 = vlog2.f32 %v1506_v33  ;;  %v1985_v12 = vpack.c.bf16 %v6024_v38, %v6022_v6 }
 0x139   : > { %5332 = vpow2.f32 %v5948_v60  ;;  %v6037_v18 = vmul.f32 0.6931472, %v5311_v11  ;;  %v1507_v19 = vadd.f32 1e-10, %v1475_v23  ;;  %v1508_v28 = vadd.f32 1e-10, %v1476_v25 }
 0x13a   : > { %v5313_v20 = vpop.eup %5312  ;;  %4883 = vmatprep.mubr.f32.mxu1 %v2003_v15  ;;  %v2035_v55 = vsub.f32 %v6005_v48, %v2003_v15  ;;  %1599 = vrot.lane.b32.xlu1 %v6024_v38, %s5522_s20  ;;  %v2036_v56 = vsub.f32 %v6009_v57, %v2004_v59  ;;  %v1477_v31 = vadd.f32 %v5804_v39, %v1438_v10  ;;  %v2005_v60 = vunpack.c.l.bf16 %v1985_v12 }
 0x13b   : > { %v5315_v32 = vpop.eup %5314  ;;  %4884 = vmatmul.mubr.f32.gmra.mxu1 %v2004_v59  ;;  %v2006_v4 = vunpack.c.h.bf16 %v1985_v12  ;;  %v1986_v40 = vpack.c.bf16 %v6037_v18, %v6032_v5  ;;  %v6046_v29 = vmul.f32 0.6931472, %v5313_v20  ;;  %5334 = vlog2.f32 %v1507_v19 }
 0x13c   : > { %v5317_v17 = vpop.eup %5316  ;;  %4803 = vmatprep.mubr.f32.mxu0 %v2035_v55  ;;  %1601 = vrot.lane.b32.xlu0 %v6032_v5, %s5522_s20  ;;  %v6050_v37 = vmul.f32 0.6931472, %v5315_v32  ;;  %v1509_v41 = vadd.f32 1e-10, %v1477_v31  ;;  %v1439_v61 = vmul.f32 %v5933_v34, %v5797_v30  ;;  %v2037_v42 = vsub.f32 %v6022_v6, %v2005_v60 }
 0x13d   : > { %v5319_v47 = vpop.eup %5318  ;;  %4804 = vmatmul.mubr.f32.gmra.mxu0 %v2036_v56  ;;  %4886 = vmatprep.mubr.f32.mxu1 %v2005_v60  ;;  %v2038_v43 = vsub.f32 %v6024_v38, %v2006_v4  ;;  %v2007_v44 = vunpack.c.l.bf16 %v1986_v40  ;;  %v2008_v45 = vunpack.c.h.bf16 %v1986_v40  ;;  %v6060_v50 = vmul.f32 0.6931472, %v5317_v17 }
 0x13e   : > { %1603 = vrot.lane.b32.xlu1 %v6037_v18, %s5522_s20  ;;  %v1987_v46 = vpack.c.bf16 %v6050_v37, %v6046_v29  ;;  %v6062_v58 = vmul.f32 0.6931472, %v5319_v47  ;;  %5336 = vlog2.f32 %v1508_v28  ;;  %v5321_v34 = vpop.eup %5320  ;;  %4806 = vmatprep.mubr.f32.mxu0 %v2037_v42  ;;  %v1478_v49 = vadd.f32 %v5804_v39, %v1439_v61 }
 0x13f   : > { %4887 = vmatmul.mubr.f32.gmra.mxu1 %v2006_v4  ;;  %v2039_v52 = vsub.f32 %v6032_v5, %v2007_v44  ;;  %v2040_v53 = vsub.f32 %v6037_v18, %v2008_v45  ;;  %5338 = vlog2.f32 %v1509_v41  ;;  %v5323_v54 = vpop.eup %5322  ;;  %v6071_v63 = vmul.f32 0.6931472, %v5321_v34 }
 0x140   : > { %4889 = vmatprep.mubr.f32.mxu1 %v2007_v44  ;;  %1605 = vrot.lane.b32.xlu0 %v6046_v29, %s5522_s20  ;;  %v2009_v8 = vunpack.c.l.bf16 %v1987_v46  ;;  %v2010_v26 = vunpack.c.h.bf16 %v1987_v46  ;;  %v1988_v62 = vpack.c.bf16 %v6062_v58, %v6060_v50  ;;  %v6073_v2 = vmul.f32 0.6931472, %v5323_v54 }
 0x141   : > { %v5325_v7 = vpop.eup %5324  ;;  %4807 = vmatmul.mubr.f32.gmra.mxu0 %v2038_v43  ;;  %v1510_v1 = vadd.f32 1e-10, %v1478_v49  ;;  %v1440_v3 = vmul.f32 %v5967_v13, %v5797_v30  ;;  %v1441_v33 = vmul.f32 %v5954_v0, %v5797_v30  ;;  %v1442_v40 = vmul.f32 %v5985_v35, %v5797_v30 }
 0x142   : > { %v5327_v51 = vpop.eup %5326  ;;  %4809 = vmatprep.mubr.f32.mxu0 %v2039_v52  ;;  %1607 = vrot.lane.b32.xlu1 %v6050_v37, %s5522_s20  ;;  %v2041_v23 = vsub.f32 %v6046_v29, %v2009_v8  ;;  %v2011_v25 = vunpack.c.l.bf16 %v1988_v62  ;;  %v6084_v11 = vpack.c.bf16 %v6073_v2, %v6071_v63  ;;  %v6086_v15 = vmul.f32 0.6931472, %v5325_v7 }
 0x143   : > { %v5329_v10 = vpop.eup %5328  ;;  %4890 = vmatmul.mubr.f32.gmra.mxu1 %v2008_v45  ;;  %v6088_v13 = vmul.f32 0.6931472, %v5327_v51  ;;  %5340 = vlog2.f32 %v1510_v1  ;;  %v2042_v0 = vsub.f32 %v6050_v37, %v2010_v26  ;;  %v2012_v59 = vunpack.c.h.bf16 %v1988_v62 }
 0x144   : > { %4892 = vmatprep.mubr.f32.mxu1 %v2009_v8  ;;  %1609 = vrot.lane.b32.xlu0 %v6060_v50, %s5522_s20  ;;  %v2043_v12 = vsub.f32 %v6060_v50, %v2011_v25  ;;  %v1479_v19 = vadd.f32 %v5804_v39, %v1440_v3  ;;  %v2013_v55 = vunpack.c.l.bf16 %v6084_v11  ;;  %v6100_v28 = vmul.f32 0.6931472, %v5329_v10 }
 0x145   : > { %v5331_v20 = vpop.eup %5330  ;;  %4810 = vmatmul.mubr.f32.gmra.mxu0 %v2040_v53  ;;  %v6098_v56 = vpack.c.bf16 %v6088_v13, %v6086_v15  ;;  %v1480_v31 = vadd.f32 %v5804_v39, %v1441_v33  ;;  %v1443_v17 = vmul.f32 %v5974_v21, %v5797_v30  ;;  %v2014_v41 = vunpack.c.h.bf16 %v6084_v11 }
 0x146   : > { %v5333_v32 = vpop.eup %5332  ;;  %4812 = vmatprep.mubr.f32.mxu0 %v2041_v23  ;;  %1611 = vrot.lane.b32.xlu1 %v6062_v58, %s5522_s20  ;;  %v6105_v60 = vmul.f32 0.6931472, %v5331_v20  ;;  %v1511_v4 = vadd.f32 1e-10, %v1479_v19  ;;  %v1481_v47 = vadd.f32 %v5804_v39, %v1442_v40  ;;  %v2044_v43 = vsub.f32 %v6062_v58, %v2012_v59 }
 0x147   : > { %4893 = vmatmul.mubr.f32.gmra.mxu1 %v2010_v26  ;;  %v1512_v61 = vadd.f32 1e-10, %v1480_v31  ;;  %v2045_v35 = vsub.f32 %v6071_v63, %v2013_v55  ;;  %v1482_v44 = vadd.f32 %v5804_v39, %v1443_v17  ;;  %v1445_v21 = vmul.f32 %v6003_v14, %v5797_v30 }
 0x148   : > { %4895 = vmatprep.mubr.f32.mxu1 %v2011_v25  ;;  %1613 = vrot.lane.b32.xlu0 %v6071_v63, %s5522_s20  ;;  %5342 = vlog2.f32 %v1511_v4  ;;  %v5335_v42 = vpop.eup %5334  ;;  %v2015_v45 = vunpack.c.l.bf16 %v6098_v56  ;;  %v1991_v46 = vpack.c.bf16 %v6105_v60, %v6100_v28  ;;  %v1513_v53 = vadd.f32 1e-10, %v1481_v47 }
 0x149   : > { %4813 = vmatmul.mubr.f32.gmra.mxu0 %v2042_v0  ;;  %v6125_v34 = vmul.f32 0.6931472, %v5335_v42  ;;  %5344 = vlog2.f32 %v1512_v61  ;;  %v1514_v49 = vadd.f32 1e-10, %v1482_v44  ;;  %v1484_v54 = vadd.f32 %v5804_v39, %v1445_v21 }
 0x14a   : > { %4815 = vmatprep.mubr.f32.mxu0 %v2043_v12  ;;  %1615 = vrot.lane.b32.xlu1 %v6073_v2, %s5522_s20  ;;  %v1444_v14 = vmul.f32 %v5333_v32, %v5797_v30  ;;  %v2046_v26 = vsub.f32 %v6073_v2, %v2014_v41  ;;  %v2016_v7 = vunpack.c.h.bf16 %v6098_v56  ;;  %5346 = vlog2.f32 %v1513_v53 }
 0x14b   : > { %v5337_v52 = vpop.eup %5336  ;;  %4896 = vmatmul.mubr.f32.gmra.mxu1 %v2012_v59  ;;  %v1516_v1 = vadd.f32 1e-10, %v1484_v54  ;;  %v2047_v30 = vsub.f32 %v6086_v15, %v2015_v45  ;;  %v2017_v33 = vunpack.c.l.bf16 %v1991_v46  ;;  %5348 = vlog2.f32 %v1514_v49 }
 0x14c   : > { %v5339_v8 = vpop.eup %5338  ;;  %4898 = vmatprep.mubr.f32.mxu1 %v2013_v55  ;;  %1617 = vrot.lane.b32.xlu0 %v6086_v15, %s5522_s20  ;;  %v6132_v62 = vmul.f32 0.6931472, %v5337_v52  ;;  %v1483_v3 = vadd.f32 %v5804_v39, %v1444_v14  ;;  %v2048_v39 = vsub.f32 %v6088_v13, %v2016_v7  ;;  %v2018_v11 = vunpack.c.h.bf16 %v1991_v46 }
 0x14d   : > { %4816 = vmatmul.mubr.f32.gmra.mxu0 %v2044_v43  ;;  %v6141_v23 = vmul.f32 0.6931472, %v5339_v8  ;;  %5350 = vlog2.f32 %v1516_v1  ;;  %v2049_v59 = vsub.f32 %v6100_v28, %v2017_v33 }
 0x14e   : > { %4818 = vmatprep.mubr.f32.mxu0 %v2045_v35  ;;  %1619 = vrot.lane.b32.xlu1 %v6088_v13, %s5522_s20  ;;  %v1992_v51 = vpack.c.bf16 %v6132_v62, %v6125_v34  ;;  %v1515_v25 = vadd.f32 1e-10, %v1483_v3  ;;  %v2050_v55 = vsub.f32 %v6105_v60, %v2018_v11 }
 0x14f   : > { %4899 = vmatmul.mubr.f32.gmra.mxu1 %v2014_v41 }
 0x150   : > { %v5341_v10 = vpop.eup %5340  ;;  %4901 = vmatprep.mubr.f32.mxu1 %v2015_v45  ;;  %1621 = vrot.lane.b32.xlu0 %v6100_v28, %s5522_s20  ;;  %5352 = vlog2.f32 %v1515_v25  ;;  %v2019_v12 = vunpack.c.l.bf16 %v1992_v51  ;;  %v2020_v56 = vunpack.c.h.bf16 %v1992_v51 }
 0x151   : > { %4819 = vmatmul.mubr.f32.gmra.mxu0 %v2046_v26  ;;  %v6146_v0 = vmul.f32 0.6931472, %v5341_v10 }
 0x152   : > { %4821 = vmatprep.mubr.f32.mxu0 %v2047_v30  ;;  %1623 = vrot.lane.b32.xlu1 %v6105_v60, %s5522_s20  ;;  %v2051_v31 = vsub.f32 %v6125_v34, %v2019_v12  ;;  %v2052_v41 = vsub.f32 %v6132_v62, %v2020_v56 }
 0x153   : > { %4902 = vmatmul.mubr.f32.gmra.mxu1 %v2016_v7  ;;  %v1993_v19 = vpack.c.bf16 %v6146_v0, %v6141_v23 }
 0x154   : > { %4904 = vmatprep.mubr.f32.mxu1 %v2017_v33  ;;  %1625 = vrot.lane.b32.xlu0 %v6125_v34, %s5522_s20 }
 0x155   : > { %v5343_v20 = vpop.eup %5342  ;;  %4822 = vmatmul.mubr.f32.gmra.mxu0 %v2048_v39  ;;  %v2021_v32 = vunpack.c.l.bf16 %v1993_v19  ;;  %v2022_v61 = vunpack.c.h.bf16 %v1993_v19 }
 0x156   : > { %4824 = vmatprep.mubr.f32.mxu0 %v2049_v59  ;;  %1627 = vrot.lane.b32.xlu1 %v6132_v62, %s5522_s20  ;;  %v6159_v4 = vmul.f32 0.6931472, %v5343_v20  ;;  %v5345_v40 = vpop.eup %5344  ;;  %v5482_v59 = vld [vmem:[%s5618_s18] sm:$0xff] }
 0x157   : > { %4905 = vmatmul.mubr.f32.gmra.mxu1 %v2018_v11  ;;  %v6163_v17 = vmul.f32 0.6931472, %v5345_v40  ;;  %v5347_v47 = vpop.eup %5346  ;;  %v2053_v42 = vsub.f32 %v6141_v23, %v2021_v32  ;;  %v2054_v52 = vsub.f32 %v6146_v0, %v2022_v61 }
 0x158   : > { %4907 = vmatprep.mubr.f32.mxu1 %v2019_v12  ;;  %1629 = vrot.lane.b32.xlu0 %v6141_v23, %s5522_s20  ;;  %v5349_v35 = vpop.eup %5348  ;;  %v6171_v44 = vmul.f32 0.6931472, %v5347_v47 }
 0x159   : > { %4825 = vmatmul.mubr.f32.gmra.mxu0 %v2050_v55  ;;  %v1994_v43 = vpack.c.bf16 %v6163_v17, %v6159_v4  ;;  %v6175_v46 = vmul.f32 0.6931472, %v5349_v35 }
 0x15a   : > { %4827 = vmatprep.mubr.f32.mxu0 %v2051_v31  ;;  %1631 = vrot.lane.b32.xlu1 %v6146_v0, %s5522_s20  ;;  %v5351_v21 = vpop.eup %5350 }
 0x15b   : > { %4908 = vmatmul.mubr.f32.gmra.mxu1 %v2020_v56  ;;  %v2023_v45 = vunpack.c.l.bf16 %v1994_v43  ;;  %v2024_v53 = vunpack.c.h.bf16 %v1994_v43  ;;  %v6178_v49 = vmul.f32 0.6931472, %v5351_v21  ;;  %v1995_v8 = vpack.c.bf16 %v6175_v46, %v6171_v44 }
 0x15c   : > { %4910 = vmatprep.mubr.f32.mxu1 %v2021_v32  ;;  %1633 = vrot.lane.b32.xlu0 %v6159_v4, %s5522_s20 }
 0x15d   : > { %4828 = vmatmul.mubr.f32.gmra.mxu0 %v2052_v41  ;;  %v5353_v54 = vpop.eup %5352  ;;  %v2055_v14 = vsub.f32 %v6159_v4, %v2023_v45  ;;  %v2025_v7 = vunpack.c.l.bf16 %v1995_v8  ;;  %v2056_v1 = vsub.f32 %v6163_v17, %v2024_v53  ;;  %v2026_v3 = vunpack.c.h.bf16 %v1995_v8 }
 0x15e   : > { %4830 = vmatprep.mubr.f32.mxu0 %v2053_v42  ;;  %1635 = vrot.lane.b32.xlu1 %v6163_v17, %s5522_s20  ;;  %v6185_v26 = vmul.f32 0.6931472, %v5353_v54 }
 0x15f   : > { %4911 = vmatmul.mubr.f32.gmra.mxu1 %v2022_v61  ;;  %v2057_v33 = vsub.f32 %v6171_v44, %v2025_v7  ;;  %v2058_v25 = vsub.f32 %v6175_v46, %v2026_v3 }
 0x160   : > { %4913 = vmatprep.mubr.f32.mxu1 %v2023_v45  ;;  %1637 = vrot.lane.b32.xlu0 %v6171_v44, %s5522_s20  ;;  %v1996_v30 = vpack.c.bf16 %v6178_v49, %v6185_v26 }
 0x161   : > { %4831 = vmatmul.mubr.f32.gmra.mxu0 %v2054_v52 }
 0x162   : > { %4833 = vmatprep.mubr.f32.mxu0 %v2055_v14  ;;  %1639 = vrot.lane.b32.xlu1 %v6175_v46, %s5522_s20  ;;  %v2027_v51 = vunpack.c.l.bf16 %v1996_v30  ;;  %v2028_v10 = vunpack.c.h.bf16 %v1996_v30 }
 0x163   : > { %4914 = vmatmul.mubr.f32.gmra.mxu1 %v2024_v53 }
 0x164   : > { %4916 = vmatprep.mubr.f32.mxu1 %v2025_v7  ;;  %1643 = vrot.lane.b32.xlu0 %v6178_v49, %s5522_s20  ;;  %v2059_v39 = vsub.f32 %v6185_v26, %v2027_v51  ;;  %v2060_v11 = vsub.f32 %v6178_v49, %v2028_v10 }
 0x165   : > { %4834 = vmatmul.mubr.f32.gmra.mxu0 %v2056_v1 }
 0x166   : > { %4836 = vmatprep.mubr.f32.mxu0 %v2057_v33 }
 0x167   : > { %4917 = vmatmul.mubr.f32.gmra.mxu1 %v2026_v3 }
 0x168   : > { %1641 = vrot.lane.b32.xlu0 %v6185_v26, %s5522_s20  ;;  %4919 = vmatprep.mubr.f32.mxu1 %v2027_v51 }
 0x169   : > { %4837 = vmatmul.mubr.f32.gmra.mxu0 %v2058_v25 }
 0x16a   : > { %4839 = vmatprep.mubr.f32.mxu0 %v2059_v39 }
 0x16b   : > { %4920 = vmatmul.mubr.f32.gmra.mxu1 %v2028_v10 }
 0x16d   : > { %4840 = vmatmul.mubr.f32.gmra.mxu0 %v2060_v11 }
 0x16e   : > { %4926 = vmatprep.mubr.msk.f32.mxu0 %vm558_vm0, %v5482_v59 }
 0x17d   : > { %v1584_v12 = vpop.permute.xlu0 %1583 }
 0x17e   : > { %v6205_v19 = vmax.f32 %v5852_v24, %v1584_v12 }
 0x180   : > { %1679 = vrot.lane.b32.xlu1 %v6205_v19, %s5523_s21 }
 0x185   : > { %v1582_v20 = vpop.permute.xlu0 %1581 }
 0x186   : > { %v6210_v55 = vmax.f32 %v5877_v9, %v1582_v20 }
 0x188   : > { %1677 = vrot.lane.b32.xlu1 %v6210_v55, %s5523_s21 }
 0x193   : > { %v1588_v56 = vpop.permute.xlu1 %1587 }
 0x194   : > { %v6215_v31 = vmax.f32 %v5918_v27, %v1588_v56 }
 0x196   : > { %1683 = vrot.lane.b32.xlu1 %v6215_v31, %s5523_s21 }
 0x19a   : > { %v1586_v24 = vpop.permute.xlu1 %1585 }
 0x19b   : > { %v6220_v32 = vmax.f32 %v5945_v16, %v1586_v24 }
 0x19d   : > { %1681 = vrot.lane.b32.xlu0 %v6220_v32, %s5523_s21 }
 0x1a1   : > { %v1590_v40 = vpop.permute.xlu0 %1589 }
 0x1a2   : > { %v6225_v9 = vmax.f32 %v5976_v22, %v1590_v40 }
 0x1a3   : > { %v1592_v41 = vpop.permute.xlu1 %1591 }
 0x1a4   : > { %v6228_v61 = vmax.f32 %v5989_v36, %v1592_v41  ;;  %1685 = vrot.lane.b32.xlu0 %v6225_v9, %s5523_s21 }
 0x1a6   : > { %v1594_v27 = vpop.permute.xlu0 %1593  ;;  %1687 = vrot.lane.b32.xlu1 %v6228_v61, %s5523_s21 }
 0x1a7   : > { %v6235_v16 = vmax.f32 %v6005_v48, %v1594_v27 }
 0x1a8   : > { %v1596_v47 = vpop.permute.xlu1 %1595 }
 0x1a9   : > { %v6238_v42 = vmax.f32 %v6009_v57, %v1596_v47  ;;  %1689 = vrot.lane.b32.xlu0 %v6235_v16, %s5523_s21 }
 0x1aa   : > { %v1598_v22 = vpop.permute.xlu0 %1597 }
 0x1ab   : > { %v6243_v36 = vmax.f32 %v6022_v6, %v1598_v22  ;;  %1691 = vrot.lane.b32.xlu1 %v6238_v42, %s5523_s21 }
 0x1ac   : > { %v1600_v43 = vpop.permute.xlu1 %1599 }
 0x1ad   : > { %v6248_v35 = vmax.f32 %v6024_v38, %v1600_v43  ;;  %1693 = vrot.lane.b32.xlu0 %v6243_v36, %s5523_s21 }
 0x1ae   : > { %v1602_v48 = vpop.permute.xlu0 %1601 }
 0x1af   : > { %v6253_v57 = vmax.f32 %v6032_v5, %v1602_v48  ;;  %1695 = vrot.lane.b32.xlu1 %v6248_v35, %s5523_s21 }
 0x1b0   : > { %v1604_v21 = vpop.permute.xlu1 %1603 }
 0x1b1   : > { %v6258_v6 = vmax.f32 %v6037_v18, %v1604_v21  ;;  %1697 = vrot.lane.b32.xlu0 %v6253_v57, %s5523_s21 }
 0x1b2   : > { %v1606_v45 = vpop.permute.xlu0 %1605 }
 0x1b3   : > { %v6263_v38 = vmax.f32 %v6046_v29, %v1606_v45  ;;  %1699 = vrot.lane.b32.xlu1 %v6258_v6, %s5523_s21 }
 0x1b4   : > { %v1608_v52 = vpop.permute.xlu1 %1607 }
 0x1b5   : > { %v6268_v5 = vmax.f32 %v6050_v37, %v1608_v52  ;;  %1701 = vrot.lane.b32.xlu0 %v6263_v38, %s5523_s21 }
 0x1b6   : > { %v1610_v53 = vpop.permute.xlu0 %1609 }
 0x1b7   : > { %v6273_v18 = vmax.f32 %v6060_v50, %v1610_v53  ;;  %1703 = vrot.lane.b32.xlu1 %v6268_v5, %s5523_s21 }
 0x1b8   : > { %v1612_v54 = vpop.permute.xlu1 %1611 }
 0x1b9   : > { %v6278_v29 = vmax.f32 %v6062_v58, %v1612_v54  ;;  %1705 = vrot.lane.b32.xlu0 %v6273_v18, %s5523_s21 }
 0x1ba   : > { %v1614_v14 = vpop.permute.xlu0 %1613 }
 0x1bb   : > { %v6283_v37 = vmax.f32 %v6071_v63, %v1614_v14  ;;  %1707 = vrot.lane.b32.xlu1 %v6278_v29, %s5523_s21 }
 0x1bc   : > { %v1616_v8 = vpop.permute.xlu1 %1615 }
 0x1bd   : > { %v6288_v50 = vmax.f32 %v6073_v2, %v1616_v8  ;;  %1709 = vrot.lane.b32.xlu0 %v6283_v37, %s5523_s21 }
 0x1be   : > { %v1618_v7 = vpop.permute.xlu0 %1617 }
 0x1bf   : > { %v6293_v58 = vmax.f32 %v6086_v15, %v1618_v7  ;;  %1711 = vrot.lane.b32.xlu1 %v6288_v50, %s5523_s21 }
 0x1c0   : > { %v1620_v1 = vpop.permute.xlu1 %1619 }
 0x1c1   : > { %v6298_v63 = vmax.f32 %v6088_v13, %v1620_v1  ;;  %1713 = vrot.lane.b32.xlu0 %v6293_v58, %s5523_s21 }
 0x1c2   : > { %v1622_v3 = vpop.permute.xlu0 %1621 }
 0x1c3   : > { %v6303_v2 = vmax.f32 %v6100_v28, %v1622_v3  ;;  %1715 = vrot.lane.b32.xlu1 %v6298_v63, %s5523_s21 }
 0x1c4   : > { %v1624_v30 = vpop.permute.xlu1 %1623 }
 0x1c5   : > { %v6308_v15 = vmax.f32 %v6105_v60, %v1624_v30  ;;  %1717 = vrot.lane.b32.xlu0 %v6303_v2, %s5523_s21 }
 0x1c6   : > { %v1626_v33 = vpop.permute.xlu0 %1625 }
 0x1c7   : > { %v6313_v13 = vmax.f32 %v6125_v34, %v1626_v33  ;;  %1719 = vrot.lane.b32.xlu1 %v6308_v15, %s5523_s21 }
 0x1c8   : > { %v1628_v51 = vpop.permute.xlu1 %1627 }
 0x1c9   : > { %v6318_v28 = vmax.f32 %v6132_v62, %v1628_v51  ;;  %1721 = vrot.lane.b32.xlu0 %v6313_v13, %s5523_s21 }
 0x1ca   : > { %v1630_v25 = vpop.permute.xlu0 %1629 }
 0x1cb   : > { %v6323_v60 = vmax.f32 %v6141_v23, %v1630_v25  ;;  %1723 = vrot.lane.b32.xlu1 %v6318_v28, %s5523_s21 }
 0x1cc   : > { %v1632_v10 = vpop.permute.xlu1 %1631 }
 0x1cd   : > { %v6328_v34 = vmax.f32 %v6146_v0, %v1632_v10  ;;  %1725 = vrot.lane.b32.xlu0 %v6323_v60, %s5523_s21 }
 0x1ce   : > { %v1634_v39 = vpop.permute.xlu0 %1633 }
 0x1cf   : > { %v6333_v62 = vmax.f32 %v6159_v4, %v1634_v39  ;;  %1727 = vrot.lane.b32.xlu1 %v6328_v34, %s5523_s21 }
 0x1d0   : > { %v1636_v11 = vpop.permute.xlu1 %1635 }
 0x1d1   : > { %v6338_v23 = vmax.f32 %v6163_v17, %v1636_v11  ;;  %1729 = vrot.lane.b32.xlu0 %v6333_v62, %s5523_s21 }
 0x1d2   : > { %v1638_v59 = vpop.permute.xlu0 %1637 }
 0x1d3   : > { %v6343_v0 = vmax.f32 %v6171_v44, %v1638_v59  ;;  %1731 = vrot.lane.b32.xlu1 %v6338_v23, %s5523_s21 }
 0x1d4   : > { %v1640_v12 = vpop.permute.xlu1 %1639 }
 0x1d5   : > { %v6348_v4 = vmax.f32 %v6175_v46, %v1640_v12  ;;  %1733 = vrot.lane.b32.xlu0 %v6343_v0, %s5523_s21 }
 0x1d6   : > { %v1644_v20 = vpop.permute.xlu0 %1643 }
 0x1d7   : > { %v6353_v17 = vmax.f32 %v6178_v49, %v1644_v20  ;;  %1735 = vrot.lane.b32.xlu1 %v6348_v4, %s5523_s21 }
 0x1d9   : > { %1739 = vrot.lane.b32.xlu0 %v6353_v17, %s5523_s21 }
 0x1da   : > { %v1642_v44 = vpop.permute.xlu0 %1641 }
 0x1db   : > { %v6360_v56 = vmax.f32 %v6185_v26, %v1642_v44 }
 0x1dd   : > { %1737 = vrot.lane.b32.xlu0 %v6360_v56, %s5523_s21 }
 0x1f2   : > { %v1680_v46 = vpop.permute.xlu1 %1679 }
 0x1f3   : > { %v6365_v24 = vmax.f32 %v6205_v19, %v1680_v46  ;;  %v2959_v46 = vld [vmem:[%s7694_s7] sm:$0xff] }
 0x1f5   : > { %1775 = vrot.lane.b32.xlu1 %v6365_v24, %s5524_s22 }
 0x1fa   : > { %v1678_v49 = vpop.permute.xlu1 %1677 }
 0x1fb   : > { %v6370_v40 = vmax.f32 %v6210_v55, %v1678_v49 }
 0x1fd   : > { %1773 = vrot.lane.b32.xlu1 %v6370_v40, %s5524_s22 }
 0x208   : > { %v1684_v26 = vpop.permute.xlu1 %1683 }
 0x209   : > { %v6375_v41 = vmax.f32 %v6215_v31, %v1684_v26 }
 0x20b   : > { %1779 = vrot.lane.b32.xlu1 %v6375_v41, %s5524_s22 }
 0x20f   : > { %v1682_v19 = vpop.permute.xlu0 %1681 }
 0x210   : > { %v6380_v27 = vmax.f32 %v6220_v32, %v1682_v19  ;;  %v5483_v19 = vld [vmem:[%s5618_s18 + $0x8] sm:$0xff] }
 0x212   : > { %1777 = vrot.lane.b32.xlu0 %v6380_v27, %s5524_s22 }
 0x216   : > { %v1686_v47 = vpop.permute.xlu0 %1685 }
 0x217   : > { %v6385_v55 = vmax.f32 %v6225_v9, %v1686_v47 }
 0x218   : > { %v1688_v22 = vpop.permute.xlu1 %1687 }
 0x219   : > { %v6388_v43 = vmax.f32 %v6228_v61, %v1688_v22  ;;  %1781 = vrot.lane.b32.xlu0 %v6385_v55, %s5524_s22 }
 0x21b   : > { %1783 = vrot.lane.b32.xlu1 %v6388_v43, %s5524_s22  ;;  %v1690_v31 = vpop.permute.xlu0 %1689 }
 0x21c   : > { %v6395_v32 = vmax.f32 %v6235_v16, %v1690_v31  ;;  %v5485_v31 = vld [vmem:[%s5618_s18 + $0x18] sm:$0xff] }
 0x21d   : > { %v1692_v48 = vpop.permute.xlu1 %1691 }
 0x21e   : > { %v6398_v21 = vmax.f32 %v6238_v42, %v1692_v48  ;;  %1785 = vrot.lane.b32.xlu0 %v6395_v32, %s5524_s22  ;;  %v5487_v48 = vld [vmem:[%s5618_s18 + $0x28] sm:$0xff] }
 0x21f   : > { %v1694_v9 = vpop.permute.xlu0 %1693 }
 0x220   : > { %1787 = vrot.lane.b32.xlu1 %v6398_v21, %s5524_s22  ;;  %v6405_v61 = vmax.f32 %v6243_v36, %v1694_v9  ;;  %v5488_v9 = vld [vmem:[%s5618_s18 + $0x30] sm:$0xff] }
 0x221   : > { %v1696_v45 = vpop.permute.xlu1 %1695 }
 0x222   : > { %v6408_v52 = vmax.f32 %v6248_v35, %v1696_v45  ;;  %1789 = vrot.lane.b32.xlu0 %v6405_v61, %s5524_s22  ;;  %v5490_v45 = vld [vmem:[%s5618_s18 + $0x40] sm:$0xff] }
 0x223   : > { %v1698_v16 = vpop.permute.xlu0 %1697 }
 0x224   : > { %1791 = vrot.lane.b32.xlu1 %v6408_v52, %s5524_s22  ;;  %v6415_v42 = vmax.f32 %v6253_v57, %v1698_v16  ;;  %v5491_v16 = vld [vmem:[%s5618_s18 + $0x48] sm:$0xff] }
 0x225   : > { %v1700_v53 = vpop.permute.xlu1 %1699 }
 0x226   : > { %v6418_v54 = vmax.f32 %v6258_v6, %v1700_v53  ;;  %1793 = vrot.lane.b32.xlu0 %v6415_v42, %s5524_s22  ;;  %v5492_v53 = vld [vmem:[%s5618_s18 + $0x50] sm:$0xff] }
 0x227   : > { %v1702_v36 = vpop.permute.xlu0 %1701 }
 0x228   : > { %1795 = vrot.lane.b32.xlu1 %v6418_v54, %s5524_s22  ;;  %v6425_v35 = vmax.f32 %v6263_v38, %v1702_v36  ;;  %v5493_v36 = vld [vmem:[%s5618_s18 + $0x58] sm:$0xff] }
 0x229   : > { %v1704_v14 = vpop.permute.xlu1 %1703 }
 0x22a   : > { %v6428_v8 = vmax.f32 %v6268_v5, %v1704_v14  ;;  %1797 = vrot.lane.b32.xlu0 %v6425_v35, %s5524_s22  ;;  %v5494_v14 = vld [vmem:[%s5618_s18 + $0x60] sm:$0xff] }
 0x22b   : > { %v1706_v57 = vpop.permute.xlu0 %1705 }
 0x22c   : > { %1799 = vrot.lane.b32.xlu1 %v6428_v8, %s5524_s22  ;;  %v6435_v6 = vmax.f32 %v6273_v18, %v1706_v57  ;;  %v5495_v57 = vld [vmem:[%s5618_s18 + $0x68] sm:$0xff] }
 0x22d   : > { %v1708_v7 = vpop.permute.xlu1 %1707 }
 0x22e   : > { %v6438_v1 = vmax.f32 %v6278_v29, %v1708_v7  ;;  %1801 = vrot.lane.b32.xlu0 %v6435_v6, %s5524_s22  ;;  %v5496_v7 = vld [vmem:[%s5618_s18 + $0x70] sm:$0xff] }
 0x22f   : > { %v1710_v38 = vpop.permute.xlu0 %1709 }
 0x230   : > { %1803 = vrot.lane.b32.xlu1 %v6438_v1, %s5524_s22  ;;  %v6445_v5 = vmax.f32 %v6283_v37, %v1710_v38 }
 0x231   : > { %v1712_v3 = vpop.permute.xlu1 %1711 }
 0x232   : > { %v6448_v30 = vmax.f32 %v6288_v50, %v1712_v3  ;;  %1805 = vrot.lane.b32.xlu0 %v6445_v5, %s5524_s22  ;;  %v5497_v3 = vld [vmem:[%s5618_s18 + $0x78] sm:$0xff] }
 0x233   : > { %v1714_v18 = vpop.permute.xlu0 %1713 }
 0x234   : > { %1807 = vrot.lane.b32.xlu1 %v6448_v30, %s5524_s22  ;;  %v6455_v29 = vmax.f32 %v6293_v58, %v1714_v18  ;;  %v5498_v18 = vld [vmem:[%s5618_s18 + $0x80] sm:$0xff] }
 0x235   : > { %v1716_v33 = vpop.permute.xlu1 %1715 }
 0x236   : > { %v6458_v51 = vmax.f32 %v6298_v63, %v1716_v33  ;;  %1809 = vrot.lane.b32.xlu0 %v6455_v29, %s5524_s22  ;;  %v5499_v33 = vld [vmem:[%s5618_s18 + $0x88] sm:$0xff] }
 0x237   : > { %v1718_v37 = vpop.permute.xlu0 %1717 }
 0x238   : > { %1811 = vrot.lane.b32.xlu1 %v6458_v51, %s5524_s22  ;;  %v6465_v50 = vmax.f32 %v6303_v2, %v1718_v37  ;;  %v5500_v37 = vld [vmem:[%s5618_s18 + $0x90] sm:$0xff] }
 0x239   : > { %v1720_v25 = vpop.permute.xlu1 %1719 }
 0x23a   : > { %v6468_v10 = vmax.f32 %v6308_v15, %v1720_v25  ;;  %1813 = vrot.lane.b32.xlu0 %v6465_v50, %s5524_s22 }
 0x23b   : > { %v1722_v58 = vpop.permute.xlu0 %1721 }
 0x23c   : > { %1815 = vrot.lane.b32.xlu1 %v6468_v10, %s5524_s22  ;;  %v6475_v63 = vmax.f32 %v6313_v13, %v1722_v58 }
 0x23d   : > { %v1724_v39 = vpop.permute.xlu1 %1723 }
 0x23e   : > { %v6478_v11 = vmax.f32 %v6318_v28, %v1724_v39  ;;  %1817 = vrot.lane.b32.xlu0 %v6475_v63, %s5524_s22  ;;  %v5501_v39 = vld [vmem:[%s5618_s18 + $0x98] sm:$0xff] }
 0x23f   : > { %v1726_v2 = vpop.permute.xlu0 %1725 }
 0x240   : > { %1819 = vrot.lane.b32.xlu1 %v6478_v11, %s5524_s22  ;;  %v6485_v15 = vmax.f32 %v6323_v60, %v1726_v2  ;;  %v5502_v2 = vld [vmem:[%s5618_s18 + $0xa0] sm:$0xff] }
 0x241   : > { %v1728_v59 = vpop.permute.xlu1 %1727 }
 0x242   : > { %v6488_v12 = vmax.f32 %v6328_v34, %v1728_v59  ;;  %1821 = vrot.lane.b32.xlu0 %v6485_v15, %s5524_s22  ;;  %v2960_v34 = vld [vmem:[%s7694_s7 + $0x8] sm:$0xff] }
 0x243   : > { %v1730_v13 = vpop.permute.xlu0 %1729  ;;  %4922 = vmatprep.subr.mxu0 %v2960_v34 }
 0x244   : > { %1823 = vrot.lane.b32.xlu1 %v6488_v12, %s5524_s22  ;;  %v6495_v28 = vmax.f32 %v6333_v62, %v1730_v13  ;;  %4923 = vmatpush3.msra.mxu0 %v2960_v34  ;;  %v5503_v13 = vld [vmem:[%s5618_s18 + $0xa8] sm:$0xff] }
 0x245   : > { %v1732_v20 = vpop.permute.xlu1 %1731  ;;  %4924 = vmatprep.subr.mxu0 %v2959_v46  ;;  %v5507_v34 = vld [vmem:[%s5618_s18 + $0xc8] sm:$0xff] }
 0x246   : > { %v6498_v44 = vmax.f32 %v6338_v23, %v1732_v20  ;;  %1825 = vrot.lane.b32.xlu0 %v6495_v28, %s5524_s22  ;;  %4925 = vmatpush3.msra.mxu0 %v2959_v46  ;;  %v5505_v20 = vld [vmem:[%s5618_s18 + $0xb8] sm:$0xff] }
 0x247   : > { %v1734_v60 = vpop.permute.xlu0 %1733  ;;  %4927 = vmatmul.mubr.msk.f32.vlgmr.msra.gmra.mxu0 %vm558_vm0, %v5483_v19  ;;  %v5510_v19 = vld [vmem:[%s5618_s18 + $0xe0] sm:$0xff] }
 0x248   : > { %1827 = vrot.lane.b32.xlu1 %v6498_v44, %s5524_s22  ;;  %v6511_v62 = vmax.f32 %v6343_v0, %v1734_v60  ;;  %v5506_v60 = vld [vmem:[%s5618_s18 + $0xc0] sm:$0xff] }
 0x249   : > { %v1736_v23 = vpop.permute.xlu1 %1735 }
 0x24a   : > { %v6514_v49 = vmax.f32 %v6348_v4, %v1736_v23  ;;  %1829 = vrot.lane.b32.xlu0 %v6511_v62, %s5524_s22  ;;  %v5484_v4 = vld [vmem:[%s5618_s18 + $0x10] sm:$0xff] }
 0x24b   : > { %v1740_v26 = vpop.permute.xlu0 %1739  ;;  %4929 = vmatprep.mubr.msk.f32.mxu0 %vm558_vm0, %v5484_v4  ;;  %v5508_v23 = vld [vmem:[%s5618_s18 + $0xd0] sm:$0xff] }
 0x24c   : > { %1831 = vrot.lane.b32.xlu1 %v6514_v49, %s5524_s22  ;;  %v6521_v0 = vmax.f32 %v6353_v17, %v1740_v26  ;;  %4930 = vmatmul.mubr.msk.f32.gmra.mxu0 %vm558_vm0, %v5485_v31  ;;  %v5486_v17 = vld [vmem:[%s5618_s18 + $0x20] sm:$0xff]  ;;  %v5509_v26 = vld [vmem:[%s5618_s18 + $0xd8] sm:$0xff] }
 0x24d   : > { %4932 = vmatprep.mubr.msk.f32.mxu0 %vm558_vm0, %v5486_v17  ;;  %v5513_v17 = vld [vmem:[%s5618_s18 + $0xf8] sm:$0xff] }
 0x24e   : > { %1835 = vrot.lane.b32.xlu0 %v6521_v0, %s5524_s22 }
 0x24f   : > { %v1738_v47 = vpop.permute.xlu0 %1737 }
 0x250   : > { %v6530_v22 = vmax.f32 %v6360_v56, %v1738_v47  ;;  %4933 = vmatmul.mubr.msk.f32.gmra.mxu0 %vm558_vm0, %v5487_v48  ;;  %v5489_v56 = vld [vmem:[%s5618_s18 + $0x38] sm:$0xff]  ;;  %v5511_v47 = vld [vmem:[%s5618_s18 + $0xe8] sm:$0xff] }
 0x251   : > { %4935 = vmatprep.mubr.msk.f32.mxu0 %vm558_vm0, %v5488_v9 }
 0x252   : > { %1833 = vrot.lane.b32.xlu0 %v6530_v22, %s5524_s22 }
 0x254   : > { %4936 = vmatmul.mubr.msk.f32.gmra.mxu0 %vm558_vm0, %v5489_v56 }
 0x255   : > { %4938 = vmatprep.mubr.msk.f32.mxu0 %vm558_vm0, %v5490_v45 }
 0x258   : > { %4939 = vmatmul.mubr.msk.f32.gmra.mxu0 %vm558_vm0, %v5491_v16 }
 0x259   : > { %4941 = vmatprep.mubr.msk.f32.mxu0 %vm558_vm0, %v5492_v53 }
 0x25c   : > { %4942 = vmatmul.mubr.msk.f32.gmra.mxu0 %vm558_vm0, %v5493_v36 }
 0x25d   : > { %4944 = vmatprep.mubr.msk.f32.mxu0 %vm558_vm0, %v5494_v14 }
 0x260   : > { %4945 = vmatmul.mubr.msk.f32.gmra.mxu0 %vm558_vm0, %v5495_v57 }
 0x261   : > { %4947 = vmatprep.mubr.msk.f32.mxu0 %vm558_vm0, %v5496_v7 }
 0x264   : > { %4948 = vmatmul.mubr.msk.f32.gmra.mxu0 %vm558_vm0, %v5497_v3 }
 0x265   : > { %4950 = vmatprep.mubr.msk.f32.mxu0 %vm558_vm0, %v5498_v18 }
 0x267   : > { %v1776_v38 = vpop.permute.xlu1 %1775 }
 0x268   : > { %4951 = vmatmul.mubr.msk.f32.gmra.mxu0 %vm558_vm0, %v5499_v33  ;;  %v6576_v59 = vmax.f32 %v6365_v24, %v1776_v38 }
 0x269   : > { %4953 = vmatprep.mubr.msk.f32.mxu0 %vm558_vm0, %v5500_v37 }
 0x26c   : > { %4954 = vmatmul.mubr.msk.f32.gmra.mxu0 %vm558_vm0, %v5501_v39 }
 0x26d   : > { %4956 = vmatprep.mubr.msk.f32.mxu0 %vm558_vm0, %v5502_v2 }
 0x26f   : > { %v1774_v25 = vpop.permute.xlu1 %1773 }
 0x270   : > { %v6567_v58 = vmax.f32 %v6370_v40, %v1774_v25  ;;  %4957 = vmatmul.mubr.msk.f32.gmra.mxu0 %vm558_vm0, %v5503_v13  ;;  %v5504_v40 = vld [vmem:[%s5618_s18 + $0xb0] sm:$0xff] }
 0x271   : > { %4959 = vmatprep.mubr.msk.f32.mxu0 %vm558_vm0, %v5504_v40 }
 0x272   : > { %1869 = vrot.lane.b32.xlu1 %v6567_v58, %s5525_s28 }
 0x274   : > { %4960 = vmatmul.mubr.msk.f32.gmra.mxu0 %vm558_vm0, %v5505_v20 }
 0x275   : > { %4962 = vmatprep.mubr.msk.f32.mxu0 %vm558_vm0, %v5506_v60 }
 0x276   : > { %1871 = vrot.lane.b32.xlu1 %v6576_v59, %s5525_s28 }
 0x278   : > { %4963 = vmatmul.mubr.msk.f32.gmra.mxu0 %vm558_vm0, %v5507_v34 }
 0x279   : > { %4965 = vmatprep.mubr.msk.f32.mxu0 %vm558_vm0, %v5508_v23 }
 0x27c   : > { %4966 = vmatmul.mubr.msk.f32.gmra.mxu0 %vm558_vm0, %v5509_v26 }
 0x27d   : > { %v1780_v24 = vpop.permute.xlu1 %1779  ;;  %4968 = vmatprep.mubr.msk.f32.mxu0 %vm558_vm0, %v5510_v19 }
 0x27e   : > { %v6591_v46 = vmax.f32 %v6375_v41, %v1780_v24  ;;  %v5512_v41 = vld [vmem:[%s5618_s18 + $0xf0] sm:$0xff] }
 0x280   : > { %1875 = vrot.lane.b32.xlu1 %v6591_v46, %s5525_s28  ;;  %4969 = vmatmul.mubr.msk.f32.gmra.mxu0 %vm558_vm0, %v5511_v47  ;;  %v6737_v47 = vpop.f32.mrf.mxu1 }
 0x281   : > { %4971 = vmatprep.mubr.msk.f32.mxu0 %vm558_vm0, %v5512_v41 }
 0x284   : > { %v1778_v4 = vpop.permute.xlu0 %1777  ;;  %4972 = vmatmul.mubr.msk.f32.gmra.mxu0 %vm558_vm0, %v5513_v17 }
 0x285   : > { %v6604_v31 = vmax.f32 %v6380_v27, %v1778_v4 }
 0x287   : > { %1873 = vrot.lane.b32.xlu0 %v6604_v31, %s5525_s28 }
 0x28b   : > { %v1782_v48 = vpop.permute.xlu0 %1781 }
 0x28c   : > { %v6613_v9 = vmax.f32 %v6385_v55, %v1782_v48 }
 0x28d   : > { %v1784_v56 = vpop.permute.xlu1 %1783 }
 0x28e   : > { %v6616_v45 = vmax.f32 %v6388_v43, %v1784_v56  ;;  %1877 = vrot.lane.b32.xlu0 %v6613_v9, %s5525_s28 }
 0x290   : > { %1879 = vrot.lane.b32.xlu1 %v6616_v45, %s5525_s28  ;;  %v1786_v27 = vpop.permute.xlu0 %1785 }
 0x291   : > { %v6623_v16 = vmax.f32 %v6395_v32, %v1786_v27 }
 0x292   : > { %v1788_v53 = vpop.permute.xlu1 %1787 }
 0x293   : > { %v6626_v36 = vmax.f32 %v6398_v21, %v1788_v53  ;;  %1881 = vrot.lane.b32.xlu0 %v6623_v16, %s5525_s28 }
 0x294   : > { %v1790_v55 = vpop.permute.xlu0 %1789 }
 0x295   : > { %v6631_v43 = vmax.f32 %v6405_v61, %v1790_v55  ;;  %1883 = vrot.lane.b32.xlu1 %v6626_v36, %s5525_s28 }
 0x296   : > { %v1792_v14 = vpop.permute.xlu1 %1791 }
 0x297   : > { %v6636_v57 = vmax.f32 %v6408_v52, %v1792_v14  ;;  %1885 = vrot.lane.b32.xlu0 %v6631_v43, %s5525_s28 }
 0x298   : > { %v1794_v32 = vpop.permute.xlu0 %1793 }
 0x299   : > { %v6641_v21 = vmax.f32 %v6415_v42, %v1794_v32  ;;  %1887 = vrot.lane.b32.xlu1 %v6636_v57, %s5525_s28 }
 0x29a   : > { %v1796_v7 = vpop.permute.xlu1 %1795 }
 0x29b   : > { %v6646_v61 = vmax.f32 %v6418_v54, %v1796_v7  ;;  %1889 = vrot.lane.b32.xlu0 %v6641_v21, %s5525_s28 }
 0x29c   : > { %v1798_v38 = vpop.permute.xlu0 %1797 }
 0x29d   : > { %v6651_v52 = vmax.f32 %v6425_v35, %v1798_v38  ;;  %1891 = vrot.lane.b32.xlu1 %v6646_v61, %s5525_s28  ;;  %v3351_v38 = vld [vmem:[%s7697_s10 + $0x70] sm:$0xff] }
 0x29e   : > { %v1800_v3 = vpop.permute.xlu1 %1799 }
 0x29f   : > { %v6656_v42 = vmax.f32 %v6428_v8, %v1800_v3  ;;  %1893 = vrot.lane.b32.xlu0 %v6651_v52, %s5525_s28 }
 0x2a0   : > { %v1802_v18 = vpop.permute.xlu0 %1801 }
 0x2a1   : > { %v6661_v54 = vmax.f32 %v6435_v6, %v1802_v18  ;;  %1895 = vrot.lane.b32.xlu1 %v6656_v42, %s5525_s28  ;;  %v3350_v18 = vld [vmem:[%s7697_s10 + $0x68] sm:$0xff] }
 0x2a2   : > { %v1804_v33 = vpop.permute.xlu1 %1803 }
 0x2a3   : > { %v6666_v35 = vmax.f32 %v6438_v1, %v1804_v33  ;;  %1897 = vrot.lane.b32.xlu0 %v6661_v54, %s5525_s28 }
 0x2a4   : > { %v1806_v37 = vpop.permute.xlu0 %1805 }
 0x2a5   : > { %v6671_v8 = vmax.f32 %v6445_v5, %v1806_v37  ;;  %1899 = vrot.lane.b32.xlu1 %v6666_v35, %s5525_s28  ;;  %v3336_v37 = vld [vmem:[%s7696_s9 + $0x78] sm:$0xff] }
 0x2a6   : > { %v1808_v25 = vpop.permute.xlu1 %1807  ;;  %5054 = vmatprep.subr.mxu0 %v3336_v37 }
 0x2a7   : > { %v6676_v6 = vmax.f32 %v6448_v30, %v1808_v25  ;;  %1901 = vrot.lane.b32.xlu0 %v6671_v8, %s5525_s28  ;;  %v3335_v25 = vld [vmem:[%s7696_s9 + $0x70] sm:$0xff]  ;;  %5055 = vmatpush3.msra.mxu0 %v3336_v37 }
 0x2a8   : > { %v1810_v39 = vpop.permute.xlu0 %1809  ;;  %5056 = vmatprep.subr.mxu0 %v3335_v25 }
 0x2a9   : > { %v6681_v1 = vmax.f32 %v6455_v29, %v1810_v39  ;;  %1903 = vrot.lane.b32.xlu1 %v6676_v6, %s5525_s28  ;;  %v3349_v39 = vld [vmem:[%s7697_s10 + $0x60] sm:$0xff]  ;;  %5057 = vmatpush3.msra.mxu0 %v3335_v25 }
 0x2aa   : > { %v1812_v2 = vpop.permute.xlu1 %1811 }
 0x2ab   : > { %v6686_v5 = vmax.f32 %v6458_v51, %v1812_v2  ;;  %1905 = vrot.lane.b32.xlu0 %v6681_v1, %s5525_s28 }
 0x2ac   : > { %v1814_v13 = vpop.permute.xlu0 %1813 }
 0x2ad   : > { %v6691_v30 = vmax.f32 %v6465_v50, %v1814_v13  ;;  %1907 = vrot.lane.b32.xlu1 %v6686_v5, %s5525_s28  ;;  %v3334_v13 = vld [vmem:[%s7696_s9 + $0x68] sm:$0xff] }
 0x2ae   : > { %v1816_v40 = vpop.permute.xlu1 %1815  ;;  %5058 = vmatprep.subr.mxu0 %v3334_v13 }
 0x2af   : > { %v6696_v29 = vmax.f32 %v6468_v10, %v1816_v40  ;;  %1909 = vrot.lane.b32.xlu0 %v6691_v30, %s5525_s28  ;;  %v3348_v40 = vld [vmem:[%s7697_s10 + $0x58] sm:$0xff]  ;;  %5059 = vmatpush3.msra.mxu0 %v3334_v13 }
 0x2b0   : > { %v1818_v20 = vpop.permute.xlu0 %1817 }
 0x2b1   : > { %v6701_v51 = vmax.f32 %v6475_v63, %v1818_v20  ;;  %1911 = vrot.lane.b32.xlu1 %v6696_v29, %s5525_s28 }
 0x2b2   : > { %v1820_v60 = vpop.permute.xlu1 %1819 }
 0x2b3   : > { %v6706_v50 = vmax.f32 %v6478_v11, %v1820_v60  ;;  %1913 = vrot.lane.b32.xlu0 %v6701_v51, %s5525_s28  ;;  %v3347_v60 = vld [vmem:[%s7697_s10 + $0x50] sm:$0xff] }
 0x2b4   : > { %v1822_v24 = vpop.permute.xlu0 %1821 }
 0x2b5   : > { %v6711_v10 = vmax.f32 %v6485_v15, %v1822_v24  ;;  %1915 = vrot.lane.b32.xlu1 %v6706_v50, %s5525_s28 }
 0x2b6   : > { %v1824_v34 = vpop.permute.xlu1 %1823 }
 0x2b7   : > { %v6716_v63 = vmax.f32 %v6488_v12, %v1824_v34  ;;  %1917 = vrot.lane.b32.xlu0 %v6711_v10, %s5525_s28  ;;  %v6730_v12 = vpop.f32.mrf.mxu0  ;;  %v3346_v34 = vld [vmem:[%s7697_s10 + $0x48] sm:$0xff] }
 0x2b8   : > { %v1826_v23 = vpop.permute.xlu0 %1825 }
 0x2b9   : > { %v6721_v11 = vmax.f32 %v6495_v28, %v1826_v23  ;;  %1919 = vrot.lane.b32.xlu1 %v6716_v63, %s5525_s28  ;;  %v6744_v17 = vpop.f32.mrf.mxu0 }
 0x2ba   : > { %v1828_v26 = vpop.permute.xlu1 %1827 }
 0x2bb   : > { %v6726_v15 = vmax.f32 %v6498_v44, %v1828_v26  ;;  %1921 = vrot.lane.b32.xlu0 %v6721_v11, %s5525_s28  ;;  %v6753_v27 = vpop.f32.mrf.mxu0  ;;  %v3345_v26 = vld [vmem:[%s7697_s10 + $0x40] sm:$0xff] }
 0x2bc   : > { %v1830_v19 = vpop.permute.xlu0 %1829 }
 0x2bd   : > { %7743 = vst [vmem:[#allocation2_spill] sm:$0xff] %v6726_v15  ;;  %v6733_v4 = vmax.f32 %v6511_v62, %v1830_v19  ;;  %1923 = vrot.lane.b32.xlu1 %v6726_v15, %s5525_s28  ;;  %v6748_v62 = vpop.f32.mrf.mxu1  ;;  %v6764_v55 = vpop.f32.mrf.mxu0 }
 0x2be   : > { %v1832_v28 = vpop.permute.xlu1 %1831  ;;  %v2353_v25 = vadd.f32 %v6748_v62, %v6744_v17 }
 0x2bf   : > { %7744 = vst [vmem:[#allocation3_spill] sm:$0xff] %v6733_v4  ;;  %v6740_v41 = vmax.f32 %v6514_v49, %v1832_v28  ;;  %1925 = vrot.lane.b32.xlu0 %v6733_v4, %s5525_s28  ;;  %v6760_v53 = vpop.f32.mrf.mxu1  ;;  %v3344_v28 = vld [vmem:[%s7697_s10 + $0x38] sm:$0xff] }
 0x2c0   : > { %v1836_v44 = vpop.permute.xlu0 %1835 }
 0x2c1   : > { %7745 = vst [vmem:[#allocation4_spill] sm:$0xff] %v6740_v41  ;;  %1927 = vrot.lane.b32.xlu1 %v6740_v41, %s5525_s28  ;;  %v6751_v48 = vmax.f32 %v6521_v0, %v1836_v44  ;;  %v6766_v14 = vpop.f32.mrf.mxu1  ;;  %v6768_v0 = vpop.f32.mrf.mxu0 }
 0x2c3   : > { %7746 = vst [vmem:[#allocation5_spill] sm:$0xff] %v6751_v48  ;;  %v6770_v32 = vpop.f32.mrf.mxu1  ;;  %v6772_v7 = vpop.f32.mrf.mxu0 }
 0x2c4   : > { %v1834_v56 = vpop.permute.xlu0 %1833 }
 0x2c5   : > { %v6756_v49 = vmax.f32 %v6530_v22, %v1834_v56  ;;  %1931 = vrot.lane.b32.xlu1 %v6751_v48, %s5525_s28  ;;  %v3352_v22 = vld [vmem:[%s7697_s10 + $0x78] sm:$0xff]  ;;  %v6780_v3 = vpop.f32.mrf.mxu1  ;;  %v6785_v33 = vpop.f32.mrf.mxu0  ;;  %v3343_v56 = vld [vmem:[%s7697_s10 + $0x30] sm:$0xff] }
 0x2c6   : > { %4974 = vmatprep.subr.mxu1 %v3352_v22 }
 0x2c7   : > { %7747 = vst [vmem:[#allocation6_spill] sm:$0xff] %v6756_v49  ;;  %1929 = vrot.lane.b32.xlu0 %v6756_v49, %s5525_s28  ;;  %4975 = vmatpush3.msra.mxu1 %v3352_v22  ;;  %v6796_v2 = vpop.f32.mrf.mxu1  ;;  %v6804_v20 = vpop.f32.mrf.mxu0 }
 0x2c8   : > { %4976 = vmatprep.subr.mxu1 %v3351_v38 }
 0x2c9   : > { %4977 = vmatpush3.msra.mxu1 %v3351_v38  ;;  %v6809_v24 = vpop.f32.mrf.mxu1  ;;  %v6814_v23 = vpop.f32.mrf.mxu0 }
 0x2ca   : > { %4978 = vmatprep.subr.mxu1 %v3350_v18 }
 0x2cb   : > { %4979 = vmatpush3.msra.mxu1 %v3350_v18  ;;  %v6819_v19 = vpop.f32.mrf.mxu1  ;;  %v6824_v44 = vpop.f32.mrf.mxu0 }
 0x2cc   : > { %4980 = vmatprep.subr.mxu1 %v3349_v39 }
 0x2cd   : > { %4981 = vmatpush3.msra.mxu1 %v3349_v39  ;;  %v6829_v22 = vpop.f32.mrf.mxu1  ;;  %v6832_v37 = vpop.f32.mrf.mxu0 }
 0x2ce   : > { %4982 = vmatprep.subr.mxu1 %v3348_v40 }
 0x2cf   : > { %4983 = vmatpush3.msra.mxu1 %v3348_v40  ;;  %v6836_v13 = vpop.f32.mrf.mxu1 }
 0x2d0   : > { %4984 = vmatprep.subr.mxu1 %v3347_v60 }
 0x2d1   : > { %4985 = vmatpush3.msra.mxu1 %v3347_v60  ;;  %v6846_v49 = vpop.f32.mrf.mxu1 }
 0x2d2   : > { %4986 = vmatprep.subr.mxu1 %v3346_v34 }
 0x2d3   : > { %4987 = vmatpush3.msra.mxu1 %v3346_v34 }
 0x2d4   : > { %4988 = vmatprep.subr.mxu1 %v3345_v26 }
 0x2d5   : > { %4989 = vmatpush3.msra.mxu1 %v3345_v26  ;;  %v6841_v26 = vpop.f32.mrf.mxu0 }
 0x2d6   : > { %4990 = vmatprep.subr.mxu1 %v3344_v28 }
 0x2d7   : > { %4991 = vmatpush3.msra.mxu1 %v3344_v28  ;;  %v6850_v62 = vpop.f32.mrf.mxu0 }
 0x2d8   : > { %4992 = vmatprep.subr.mxu1 %v3343_v56 }
 0x2d9   : > { %4993 = vmatpush3.msra.mxu1 %v3343_v56 }
 0x2e4   : > { %v1870_v38 = vpop.permute.xlu1 %1869 }
 0x2e5   : > { %v1933_v18 = vmax.f32 %v6567_v58, %v1870_v38  ;;  %v2358_v58 = vadd.f32 %v6737_v47, %v6730_v12 }
 0x2e7   : > { %v2511_v39 = vmul.f32 15.0, %v1933_v18  ;;  %v6853_v18 = vpop.f32.mrf.mxu1 }
 0x2e8   : > { %v1872_v40 = vpop.permute.xlu1 %1871 }
 0x2e9   : > { %v6838_v60 = vsub.f32 %v2353_v25, %v2511_v39  ;;  %v1934_v34 = vmax.f32 %v6576_v59, %v1872_v40  ;;  %v6855_v59 = vpop.f32.mrf.mxu0  ;;  %v6857_v39 = vpop.f32.mrf.mxu1 }
 0x2eb   : > { %7748 = vst [vmem:[#allocation7_spill] sm:$0xff] %v6838_v60  ;;  %v2575_v28 = vmul.f32 1.442695, %v6838_v60  ;;  %v2512_v38 = vmul.f32 15.0, %v1934_v34  ;;  %v6860_v47 = vpop.f32.mrf.mxu0  ;;  %v6862_v40 = vpop.f32.mrf.mxu1 }
 0x2ed   : > { %5354 = vpow2.f32 %v2575_v28  ;;  %v6848_v17 = vsub.f32 %v2358_v58, %v2512_v38  ;;  %v2368_v28 = vadd.f32 %v6760_v53, %v6753_v27  ;;  %v6868_v38 = vpop.f32.mrf.mxu0  ;;  %v6872_v48 = vpop.f32.mrf.mxu1 }
 0x2ef   : > { %7749 = vst [vmem:[#allocation8_spill] sm:$0xff] %v6848_v17  ;;  %v2577_v56 = vmul.f32 1.442695, %v6848_v17  ;;  %v6880_v4 = vpop.f32.mrf.mxu0 }
 0x2f1   : > { %5356 = vpow2.f32 %v2577_v56 }
 0x2f2   : > { %v1876_v25 = vpop.permute.xlu1 %1875 }
 0x2f3   : > { %v1936_v12 = vmax.f32 %v6591_v46, %v1876_v25  ;;  %v2363_v25 = vadd.f32 %v6766_v14, %v6764_v55  ;;  %v6890_v55 = vpop.f32.mrf.mxu0 }
 0x2f5   : > { %v2514_v34 = vmul.f32 15.0, %v1936_v12 }
 0x2f7   : > { %v6874_v46 = vsub.f32 %v2368_v28, %v2514_v34 }
 0x2f9   : > { %v1874_v56 = vpop.permute.xlu0 %1873  ;;  %7751 = vst [vmem:[#allocation10_spill] sm:$0xff] %v6874_v46 }
 0x2fa   : > { %v6864_v58 = vpop.eup %5354  ;;  %v1935_v17 = vmax.f32 %v6604_v31, %v1874_v56  ;;  %v6885_v31 = vpop.f32.mrf.mxu1  ;;  %v2581_v56 = vmul.f32 1.442695, %v6874_v46  ;;  %v2378_v46 = vadd.f32 %v6770_v32, %v6768_v0 }
 0x2fb   : > { %7750 = vst [vmem:[#allocation9_spill] sm:$0xff] %v6864_v58  ;;  %v2703_v60 = vand.u32 2147483647, %v6864_v58 }
 0x2fc   : > { %v2513_v12 = vmul.f32 15.0, %v1935_v17 }
 0x2fd   : > { %2735 = vadd.xlane.f32.xlu0 %v2703_v60  ;;  %v2373_v60 = vadd.f32 %v6780_v3, %v6772_v7 }
 0x2fe   : > { %v6878_v41 = vpop.eup %5356  ;;  %v6882_v27 = vsub.f32 %v2363_v25, %v2513_v12  ;;  %v6895_v12 = vpop.f32.mrf.mxu1 }
 0x2ff   : > { %7752 = vst [vmem:[#allocation11_spill] sm:$0xff] %v6878_v41  ;;  %v2704_v53 = vand.u32 2147483647, %v6878_v41 }
 0x300   : > { %7753 = vst [vmem:[#allocation12_spill] sm:$0xff] %v6882_v27  ;;  %v1878_v58 = vpop.permute.xlu0 %1877  ;;  %v2579_v34 = vmul.f32 1.442695, %v6882_v27  ;;  %v6909_v3 = vpop.f32.mrf.mxu1 }
 0x301   : > { %v1937_v28 = vmax.f32 %v6613_v9, %v1878_v58  ;;  %2737 = vadd.xlane.f32.xlu1 %v2704_v53  ;;  %v6901_v58 = vpop.f32.mrf.mxu0 }
 0x302   : > { %v1880_v14 = vpop.permute.xlu1 %1879  ;;  %5358 = vpow2.f32 %v2579_v34 }
 0x303   : > { %v2515_v17 = vmul.f32 15.0, %v1937_v28  ;;  %v1938_v25 = vmax.f32 %v6616_v45, %v1880_v14  ;;  %5360 = vpow2.f32 %v2581_v56  ;;  %v2383_v45 = vadd.f32 %v6809_v24, %v6804_v20  ;;  %v6915_v14 = vpop.f32.mrf.mxu0  ;;  %v6931_v24 = vpop.f32.mrf.mxu1 }
 0x304   : > { %v2388_v28 = vadd.f32 %v6796_v2, %v6785_v33  ;;  %v3332_v33 = vld [vmem:[%s7696_s9 + $0x58] sm:$0xff]  ;;  %v2393_v2 = vadd.f32 %v6829_v22, %v6824_v44 }
 0x305   : > { %v6899_v27 = vsub.f32 %v2373_v60, %v2515_v17  ;;  %v2516_v9 = vmul.f32 15.0, %v1938_v25  ;;  %v1882_v53 = vpop.permute.xlu0 %1881 }
 0x306   : > { %v1939_v7 = vmax.f32 %v6623_v16, %v1882_v53 }
 0x307   : > { %7754 = vst [vmem:[#allocation13_spill] sm:$0xff] %v6899_v27  ;;  %v2583_v41 = vmul.f32 1.442695, %v6899_v27  ;;  %v6904_v15 = vsub.f32 %v2378_v46, %v2516_v9  ;;  %v1884_v56 = vpop.permute.xlu1 %1883 }
 0x308   : > { %v2517_v32 = vmul.f32 15.0, %v1939_v7  ;;  %v1940_v34 = vmax.f32 %v6626_v36, %v1884_v56  ;;  %v3333_v36 = vld [vmem:[%s7696_s9 + $0x60] sm:$0xff]  ;;  %v2398_v7 = vadd.f32 %v6819_v19, %v6814_v23 }
 0x309   : > { %7755 = vst [vmem:[#allocation14_spill] sm:$0xff] %v6904_v15  ;;  %5362 = vpow2.f32 %v2583_v41  ;;  %v2585_v0 = vmul.f32 1.442695, %v6904_v15  ;;  %v1886_v46 = vpop.permute.xlu0 %1885  ;;  %v3342_v41 = vld [vmem:[%s7697_s10 + $0x28] sm:$0xff]  ;;  %5060 = vmatprep.subr.mxu0 %v3333_v36 }
 0x30a   : > { %v6917_v16 = vsub.f32 %v2383_v45, %v2517_v32  ;;  %v2518_v60 = vmul.f32 15.0, %v1940_v34  ;;  %v1941_v20 = vmax.f32 %v6631_v43, %v1886_v46  ;;  %4994 = vmatprep.subr.mxu1 %v3342_v41  ;;  %5061 = vmatpush3.msra.mxu0 %v3333_v36  ;;  %v6939_v45 = vpop.f32.mrf.mxu0  ;;  %v6946_v34 = vpop.f32.mrf.mxu1 }
 0x30b   : > { %5364 = vpow2.f32 %v2585_v0  ;;  %v1888_v17 = vpop.permute.xlu1 %1887  ;;  %4995 = vmatpush3.msra.mxu1 %v3342_v41  ;;  %5062 = vmatprep.subr.mxu0 %v3332_v33  ;;  %v2403_v41 = vadd.f32 %v6846_v49, %v6841_v26 }
 0x30c   : > { %7756 = vst [vmem:[#allocation15_spill] sm:$0xff] %v6917_v16  ;;  %v2587_v43 = vmul.f32 1.442695, %v6917_v16  ;;  %v6934_v25 = vsub.f32 %v2388_v28, %v2518_v60  ;;  %v2519_v9 = vmul.f32 15.0, %v1941_v20  ;;  %v1942_v53 = vmax.f32 %v6636_v57, %v1888_v17  ;;  %5063 = vmatpush3.msra.mxu0 %v3332_v33  ;;  %v6959_v36 = vpop.f32.mrf.mxu0 }
 0x30d   : > { %v1890_v44 = vpop.permute.xlu0 %1889  ;;  %v2408_v20 = vadd.f32 %v6836_v13, %v6832_v37 }
 0x30e   : > { %7757 = vst [vmem:[#allocation16_spill] sm:$0xff] %v6934_v25  ;;  %5366 = vpow2.f32 %v2587_v43  ;;  %v2589_v22 = vmul.f32 1.442695, %v6934_v25  ;;  %v6942_v56 = vsub.f32 %v2393_v2, %v2519_v9  ;;  %v2520_v0 = vmul.f32 15.0, %v1942_v53  ;;  %v6966_v53 = vpop.f32.mrf.mxu1 }
 0x30f   : > { %v6944_v32 = vpop.eup %5358  ;;  %v1943_v57 = vmax.f32 %v6641_v21, %v1890_v44  ;;  %v1892_v28 = vpop.permute.xlu1 %1891 }
 0x310   : > { %7758 = vst [vmem:[#allocation17_spill] sm:$0xff] %v6942_v56  ;;  %v6949_v46 = vpop.eup %5360  ;;  %5368 = vpow2.f32 %v2589_v22  ;;  %v2591_v23 = vmul.f32 1.442695, %v6942_v56  ;;  %v6952_v19 = vsub.f32 %v2398_v7, %v2520_v0  ;;  %v1944_v60 = vmax.f32 %v6646_v61, %v1892_v28 }
 0x311   : > { %7759 = vst [vmem:[#allocation18_spill] sm:$0xff] %v6949_v46  ;;  %v2521_v33 = vmul.f32 15.0, %v1943_v57  ;;  %v1894_v21 = vpop.permute.xlu0 %1893  ;;  %v2705_v2 = vand.u32 2147483647, %v6944_v32  ;;  %v2413_v61 = vadd.f32 %v6857_v39, %v6855_v59  ;;  %v2706_v13 = vand.u32 2147483647, %v6949_v46  ;;  %v6978_v59 = vpop.f32.mrf.mxu0 }
 0x312   : > { %7760 = vst [vmem:[#allocation19_spill] sm:$0xff] %v6952_v19  ;;  %5370 = vpow2.f32 %v2591_v23  ;;  %v2593_v17 = vmul.f32 1.442695, %v6952_v19  ;;  %v2522_v43 = vmul.f32 15.0, %v1944_v60  ;;  %v1945_v9 = vmax.f32 %v6651_v52, %v1894_v21  ;;  %v3809_v19 = vld [vmem:[%s7698_s11 + $0x30] sm:$0xff] }
 0x313   : > { %v6968_v37 = vsub.f32 %v2403_v41, %v2521_v33  ;;  %v1896_v49 = vpop.permute.xlu1 %1895  ;;  %2739 = vadd.xlane.f32.xlu0 %v2705_v2  ;;  %v2418_v52 = vadd.f32 %v6853_v18, %v6850_v62  ;;  %v6989_v41 = vpop.f32.mrf.mxu1 }
 0x314   : > { %5372 = vpow2.f32 %v2593_v17  ;;  %v6971_v26 = vsub.f32 %v2408_v20, %v2522_v43  ;;  %v2523_v7 = vmul.f32 15.0, %v1945_v9  ;;  %v1946_v44 = vmax.f32 %v6656_v42, %v1896_v49  ;;  %v6995_v17 = vpop.f32.mrf.mxu0 }
 0x315   : > { %7761 = vst [vmem:[#allocation20_spill] sm:$0xff] %v6968_v37  ;;  %v2595_v39 = vmul.f32 1.442695, %v6968_v37  ;;  %v1898_v0 = vpop.permute.xlu0 %1897  ;;  %v2423_v42 = vadd.f32 %v6872_v48, %v6868_v38 }
 0x316   : > { %7762 = vst [vmem:[#allocation21_spill] sm:$0xff] %v6971_v26  ;;  %v6974_v22 = vpop.eup %5362  ;;  %v2597_v57 = vmul.f32 1.442695, %v6971_v26  ;;  %v6982_v28 = vsub.f32 %v2413_v61, %v2523_v7  ;;  %v2524_v23 = vmul.f32 15.0, %v1946_v44  ;;  %v1947_v60 = vmax.f32 %v6661_v54, %v1898_v0 }
 0x317   : > { %5374 = vpow2.f32 %v2595_v39  ;;  %v1900_v62 = vpop.permute.xlu1 %1899  ;;  %2741 = vadd.xlane.f32.xlu0 %v2706_v13  ;;  %v2707_v18 = vand.u32 2147483647, %v6974_v22  ;;  %v2428_v13 = vadd.f32 %v6862_v40, %v6860_v47  ;;  %v2433_v7 = vadd.f32 %v6895_v12, %v6890_v55  ;;  %v7017_v47 = vpop.f32.mrf.mxu0 }
 0x318   : > { %7763 = vst [vmem:[#allocation22_spill] sm:$0xff] %v6982_v28  ;;  %v6985_v20 = vpop.eup %5364  ;;  %5376 = vpow2.f32 %v2597_v57  ;;  %v2599_v33 = vmul.f32 1.442695, %v6982_v28  ;;  %v6993_v21 = vsub.f32 %v2418_v52, %v2524_v23  ;;  %v2525_v2 = vmul.f32 15.0, %v1947_v60 }
 0x319   : > { %v1948_v54 = vmax.f32 %v6666_v35, %v1900_v62  ;;  %v1902_v43 = vpop.permute.xlu0 %1901  ;;  %2743 = vadd.xlane.f32.xlu1 %v2707_v18  ;;  %v2708_v48 = vand.u32 2147483647, %v6985_v20  ;;  %v7009_v35 = vpop.f32.mrf.mxu1  ;;  %v2438_v23 = vadd.f32 %v6885_v31, %v6880_v4 }
 0x31a   : > { %7764 = vst [vmem:[#allocation23_spill] sm:$0xff] %v6993_v21  ;;  %5378 = vpow2.f32 %v2599_v33  ;;  %v2601_v38 = vmul.f32 1.442695, %v6993_v21  ;;  %v7000_v9 = vsub.f32 %v2423_v42, %v2525_v2  ;;  %v1949_v61 = vmax.f32 %v6671_v8, %v1902_v43 }
 0x31b   : > { %v7003_v49 = vpop.eup %5366  ;;  %v2526_v44 = vmul.f32 15.0, %v1948_v54  ;;  %v1904_v52 = vpop.permute.xlu1 %1903  ;;  %2745 = vadd.xlane.f32.xlu0 %v2708_v48 }
 0x31c   : > { %7765 = vst [vmem:[#allocation24_spill] sm:$0xff] %v7000_v9  ;;  %5380 = vpow2.f32 %v2601_v38  ;;  %v2603_v39 = vmul.f32 1.442695, %v7000_v9  ;;  %v2527_v0 = vmul.f32 15.0, %v1949_v61  ;;  %v1950_v57 = vmax.f32 %v6676_v6, %v1904_v52  ;;  %v7029_v33 = vpop.f32.mrf.mxu1 }
 0x31d   : > { %v7013_v8 = vpop.eup %5368  ;;  %v7019_v40 = vsub.f32 %v2428_v13, %v2526_v44  ;;  %v1906_v55 = vpop.permute.xlu0 %1905  ;;  %v2709_v12 = vand.u32 2147483647, %v7003_v49  ;;  %v2443_v6 = vadd.f32 %v6931_v24, %v6915_v14  ;;  %v2448_v14 = vadd.f32 %v6909_v3, %v6901_v58  ;;  %v3330_v3 = vld [vmem:[%s7696_s9 + $0x48] sm:$0xff] }
 0x31e   : > { %5382 = vpow2.f32 %v2603_v39  ;;  %v7022_v60 = vsub.f32 %v2433_v7, %v2527_v0  ;;  %v2528_v42 = vmul.f32 15.0, %v1950_v57  ;;  %v1951_v62 = vmax.f32 %v6681_v1, %v1906_v55  ;;  %v7041_v24 = vpop.f32.mrf.mxu0  ;;  %v3341_v7 = vld [vmem:[%s7697_s10 + $0x20] sm:$0xff]  ;;  %v2472_v39 = vpop.f32.mrf.mxu1 }
 0x31f   : > { %7766 = vst [vmem:[#allocation25_spill] sm:$0xff] %v7019_v40  ;;  %v7025_v18 = vpop.eup %5370  ;;  %v2605_v4 = vmul.f32 1.442695, %v7019_v40  ;;  %2747 = vadd.xlane.f32.xlu1 %v2709_v12  ;;  %v1908_v31 = vpop.permute.xlu1 %1907  ;;  %v2710_v2 = vand.u32 2147483647, %v7013_v8  ;;  %4996 = vmatprep.subr.mxu1 %v3341_v7  ;;  %v7789_v40 = vld [vmem:[#allocation11_spill] sm:$0xff] }
 0x320   : > { %7767 = vst [vmem:[#allocation26_spill] sm:$0xff] %v7022_v60  ;;  %v2607_v54 = vmul.f32 1.442695, %v7022_v60  ;;  %v7034_v43 = vsub.f32 %v2438_v23, %v2528_v42  ;;  %v2529_v48 = vmul.f32 15.0, %v1951_v62  ;;  %v1952_v1 = vmax.f32 %v6686_v5, %v1908_v31  ;;  %v3331_v5 = vld [vmem:[%s7696_s9 + $0x50] sm:$0xff]  ;;  %4997 = vmatpush3.msra.mxu1 %v3341_v7  ;;  %v7070_v31 = vpop.f32.mrf.mxu0 }
 0x321   : > { %v7037_v38 = vpop.eup %5372  ;;  %5384 = vpow2.f32 %v2605_v4  ;;  %v1910_v61 = vpop.permute.xlu0 %1909  ;;  %2749 = vadd.xlane.f32.xlu0 %v2710_v2  ;;  %v2711_v13 = vand.u32 2147483647, %v7025_v18  ;;  %5064 = vmatprep.subr.mxu0 %v3331_v5  ;;  %v2453_v4 = vadd.f32 %v6966_v53, %v6959_v36  ;;  %v2463_v36 = vadd.f32 %v7009_v35, %v6995_v17 }
 0x322   : > { %7768 = vst [vmem:[#allocation27_spill] sm:$0xff] %v7034_v43  ;;  %5386 = vpow2.f32 %v2607_v54  ;;  %v2609_v44 = vmul.f32 1.442695, %v7034_v43  ;;  %v7051_v52 = vsub.f32 %v2443_v6, %v2529_v48  ;;  %v2530_v58 = vmul.f32 15.0, %v1952_v1  ;;  %5065 = vmatpush3.msra.mxu0 %v3331_v5  ;;  %v7082_v53 = vpop.f32.mrf.mxu1  ;;  %v3328_v5 = vld [vmem:[%s7696_s9 + $0x38] sm:$0xff] }
 0x323   : > { %v1953_v0 = vmax.f32 %v6691_v30, %v1910_v61  ;;  %2751 = vadd.xlane.f32.xlu1 %v2711_v13  ;;  %v1912_v57 = vpop.permute.xlu1 %1911  ;;  %v2712_v23 = vand.u32 2147483647, %v7037_v38  ;;  %v2458_v30 = vadd.f32 %v6946_v34, %v6939_v45  ;;  %5066 = vmatprep.subr.mxu0 %v3330_v3  ;;  %v3329_v45 = vld [vmem:[%s7696_s9 + $0x40] sm:$0xff] }
 0x324   : > { %7769 = vst [vmem:[#allocation28_spill] sm:$0xff] %v7051_v52  ;;  %v7058_v55 = vpop.eup %5374  ;;  %5388 = vpow2.f32 %v2609_v44  ;;  %v2611_v12 = vmul.f32 1.442695, %v7051_v52  ;;  %v7061_v42 = vsub.f32 %v2448_v14, %v2530_v58  ;;  %v1954_v62 = vmax.f32 %v6696_v29, %v1912_v57  ;;  %5067 = vmatpush3.msra.mxu0 %v3330_v3 }
 0x325   : > { %v7064_v6 = vpop.eup %5376  ;;  %v2531_v2 = vmul.f32 15.0, %v1953_v0  ;;  %v1914_v54 = vpop.permute.xlu0 %1913  ;;  %2753 = vadd.xlane.f32.xlu0 %v2712_v23  ;;  %v2713_v48 = vand.u32 2147483647, %v7058_v55  ;;  %5068 = vmatprep.subr.mxu0 %v3329_v45  ;;  %v2468_v3 = vadd.f32 %v6989_v41, %v6978_v59  ;;  %v3327_v59 = vld [vmem:[%s7696_s9 + $0x30] sm:$0xff] }
 0x326   : > { %7770 = vst [vmem:[#allocation29_spill] sm:$0xff] %v7061_v42  ;;  %5390 = vpow2.f32 %v2611_v12  ;;  %v2613_v29 = vmul.f32 1.442695, %v7061_v42  ;;  %v2532_v1 = vmul.f32 15.0, %v1954_v62  ;;  %v1955_v14 = vmax.f32 %v6701_v51, %v1914_v54  ;;  %v3340_v51 = vld [vmem:[%s7697_s10 + $0x18] sm:$0xff]  ;;  %5069 = vmatpush3.msra.mxu0 %v3329_v45  ;;  %v2257_v0 = vpop.f32.mrf.mxu0  ;;  %v2482_v54 = vpop.f32.mrf.mxu1  ;;  %v3326_v45 = vld [vmem:[%s7696_s9 + $0x28] sm:$0xff] }
 0x327   : > { %v7078_v34 = vpop.eup %5378  ;;  %v7084_v61 = vsub.f32 %v2453_v4, %v2531_v2  ;;  %2755 = vadd.xlane.f32.xlu1 %v2713_v48  ;;  %v1916_v13 = vpop.permute.xlu1 %1915  ;;  %v2714_v7 = vand.u32 2147483647, %v7064_v6  ;;  %4998 = vmatprep.subr.mxu1 %v3340_v51  ;;  %v2473_v2 = vadd.f32 %v2472_v39, %v7041_v24 }
 0x328   : > { %5392 = vpow2.f32 %v2613_v29  ;;  %v7093_v44 = vsub.f32 %v2458_v30, %v2532_v1  ;;  %v2533_v17 = vmul.f32 15.0, %v1955_v14  ;;  %v1956_v35 = vmax.f32 %v6706_v50, %v1916_v13  ;;  %4999 = vmatpush3.msra.mxu1 %v3340_v51  ;;  %5070 = vmatprep.subr.mxu0 %v3328_v5 }
 0x329   : > { %7771 = vst [vmem:[#allocation30_spill] sm:$0xff] %v7084_v61  ;;  %v7096_v58 = vpop.eup %5380  ;;  %v2615_v57 = vmul.f32 1.442695, %v7084_v61  ;;  %v1918_v23 = vpop.permute.xlu0 %1917  ;;  %2757 = vadd.xlane.f32.xlu0 %v2714_v7  ;;  %v2715_v12 = vand.u32 2147483647, %v7078_v34  ;;  %5071 = vmatpush3.msra.mxu0 %v3328_v5  ;;  %v3339_v7 = vld [vmem:[%s7697_s10 + $0x10] sm:$0xff] }
 0x32a   : > { %7772 = vst [vmem:[#allocation31_spill] sm:$0xff] %v7093_v44  ;;  %v2617_v62 = vmul.f32 1.442695, %v7093_v44  ;;  %v7103_v30 = vsub.f32 %v2463_v36, %v2533_v17  ;;  %v2534_v50 = vmul.f32 15.0, %v1956_v35  ;;  %v1957_v4 = vmax.f32 %v6711_v10, %v1918_v23  ;;  %5072 = vmatprep.subr.mxu0 %v3327_v59  ;;  %v7119_v36 = vpop.f32.mrf.mxu0  ;;  %5000 = vmatprep.subr.mxu1 %v3339_v7  ;;  %v7259_v61 = vld [vmem:[%s7695_s8] ss:$0 sm:$0xff] }
 0x32b   : > { %v7109_v41 = vpop.eup %5382  ;;  %5394 = vpow2.f32 %v2615_v57  ;;  %2759 = vadd.xlane.f32.xlu1 %v2715_v12  ;;  %v1920_v48 = vpop.permute.xlu1 %1919  ;;  %v2716_v29 = vand.u32 2147483647, %v7096_v58  ;;  %5073 = vmatpush3.msra.mxu0 %v3327_v59  ;;  %v2478_v57 = vadd.f32 %v7029_v33, %v7017_v47  ;;  %v2483_v23 = vadd.f32 %v2482_v54, %v2257_v0  ;;  %v3338_v0 = vld [vmem:[%s7697_s10 + $0x8] sm:$0xff]  ;;  %v3324_v54 = vld [vmem:[%s7696_s9 + $0x18] sm:$0xff] }
 0x32c   : > { %7773 = vst [vmem:[#allocation32_spill] sm:$0xff] %v7103_v30  ;;  %5396 = vpow2.f32 %v2617_v62  ;;  %v2619_v1 = vmul.f32 1.442695, %v7103_v30  ;;  %v7114_v10 = vsub.f32 %v2468_v3, %v2534_v50  ;;  %v2535_v14 = vmul.f32 15.0, %v1957_v4  ;;  %5074 = vmatprep.subr.mxu0 %v3326_v45  ;;  %v4918_v12 = vpop.f32.mrf.mxu1  ;;  %5001 = vmatpush3.msra.mxu1 %v3339_v7 }
 0x32d   : > { %v1958_v24 = vmax.f32 %v6716_v63, %v1920_v48  ;;  %v1922_v39 = vpop.permute.xlu0 %1921  ;;  %2761 = vadd.xlane.f32.xlu0 %v2716_v29  ;;  %v2717_v13 = vand.u32 2147483647, %v7109_v41  ;;  %v3325_v63 = vld [vmem:[%s7696_s9 + $0x20] sm:$0xff]  ;;  %5075 = vmatpush3.msra.mxu0 %v3326_v45  ;;  %v2488_v45 = vadd.f32 %v7082_v53, %v7070_v31  ;;  %v3323_v31 = vld [vmem:[%s7696_s9 + $0x10] sm:$0xff] }
 0x32e   : > { %7774 = vst [vmem:[#allocation33_spill] sm:$0xff] %v7114_v10  ;;  %v7126_v51 = vpop.eup %5384  ;;  %5398 = vpow2.f32 %v2619_v1  ;;  %v2621_v5 = vmul.f32 1.442695, %v7114_v10  ;;  %v7129_v17 = vsub.f32 %v2473_v2, %v2535_v14  ;;  %v1959_v35 = vmax.f32 %v6721_v11, %v1922_v39  ;;  %v7776_v2 = vld [vmem:[#allocation2_spill] sm:$0xff]  ;;  %v2267_v1 = vpop.f32.mrf.mxu0  ;;  %5076 = vmatprep.subr.mxu0 %v3325_v63  ;;  %5002 = vmatprep.subr.mxu1 %v3338_v0 }
 0x32f   : > { %v7135_v3 = vpop.eup %5386  ;;  %v2536_v62 = vmul.f32 15.0, %v1958_v24  ;;  %2763 = vadd.xlane.f32.xlu1 %v2717_v13  ;;  %v1924_v50 = vpop.permute.xlu1 %1923  ;;  %v2718_v4 = vand.u32 2147483647, %v7126_v51  ;;  %5077 = vmatpush3.msra.mxu0 %v3325_v63  ;;  %v7781_v63 = vld [vmem:[#allocation4_spill] sm:$0xff] }
 0x330   : > { %7775 = vst [vmem:[#allocation34_spill] sm:$0xff] %v7129_v17  ;;  %5400 = vpow2.f32 %v2621_v5  ;;  %v2623_v11 = vmul.f32 1.442695, %v7129_v17  ;;  %v2537_v59 = vmul.f32 15.0, %v1959_v35  ;;  %v1960_v48 = vmax.f32 %v7776_v2, %v1924_v50  ;;  %v2492_v7 = vpop.f32.mrf.mxu1  ;;  %v7779_v35 = vld [vmem:[#allocation3_spill] sm:$0xff]  ;;  %5003 = vmatpush3.msra.mxu1 %v3338_v0  ;;  %5078 = vmatprep.subr.mxu0 %v3324_v54 }
 0x331   : > { %v7142_v29 = vpop.eup %5388  ;;  %v7144_v14 = vsub.f32 %v2478_v57, %v2536_v62  ;;  %v1926_v47 = vpop.permute.xlu0 %1925  ;;  %2765 = vadd.xlane.f32.xlu0 %v2718_v4  ;;  %v2719_v33 = vand.u32 2147483647, %v7135_v3  ;;  %v2493_v2 = vadd.f32 %v2492_v7, %v2267_v1  ;;  %5079 = vmatpush3.msra.mxu0 %v3324_v54  ;;  %v2498_v0 = vadd.f32 %v4918_v12, %v7119_v36  ;;  %v7784_v12 = vld [vmem:[#allocation5_spill] sm:$0xff] }
 0x332   : > { %5402 = vpow2.f32 %v2623_v11  ;;  %v7155_v24 = vsub.f32 %v2483_v23, %v2537_v59  ;;  %v2538_v39 = vmul.f32 15.0, %v1960_v48  ;;  %v1961_v57 = vmax.f32 %v7779_v35, %v1926_v47  ;;  %v3337_v11 = vld [vmem:[%s7697_s10] sm:$0xff]  ;;  %v4841_v48 = vpop.f32.mrf.mxu0  ;;  %5080 = vmatprep.subr.mxu0 %v3323_v31  ;;  %v3322_v35 = vld [vmem:[%s7696_s9 + $0x8] sm:$0xff]  ;;  %v4921_v1 = vpop.f32.mrf.mxu1 }
 0x333   : > { %7777 = vst [vmem:[#allocation2_spill] sm:$0xff] %v7144_v14  ;;  %v7157_v13 = vpop.eup %5390  ;;  %v2625_v5 = vmul.f32 1.442695, %v7144_v14  ;;  %2767 = vadd.xlane.f32.xlu1 %v2719_v33  ;;  %v1928_v62 = vpop.permute.xlu1 %1927  ;;  %v2720_v50 = vand.u32 2147483647, %v7142_v29  ;;  %5004 = vmatprep.subr.mxu1 %v3337_v11 }
 0x334   : > { %7778 = vst [vmem:[#allocation35_spill] sm:$0xff] %v7155_v24  ;;  %v2627_v53 = vmul.f32 1.442695, %v7155_v24  ;;  %v7166_v23 = vsub.f32 %v2488_v45, %v2538_v39  ;;  %v1962_v4 = vmax.f32 %v7781_v63, %v1928_v62  ;;  %v2539_v47 = vmul.f32 15.0, %v1961_v57  ;;  %5005 = vmatpush3.msra.mxu1 %v3337_v11  ;;  %5081 = vmatpush3.msra.mxu0 %v3323_v31  ;;  %v2277_v63 = vpop.f32.mrf.mxu0 }
 0x335   : > { %v7172_v59 = vpop.eup %5392  ;;  %5404 = vpow2.f32 %v2625_v5  ;;  %2769 = vadd.xlane.f32.xlu0 %v2720_v50  ;;  %v2721_v33 = vand.u32 2147483647, %v7157_v13  ;;  %v3321_v50 = vld [vmem:[%s7696_s9] sm:$0xff]  ;;  %5082 = vmatprep.subr.mxu0 %v3322_v35  ;;  %v2508_v31 = vadd.f32 %v4921_v1, %v4841_v48 }
 0x336   : > { %7780 = vst [vmem:[#allocation3_spill] sm:$0xff] %v7166_v23  ;;  %5406 = vpow2.f32 %v2627_v53  ;;  %v2629_v45 = vmul.f32 1.442695, %v7166_v23  ;;  %v2540_v39 = vmul.f32 15.0, %v1962_v4  ;;  %v7180_v7 = vsub.f32 %v2493_v2, %v2539_v47  ;;  %v7198_v47 = vld [vmem:[%s7698_s11 + $0x78] sm:$0xff]  ;;  %5083 = vmatpush3.msra.mxu0 %v3322_v35 }
 0x337   : > { %2771 = vadd.xlane.f32.xlu1 %v2721_v33  ;;  %v1932_v5 = vpop.permute.xlu1 %1931  ;;  %v2722_v57 = vand.u32 2147483647, %v7172_v59  ;;  %5134 = vmatprep.subr.mxu1 %v7198_v47 }
 0x338   : > { %7782 = vst [vmem:[#allocation4_spill] sm:$0xff] %v7180_v7  ;;  %v7183_v54 = vpop.eup %5394  ;;  %5408 = vpow2.f32 %v2629_v45  ;;  %v7185_v36 = vsub.f32 %v2498_v0, %v2540_v39  ;;  %v1964_v62 = vmax.f32 %v7784_v12, %v1932_v5  ;;  %v2631_v4 = vmul.f32 1.442695, %v7180_v7  ;;  %v7785_v45 = vld [vmem:[#allocation6_spill] sm:$0xff]  ;;  %5084 = vmatprep.subr.mxu0 %v3321_v50 }
 0x339   : > { %v7191_v53 = vpop.eup %5396  ;;  %v1930_v2 = vpop.permute.xlu0 %1929  ;;  %2773 = vadd.xlane.f32.xlu0 %v2722_v57  ;;  %v2723_v11 = vand.u32 2147483647, %v7183_v54  ;;  %5085 = vmatpush3.msra.mxu0 %v3321_v50 }
 0x33a   : > { %7783 = vst [vmem:[#allocation36_spill] sm:$0xff] %v7185_v36  ;;  %v2633_v33 = vmul.f32 1.442695, %v7185_v36  ;;  %v2542_v0 = vmul.f32 15.0, %v1964_v62  ;;  %v1963_v39 = vmax.f32 %v7785_v45, %v1930_v2  ;;  %v2502_v57 = vpop.f32.mrf.mxu1  ;;  %5410 = vpow2.f32 %v2631_v4 }
 0x33b   : > { %v7203_v5 = vpop.eup %5398  ;;  %2775 = vadd.xlane.f32.xlu1 %v2723_v11  ;;  %v2724_v12 = vand.u32 2147483647, %v7191_v53  ;;  %v2503_v7 = vadd.f32 %v2502_v57, %v2277_v63 }
 0x33c   : > { %5412 = vpow2.f32 %v2633_v33  ;;  %v7206_v23 = vsub.f32 %v2508_v31, %v2542_v0  ;;  %v2541_v48 = vmul.f32 15.0, %v1963_v39  ;;  %v2725_v35 = vand.u32 2147483647, %v7203_v5 }
 0x33d   : > { %v7208_v1 = vpop.eup %5400  ;;  %2777 = vadd.xlane.f32.xlu0 %v2724_v12 }
 0x33e   : > { %7786 = vst [vmem:[#allocation5_spill] sm:$0xff] %v7206_v23  ;;  %v2637_v62 = vmul.f32 1.442695, %v7206_v23  ;;  %v7212_v2 = vsub.f32 %v2503_v7, %v2541_v48  ;;  %v2726_v4 = vand.u32 2147483647, %v7208_v1 }
 0x33f   : > { %v7215_v11 = vpop.eup %5402  ;;  %2779 = vadd.xlane.f32.xlu1 %v2725_v35 }
 0x340   : > { %7787 = vst [vmem:[#allocation6_spill] sm:$0xff] %v7212_v2  ;;  %5414 = vpow2.f32 %v2637_v62  ;;  %v2635_v63 = vmul.f32 1.442695, %v7212_v2  ;;  %v2727_v31 = vand.u32 2147483647, %v7215_v11 }
 0x341   : > { %2781 = vadd.xlane.f32.xlu0 %v2726_v4 }
 0x342   : > { %v7219_v50 = vpop.eup %5404  ;;  %5416 = vpow2.f32 %v2635_v63 }
 0x343   : > { %v7221_v33 = vpop.eup %5406  ;;  %2783 = vadd.xlane.f32.xlu1 %v2727_v31  ;;  %v2728_v7 = vand.u32 2147483647, %v7219_v50 }
 0x344   : > { %v2729_v0 = vand.u32 2147483647, %v7221_v33 }
 0x345   : > { %v7225_v45 = vpop.eup %5408  ;;  %2785 = vadd.xlane.f32.xlu0 %v2728_v7  ;;  %v4928_v7 = vpop.f32.mrf.mxu0 }
 0x346   : > { %v2730_v39 = vand.u32 2147483647, %v7225_v45  ;;  %v3136_v52 = vadd.f32 %v4928_v7, %v7259_v61  ;;  %v3816_v7 = vld [vmem:[%s7698_s11 + $0x68] sm:$0xff] }
 0x347   : > { %2787 = vadd.xlane.f32.xlu1 %v2729_v0  ;;  %v7228_v57 = vpop.eup %5410  ;;  %v3130_v0 = vpop.f32.mrf.mxu0 }
 0x348   : > { %v2731_v48 = vand.u32 2147483647, %v7228_v57 }
 0x349   : > { %v7230_v12 = vpop.eup %5412  ;;  %2789 = vadd.xlane.f32.xlu0 %v2730_v39  ;;  %v7240_v23 = vpop.f32.mrf.mxu0 }
 0x34a   : > { %v2732_v35 = vand.u32 2147483647, %v7230_v12 }
 0x34b   : > { %2791 = vadd.xlane.f32.xlu1 %v2731_v48  ;;  %v7242_v39 = vpop.f32.mrf.mxu0 }
 0x34d   : > { %v7234_v62 = vpop.eup %5414  ;;  %2793 = vadd.xlane.f32.xlu0 %v2732_v35  ;;  %v7244_v2 = vpop.f32.mrf.mxu0 }
 0x34e   : > { %v2734_v4 = vand.u32 2147483647, %v7234_v62 }
 0x34f   : > { %v7237_v63 = vpop.eup %5416  ;;  %v7246_v48 = vpop.f32.mrf.mxu0 }
 0x350   : > { %v2733_v31 = vand.u32 2147483647, %v7237_v63 }
 0x351   : > { %2797 = vadd.xlane.f32.xlu0 %v2734_v4  ;;  %v7248_v24 = vpop.f32.mrf.mxu0 }
 0x352   : > { %2795 = vadd.xlane.f32.xlu1 %v2733_v31 }
 0x353   : > { %v7250_v4 = vpop.f32.mrf.mxu0 }
 0x355   : > { %v7252_v30 = vpop.f32.mrf.mxu0 }
 0x357   : > { %v7254_v44 = vpop.f32.mrf.mxu0 }
 0x359   : > { %v7262_v42 = vpop.f32.mrf.mxu0 }
 0x386   : > { %v2736_v36 = vpop.xlane.xlu0 %2735 }
 0x387   : > { %v2799_v35 = vmul.f32 0.0625, %v2736_v36  ;;  %v3131_v36 = vadd.f32 %v7259_v61, %v3130_v0  ;;  %v3817_v0 = vld [vmem:[%s7698_s11 + $0x70] sm:$0xff] }
 0x389   : > { %v2831_v14 = vmax.f32 %v2799_v35, 1e-12 }
 0x38a   : > { %v2738_v17 = vpop.xlane.xlu1 %2737 }
 0x38b   : > { %5418 = vrcp.f32 %v2831_v14  ;;  %v2800_v10 = vmul.f32 0.0625, %v2738_v17  ;;  %v7788_v14 = vld [vmem:[#allocation9_spill] sm:$0xff] }
 0x38d   : > { %v2832_v31 = vmax.f32 %v2800_v10, 1e-12 }
 0x38f   : > { %5420 = vrcp.f32 %v2832_v31  ;;  %v7266_v31 = vpop.f32.mrf.mxu0 }
 0x391   : > { %v7272_v26 = vpop.f32.mrf.mxu0 }
 0x398   : > { %v5419_v35 = vpop.eup %5418 }
 0x399   : > { %v2927_v17 = vmul.f32 %v5419_v35, %v7788_v14 }
 0x39b   : > { %v3289_v10 = vmul.f32 %v3131_v36, %v2927_v17  ;;  %5006 = vmatprep.mubr.f32.mxu1 %v2927_v17  ;;  %v3814_v17 = vld [vmem:[%s7698_s11 + $0x58] sm:$0xff] }
 0x39c   : > { %v5421_v43 = vpop.eup %5420  ;;  %v2740_v60 = vpop.xlane.xlu0 %2739 }
 0x39d   : > { %v2928_v9 = vmul.f32 %v5421_v43, %v7789_v40  ;;  %5086 = vmatprep.mubr.f32.mxu0 %v3289_v10  ;;  %v2801_v21 = vmul.f32 0.0625, %v2740_v60  ;;  %v3815_v43 = vld [vmem:[%s7698_s11 + $0x60] sm:$0xff] }
 0x39f   : > { %v3290_v28 = vmul.f32 %v3136_v52, %v2928_v9  ;;  %5007 = vmatmul.mubr.f32.vlgmr.msra.gmra.mxu1 %v2928_v9  ;;  %v2833_v35 = vmax.f32 %v2801_v21, 1e-12  ;;  %v7281_v52 = vpop.f32.mrf.mxu0 }
 0x3a0   : > { %5135 = vmatpush3.msra.mxu1 %v7198_v47  ;;  %v2742_v36 = vpop.xlane.xlu0 %2741 }
 0x3a1   : > { %5087 = vmatmul.mubr.f32.vlgmr.msra.gmra.mxu0 %v3290_v28  ;;  %5136 = vmatprep.subr.mxu1 %v3817_v0  ;;  %5422 = vrcp.f32 %v2833_v35  ;;  %v2802_v60 = vmul.f32 0.0625, %v2742_v36  ;;  %v3813_v35 = vld [vmem:[%s7698_s11 + $0x50] sm:$0xff]  ;;  %v7289_v36 = vpop.f32.mrf.mxu0 }
 0x3a2   : > { %5137 = vmatpush3.msra.mxu1 %v3817_v0  ;;  %v2744_v9 = vpop.xlane.xlu1 %2743 }
 0x3a3   : > { %5138 = vmatprep.subr.mxu1 %v3816_v7  ;;  %v2803_v21 = vmul.f32 0.0625, %v2744_v9  ;;  %v2834_v47 = vmax.f32 %v2802_v60, 1e-12 }
 0x3a4   : > { %5139 = vmatpush3.msra.mxu1 %v3816_v7  ;;  %v2746_v28 = vpop.xlane.xlu0 %2745  ;;  %v3812_v7 = vld [vmem:[%s7698_s11 + $0x48] sm:$0xff] }
 0x3a5   : > { %5140 = vmatprep.subr.mxu1 %v3815_v43  ;;  %v2835_v10 = vmax.f32 %v2803_v21, 1e-12  ;;  %5424 = vrcp.f32 %v2834_v47  ;;  %v2804_v0 = vmul.f32 0.0625, %v2746_v28  ;;  %v7297_v28 = vpop.f32.mrf.mxu0 }
 0x3a6   : > { %5141 = vmatpush3.msra.mxu1 %v3815_v43  ;;  %v3811_v43 = vld [vmem:[%s7698_s11 + $0x40] sm:$0xff] }
 0x3a7   : > { %5142 = vmatprep.subr.mxu1 %v3814_v17  ;;  %5426 = vrcp.f32 %v2835_v10  ;;  %v2836_v60 = vmax.f32 %v2804_v0, 1e-12 }
 0x3a8   : > { %5143 = vmatpush3.msra.mxu1 %v3814_v17  ;;  %v2748_v9 = vpop.xlane.xlu1 %2747  ;;  %v3810_v17 = vld [vmem:[%s7698_s11 + $0x38] sm:$0xff] }
 0x3a9   : > { %5144 = vmatprep.subr.mxu1 %v3813_v35  ;;  %v2805_v21 = vmul.f32 0.0625, %v2748_v9  ;;  %5428 = vrcp.f32 %v2836_v60  ;;  %v3141_v9 = vadd.f32 %v7259_v61, %v7242_v39 }
 0x3aa   : > { %5145 = vmatpush3.msra.mxu1 %v3813_v35  ;;  %v2750_v47 = vpop.xlane.xlu0 %2749 }
 0x3ab   : > { %5146 = vmatprep.subr.mxu1 %v3812_v7  ;;  %v2837_v10 = vmax.f32 %v2805_v21, 1e-12  ;;  %v2806_v0 = vmul.f32 0.0625, %v2750_v47 }
 0x3ac   : > { %5147 = vmatpush3.msra.mxu1 %v3812_v7  ;;  %v2752_v37 = vpop.xlane.xlu1 %2751  ;;  %v7307_v7 = vpop.f32.mrf.mxu0 }
 0x3ad   : > { %5148 = vmatprep.subr.mxu1 %v3811_v43  ;;  %5430 = vrcp.f32 %v2837_v10  ;;  %v2807_v60 = vmul.f32 0.0625, %v2752_v37  ;;  %v2838_v35 = vmax.f32 %v2806_v0, 1e-12  ;;  %v3808_v37 = vld [vmem:[%s7698_s11 + $0x28] sm:$0xff] }
 0x3ae   : > { %5149 = vmatpush3.msra.mxu1 %v3811_v43  ;;  %v5423_v21 = vpop.eup %5422  ;;  %v2754_v47 = vpop.xlane.xlu0 %2753  ;;  %v3146_v43 = vadd.f32 %v7240_v23, %v7259_v61 }
 0x3af   : > { %5150 = vmatprep.subr.mxu1 %v3810_v17  ;;  %v2839_v56 = vmax.f32 %v2807_v60, 1e-12  ;;  %5432 = vrcp.f32 %v2838_v35  ;;  %v2808_v25 = vmul.f32 0.0625, %v2754_v47  ;;  %v2929_v10 = vmul.f32 %v5423_v21, %v6944_v32  ;;  %v3807_v60 = vld [vmem:[%s7698_s11 + $0x20] sm:$0xff]  ;;  %v7318_v21 = vpop.f32.mrf.mxu0 }
 0x3b0   : > { %5151 = vmatpush3.msra.mxu1 %v3810_v17  ;;  %v2756_v39 = vpop.xlane.xlu1 %2755 }
 0x3b1   : > { %5152 = vmatprep.subr.mxu1 %v3809_v19  ;;  %5434 = vrcp.f32 %v2839_v56  ;;  %v2809_v0 = vmul.f32 0.0625, %v2756_v39  ;;  %v2840_v16 = vmax.f32 %v2808_v25, 1e-12  ;;  %v3291_v15 = vmul.f32 %v3141_v9, %v2929_v10  ;;  %5009 = vmatprep.mubr.f32.mxu1 %v2929_v10  ;;  %v3806_v10 = vld [vmem:[%s7698_s11 + $0x18] sm:$0xff] }
 0x3b2   : > { %5153 = vmatpush3.msra.mxu1 %v3809_v19  ;;  %v5425_v17 = vpop.eup %5424  ;;  %v2758_v35 = vpop.xlane.xlu0 %2757  ;;  %v3156_v19 = vadd.f32 %v7244_v2, %v7259_v61  ;;  %v3151_v9 = vadd.f32 %v7259_v61, %v7246_v48  ;;  %v3805_v2 = vld [vmem:[%s7698_s11 + $0x10] sm:$0xff] }
 0x3b3   : > { %5154 = vmatprep.subr.mxu1 %v3808_v37  ;;  %v2841_v47 = vmax.f32 %v2809_v0, 1e-12  ;;  %5436 = vrcp.f32 %v2840_v16  ;;  %v2930_v23 = vmul.f32 %v5425_v17, %v6949_v46  ;;  %v2810_v27 = vmul.f32 0.0625, %v2758_v35  ;;  %5089 = vmatprep.mubr.f32.mxu0 %v3291_v15  ;;  %v7329_v35 = vpop.f32.mrf.mxu0 }
 0x3b4   : > { %5155 = vmatpush3.msra.mxu1 %v3808_v37  ;;  %v5427_v25 = vpop.eup %5426  ;;  %v2760_v56 = vpop.xlane.xlu1 %2759 }
 0x3b5   : > { %5156 = vmatprep.subr.mxu1 %v3807_v60  ;;  %5438 = vrcp.f32 %v2841_v47  ;;  %v3292_v16 = vmul.f32 %v3146_v43, %v2930_v23  ;;  %v2811_v39 = vmul.f32 0.0625, %v2760_v56  ;;  %v2842_v0 = vmax.f32 %v2810_v27, 1e-12  ;;  %5010 = vmatmul.mubr.f32.gmra.mxu1 %v2930_v23 }
 0x3b6   : > { %v5429_v15 = vpop.eup %5428  ;;  %v2931_v37 = vmul.f32 %v5427_v25, %v6974_v22  ;;  %v2762_v17 = vpop.xlane.xlu0 %2761  ;;  %5157 = vmatpush3.msra.mxu1 %v3807_v60  ;;  %v3161_v23 = vadd.f32 %v7259_v61, %v7250_v4  ;;  %v3804_v60 = vld [vmem:[%s7698_s11 + $0x8] sm:$0xff]  ;;  %v3803_v4 = vld [vmem:[%s7698_s11] sm:$0xff] }
 0x3b7   : > { %v2843_v48 = vmax.f32 %v2811_v39, 1e-12  ;;  %5440 = vrcp.f32 %v2842_v0  ;;  %v2932_v46 = vmul.f32 %v5429_v15, %v6985_v20  ;;  %v2812_v47 = vmul.f32 0.0625, %v2762_v17  ;;  %5090 = vmatmul.mubr.f32.gmra.mxu0 %v3292_v16  ;;  %5158 = vmatprep.subr.mxu1 %v3806_v10  ;;  %v7342_v15 = vpop.f32.mrf.mxu0 }
 0x3b8   : > { %v3293_v27 = vmul.f32 %v3151_v9, %v2931_v37  ;;  %v2764_v43 = vpop.xlane.xlu1 %2763  ;;  %5012 = vmatprep.mubr.f32.mxu1 %v2931_v37  ;;  %5159 = vmatpush3.msra.mxu1 %v3806_v10  ;;  %v3166_v9 = vadd.f32 %v7248_v24, %v7259_v61  ;;  %v3171_v24 = vadd.f32 %v7259_v61, %v7254_v44 }
 0x3b9   : > { %5442 = vrcp.f32 %v2843_v48  ;;  %v3294_v25 = vmul.f32 %v3156_v19, %v2932_v46  ;;  %v2813_v56 = vmul.f32 0.0625, %v2764_v43  ;;  %v2844_v39 = vmax.f32 %v2812_v47, 1e-12  ;;  %5013 = vmatmul.mubr.f32.gmra.mxu1 %v2932_v46  ;;  %5160 = vmatprep.subr.mxu1 %v3805_v2 }
 0x3ba   : > { %v5431_v0 = vpop.eup %5430  ;;  %v2766_v16 = vpop.xlane.xlu0 %2765  ;;  %5092 = vmatprep.mubr.f32.mxu0 %v3293_v27  ;;  %5161 = vmatpush3.msra.mxu1 %v3805_v2 }
 0x3bb   : > { %v2845_v10 = vmax.f32 %v2813_v56, 1e-12  ;;  %5444 = vrcp.f32 %v2844_v39  ;;  %v2933_v19 = vmul.f32 %v5431_v0, %v7003_v49  ;;  %v2814_v37 = vmul.f32 0.0625, %v2766_v16  ;;  %5093 = vmatmul.mubr.f32.gmra.mxu0 %v3294_v25  ;;  %5162 = vmatprep.subr.mxu1 %v3804_v60  ;;  %v7353_v39 = vpop.f32.mrf.mxu0 }
 0x3bc   : > { %v5433_v46 = vpop.eup %5432  ;;  %v2768_v17 = vpop.xlane.xlu1 %2767  ;;  %5163 = vmatpush3.msra.mxu1 %v3804_v60  ;;  %v3176_v56 = vadd.f32 %v7252_v30, %v7259_v61 }
 0x3bd   : > { %5446 = vrcp.f32 %v2845_v10  ;;  %v2934_v2 = vmul.f32 %v5433_v46, %v7013_v8  ;;  %v3295_v48 = vmul.f32 %v3161_v23, %v2933_v19  ;;  %v2815_v47 = vmul.f32 0.0625, %v2768_v17  ;;  %5015 = vmatprep.mubr.f32.mxu1 %v2933_v19  ;;  %5164 = vmatprep.subr.mxu1 %v3803_v4 }
 0x3be   : > { %v5435_v27 = vpop.eup %5434  ;;  %v2846_v43 = vmax.f32 %v2814_v37, 1e-12  ;;  %v2770_v25 = vpop.xlane.xlu0 %2769  ;;  %5165 = vmatpush3.msra.mxu1 %v3803_v4  ;;  %v3181_v19 = vadd.f32 %v7259_v61, %v7266_v31  ;;  %v3186_v17 = vadd.f32 %v7262_v42, %v7259_v61 }
 0x3bf   : > { %v3296_v0 = vmul.f32 %v3166_v9, %v2934_v2  ;;  %v2847_v16 = vmax.f32 %v2815_v47, 1e-12  ;;  %v2935_v44 = vmul.f32 %v5435_v27, %v7025_v18  ;;  %v2816_v60 = vmul.f32 0.0625, %v2770_v25  ;;  %5095 = vmatprep.mubr.f32.mxu0 %v3295_v48  ;;  %5016 = vmatmul.mubr.f32.gmra.mxu1 %v2934_v2  ;;  %v7361_v2 = vpop.f32.mrf.mxu0 }
 0x3c0   : > { %v5437_v23 = vpop.eup %5436  ;;  %5448 = vrcp.f32 %v2846_v43  ;;  %v2772_v10 = vpop.xlane.xlu1 %2771 }
 0x3c1   : > { %5450 = vrcp.f32 %v2847_v16  ;;  %v2936_v30 = vmul.f32 %v5437_v23, %v7037_v38  ;;  %v3297_v37 = vmul.f32 %v3171_v24, %v2935_v44  ;;  %v2817_v46 = vmul.f32 0.0625, %v2772_v10  ;;  %5018 = vmatprep.mubr.f32.mxu1 %v2935_v44  ;;  %5096 = vmatmul.mubr.f32.gmra.mxu0 %v3296_v0 }
 0x3c2   : > { %v5439_v9 = vpop.eup %5438  ;;  %v2848_v4 = vmax.f32 %v2816_v60, 1e-12  ;;  %v2774_v48 = vpop.xlane.xlu0 %2773  ;;  %v3191_v0 = vadd.f32 %v7259_v61, %v7281_v52  ;;  %v3196_v23 = vadd.f32 %v7272_v26, %v7259_v61 }
 0x3c3   : > { %v3298_v47 = vmul.f32 %v3176_v56, %v2936_v30  ;;  %v2849_v27 = vmax.f32 %v2817_v46, 1e-12  ;;  %v2937_v43 = vmul.f32 %v5439_v9, %v7058_v55  ;;  %v2818_v31 = vmul.f32 0.0625, %v2774_v48  ;;  %5098 = vmatprep.mubr.f32.mxu0 %v3297_v37  ;;  %5019 = vmatmul.mubr.f32.gmra.mxu1 %v2936_v30  ;;  %v7369_v30 = vpop.f32.mrf.mxu0 }
 0x3c4   : > { %v5441_v25 = vpop.eup %5440  ;;  %5452 = vrcp.f32 %v2848_v4  ;;  %v2776_v24 = vpop.xlane.xlu1 %2775  ;;  %v3201_v48 = vadd.f32 %v7259_v61, %v7297_v28  ;;  %v3206_v28 = vadd.f32 %v7289_v36, %v7259_v61 }
 0x3c5   : > { %5454 = vrcp.f32 %v2849_v27  ;;  %v2938_v16 = vmul.f32 %v5441_v25, %v7064_v6  ;;  %v3299_v42 = vmul.f32 %v3181_v19, %v2937_v43  ;;  %v2819_v44 = vmul.f32 0.0625, %v2776_v24  ;;  %5021 = vmatprep.mubr.f32.mxu1 %v2937_v43  ;;  %5099 = vmatmul.mubr.f32.gmra.mxu0 %v3298_v47  ;;  %v7375_v25 = vpop.f32.mrf.mxu0 }
 0x3c6   : > { %v5443_v56 = vpop.eup %5442  ;;  %v2850_v60 = vmax.f32 %v2818_v31, 1e-12  ;;  %v2778_v10 = vpop.xlane.xlu0 %2777 }
 0x3c7   : > { %v3300_v37 = vmul.f32 %v3186_v17, %v2938_v16  ;;  %v2851_v46 = vmax.f32 %v2819_v44, 1e-12  ;;  %v2939_v9 = vmul.f32 %v5443_v56, %v7078_v34  ;;  %v2820_v52 = vmul.f32 0.0625, %v2778_v10  ;;  %5101 = vmatprep.mubr.f32.mxu0 %v3299_v42  ;;  %5022 = vmatmul.mubr.f32.gmra.mxu1 %v2938_v16 }
 0x3c8   : > { %v5445_v4 = vpop.eup %5444  ;;  %5456 = vrcp.f32 %v2850_v60  ;;  %v2780_v19 = vpop.xlane.xlu1 %2779  ;;  %v3211_v56 = vadd.f32 %v7259_v61, %v7318_v21 }
 0x3c9   : > { %5458 = vrcp.f32 %v2851_v46  ;;  %v2940_v47 = vmul.f32 %v5445_v4, %v7096_v58  ;;  %v3301_v26 = vmul.f32 %v3191_v0, %v2939_v9  ;;  %v2821_v27 = vmul.f32 0.0625, %v2780_v19  ;;  %5024 = vmatprep.mubr.f32.mxu1 %v2939_v9  ;;  %5102 = vmatmul.mubr.f32.gmra.mxu0 %v3300_v37  ;;  %v7383_v4 = vpop.f32.mrf.mxu0 }
 0x3ca   : > { %v5447_v17 = vpop.eup %5446  ;;  %v2852_v43 = vmax.f32 %v2820_v52, 1e-12  ;;  %v2782_v31 = vpop.xlane.xlu0 %2781 }
 0x3cb   : > { %v3302_v24 = vmul.f32 %v3196_v23, %v2940_v47  ;;  %v2853_v16 = vmax.f32 %v2821_v27, 1e-12  ;;  %v2941_v42 = vmul.f32 %v5447_v17, %v7109_v41  ;;  %v2822_v44 = vmul.f32 0.0625, %v2782_v31  ;;  %5104 = vmatprep.mubr.f32.mxu0 %v3301_v26  ;;  %5025 = vmatmul.mubr.f32.gmra.mxu1 %v2940_v47 }
 0x3cc   : > { %5460 = vrcp.f32 %v2852_v43  ;;  %v2784_v0 = vpop.xlane.xlu1 %2783  ;;  %v3221_v27 = vadd.f32 %v7259_v61, %v7342_v15  ;;  %v3226_v15 = vadd.f32 %v7329_v35, %v7259_v61 }
 0x3cd   : > { %v5449_v60 = vpop.eup %5448  ;;  %5462 = vrcp.f32 %v2853_v16  ;;  %v3303_v10 = vmul.f32 %v3201_v48, %v2941_v42  ;;  %v2823_v37 = vmul.f32 0.0625, %v2784_v0  ;;  %v2854_v46 = vmax.f32 %v2822_v44, 1e-12  ;;  %5027 = vmatprep.mubr.f32.mxu1 %v2941_v42  ;;  %5105 = vmatmul.mubr.f32.gmra.mxu0 %v3302_v24 }
 0x3ce   : > { %v5451_v23 = vpop.eup %5450  ;;  %v2942_v9 = vmul.f32 %v5449_v60, %v7126_v51  ;;  %v2786_v52 = vpop.xlane.xlu0 %2785  ;;  %v3216_v48 = vadd.f32 %v7307_v7, %v7259_v61 }
 0x3cf   : > { %v2855_v19 = vmax.f32 %v2823_v37, 1e-12  ;;  %5464 = vrcp.f32 %v2854_v46  ;;  %v2943_v36 = vmul.f32 %v5451_v23, %v7135_v3  ;;  %v2824_v47 = vmul.f32 0.0625, %v2786_v52  ;;  %5107 = vmatprep.mubr.f32.mxu0 %v3303_v10 }
 0x3d0   : > { %v3304_v21 = vmul.f32 %v3206_v28, %v2942_v9  ;;  %v2788_v26 = vpop.xlane.xlu1 %2787  ;;  %5028 = vmatmul.mubr.f32.gmra.mxu1 %v2942_v9  ;;  %v3250_v28 = vpop.f32.mrf.mxu0  ;;  %v3231_v37 = vadd.f32 %v7259_v61, %v7361_v2  ;;  %v3236_v2 = vadd.f32 %v7353_v39, %v7259_v61 }
 0x3d1   : > { %v5453_v17 = vpop.eup %5452  ;;  %5466 = vrcp.f32 %v2855_v19  ;;  %v3305_v43 = vmul.f32 %v3211_v56, %v2943_v36  ;;  %v2825_v31 = vmul.f32 0.0625, %v2788_v26  ;;  %v2856_v24 = vmax.f32 %v2824_v47, 1e-12  ;;  %5030 = vmatprep.mubr.f32.mxu1 %v2943_v36 }
 0x3d2   : > { %v5455_v16 = vpop.eup %5454  ;;  %v2944_v42 = vmul.f32 %v5453_v17, %v7142_v29  ;;  %5108 = vmatmul.mubr.f32.gmra.mxu0 %v3304_v21  ;;  %v2790_v44 = vpop.xlane.xlu0 %2789 }
 0x3d3   : > { %v2857_v0 = vmax.f32 %v2825_v31, 1e-12  ;;  %5468 = vrcp.f32 %v2856_v24  ;;  %v2945_v7 = vmul.f32 %v5455_v16, %v7157_v13  ;;  %v2826_v60 = vmul.f32 0.0625, %v2790_v44  ;;  %5110 = vmatprep.mubr.f32.mxu0 %v3305_v43  ;;  %v4967_v21 = vpop.f32.mrf.mxu0 }
 0x3d4   : > { %v3306_v10 = vmul.f32 %v3216_v48, %v2944_v42  ;;  %v2792_v56 = vpop.xlane.xlu1 %2791  ;;  %5031 = vmatmul.mubr.f32.gmra.mxu1 %v2944_v42  ;;  %v3241_v24 = vadd.f32 %v7259_v61, %v7375_v25 }
 0x3d5   : > { %v5457_v46 = vpop.eup %5456  ;;  %5470 = vrcp.f32 %v2857_v0  ;;  %v3307_v23 = vmul.f32 %v3221_v27, %v2945_v7  ;;  %v2827_v9 = vmul.f32 0.0625, %v2792_v56  ;;  %v2858_v52 = vmax.f32 %v2826_v60, 1e-12  ;;  %5033 = vmatprep.mubr.f32.mxu1 %v2945_v7  ;;  %v3260_v0 = vpop.f32.mrf.mxu0 }
 0x3d6   : > { %v5459_v19 = vpop.eup %5458  ;;  %v2946_v36 = vmul.f32 %v5457_v46, %v7172_v59  ;;  %5111 = vmatmul.mubr.f32.gmra.mxu0 %v3306_v10  ;;  %v2794_v47 = vpop.xlane.xlu0 %2793  ;;  %v3246_v7 = vadd.f32 %v7369_v30, %v7259_v61 }
 0x3d7   : > { %v2859_v48 = vmax.f32 %v2827_v9, 1e-12  ;;  %5472 = vrcp.f32 %v2858_v52  ;;  %v2947_v35 = vmul.f32 %v5459_v19, %v7183_v54  ;;  %v2828_v26 = vmul.f32 0.0625, %v2794_v47  ;;  %5113 = vmatprep.mubr.f32.mxu0 %v3307_v23  ;;  %v4970_v30 = vpop.f32.mrf.mxu0 }
 0x3d8   : > { %v3308_v17 = vmul.f32 %v3226_v15, %v2946_v36  ;;  %5034 = vmatmul.mubr.f32.gmra.mxu1 %v2946_v36  ;;  %v3251_v9 = vadd.f32 %v7259_v61, %v3250_v28  ;;  %v3256_v47 = vadd.f32 %v7383_v4, %v7259_v61  ;;  %v3261_v28 = vadd.f32 %v7259_v61, %v3260_v0 }
 0x3d9   : > { %v5461_v27 = vpop.eup %5460  ;;  %5474 = vrcp.f32 %v2859_v48  ;;  %v3309_v43 = vmul.f32 %v3231_v37, %v2947_v35  ;;  %v2860_v31 = vmax.f32 %v2828_v26, 1e-12  ;;  %5036 = vmatprep.mubr.f32.mxu1 %v2947_v35 }
 0x3da   : > { %v5463_v16 = vpop.eup %5462  ;;  %v2948_v42 = vmul.f32 %v5461_v27, %v7191_v53  ;;  %5114 = vmatmul.mubr.f32.gmra.mxu0 %v3308_v17  ;;  %v2798_v44 = vpop.xlane.xlu0 %2797 }
 0x3db   : > { %5476 = vrcp.f32 %v2860_v31  ;;  %v2949_v39 = vmul.f32 %v5463_v16, %v7203_v5  ;;  %v2830_v60 = vmul.f32 0.0625, %v2798_v44  ;;  %5116 = vmatprep.mubr.f32.mxu0 %v3309_v43  ;;  %v2796_v10 = vpop.xlane.xlu1 %2795  ;;  %v3270_v27 = vpop.f32.mrf.mxu0  ;;  %v3266_v31 = vadd.f32 %v4967_v21, %v7259_v61 }
 0x3dc   : > { %v5465_v15 = vpop.eup %5464  ;;  %v3310_v56 = vmul.f32 %v3236_v2, %v2948_v42  ;;  %v2829_v37 = vmul.f32 0.0625, %v2796_v10  ;;  %5037 = vmatmul.mubr.f32.gmra.mxu1 %v2948_v42  ;;  %v3271_v44 = vadd.f32 %v7259_v61, %v3270_v27 }
 0x3dd   : > { %v2950_v25 = vmul.f32 %v5465_v15, %v7208_v1  ;;  %v3311_v46 = vmul.f32 %v3241_v24, %v2949_v39  ;;  %v2862_v23 = vmax.f32 %v2830_v60, 1e-12  ;;  %5039 = vmatprep.mubr.f32.mxu1 %v2949_v39  ;;  %v3276_v60 = vadd.f32 %v4970_v30, %v7259_v61 }
 0x3de   : > { %v5467_v52 = vpop.eup %5466  ;;  %v2861_v19 = vmax.f32 %v2829_v37, 1e-12  ;;  %5117 = vmatmul.mubr.f32.gmra.mxu0 %v3310_v56 }
 0x3df   : > { %v3312_v36 = vmul.f32 %v3246_v7, %v2950_v25  ;;  %5478 = vrcp.f32 %v2862_v23  ;;  %v2951_v48 = vmul.f32 %v5467_v52, %v7215_v11  ;;  %5119 = vmatprep.mubr.f32.mxu0 %v3311_v46  ;;  %v4973_v7 = vpop.f32.mrf.mxu0  ;;  %v2639_v52 = vsub.f32 0.0, %v7788_v14 }
 0x3e0   : > { %v5469_v35 = vpop.eup %5468  ;;  %5480 = vrcp.f32 %v2861_v19  ;;  %5040 = vmatmul.mubr.f32.gmra.mxu1 %v2950_v25  ;;  %v3286_v46 = vadd.f32 %v4973_v7, %v7259_v61  ;;  %v7796_v7 = vld [vmem:[#allocation14_spill] sm:$0xff] }
 0x3e1   : > { %v2952_v26 = vmul.f32 %v5469_v35, %v7219_v50  ;;  %v3313_v17 = vmul.f32 %v3251_v9, %v2951_v48  ;;  %5042 = vmatprep.mubr.f32.mxu1 %v2951_v48  ;;  %v3280_v37 = vpop.f32.mrf.mxu0 }
 0x3e2   : > { %v5471_v2 = vpop.eup %5470  ;;  %5120 = vmatmul.mubr.f32.gmra.mxu0 %v3312_v36  ;;  %v3281_v9 = vadd.f32 %v7259_v61, %v3280_v37  ;;  %v7791_v61 = vld [vmem:[#allocation8_spill] sm:$0xff] }
 0x3e3   : > { %v3314_v43 = vmul.f32 %v3256_v47, %v2952_v26  ;;  %v2953_v4 = vmul.f32 %v5471_v2, %v7221_v33  ;;  %5122 = vmatprep.mubr.f32.mxu0 %v3313_v17  ;;  %v2640_v47 = vsub.f32 0.0, %v7789_v40  ;;  %v7792_v2 = vld [vmem:[#allocation18_spill] sm:$0xff] }
 0x3e4   : > { %v5473_v24 = vpop.eup %5472  ;;  %5043 = vmatmul.mubr.f32.gmra.mxu1 %v2952_v26  ;;  %v7790_v26 = vld [vmem:[#allocation7_spill] sm:$0xff]  ;;  %v2642_v27 = vsub.f32 0.0, %v7792_v2  ;;  %v7794_v40 = vld [vmem:[#allocation10_spill] sm:$0xff] }
 0x3e5   : > { %v2954_v16 = vmul.f32 %v5473_v24, %v7225_v45  ;;  %v3315_v42 = vmul.f32 %v3261_v28, %v2953_v4  ;;  %5045 = vmatprep.mubr.f32.mxu1 %v2953_v4  ;;  %v2671_v17 = vmul.f32 %v2639_v52, %v7790_v26  ;;  %v2641_v28 = vsub.f32 0.0, %v6944_v32  ;;  %v7802_v52 = vld [vmem:[#allocation21_spill] sm:$0xff]  ;;  %v7808_v2 = vld [vmem:[#allocation27_spill] sm:$0xff] }
 0x3e6   : > { %v5475_v0 = vpop.eup %5474  ;;  %5123 = vmatmul.mubr.f32.gmra.mxu0 %v3314_v43  ;;  %v2672_v14 = vmul.f32 %v2640_v47, %v7791_v61  ;;  %v7793_v43 = vld [vmem:[#allocation12_spill] sm:$0xff]  ;;  %v2643_v4 = vsub.f32 0.0, %v6974_v22  ;;  %v2674_v24 = vmul.f32 %v2642_v27, %v7794_v40  ;;  %v2647_v22 = vsub.f32 0.0, %v7025_v18  ;;  %v7804_v47 = vld [vmem:[#allocation23_spill] sm:$0xff]  ;;  %v7807_v61 = vld [vmem:[#allocation26_spill] sm:$0xff] }
 0x3e7   : > { %v3316_v39 = vmul.f32 %v3266_v31, %v2954_v16  ;;  %v2955_v10 = vmul.f32 %v5475_v0, %v7228_v57  ;;  %5125 = vmatprep.mubr.f32.mxu0 %v3315_v42  ;;  %v2673_v31 = vmul.f32 %v2641_v28, %v7793_v43  ;;  %v7795_v42 = vld [vmem:[#allocation13_spill] sm:$0xff]  ;;  %v2651_v18 = vsub.f32 0.0, %v7078_v34  ;;  %v7809_v43 = vld [vmem:[#allocation28_spill] sm:$0xff] }
 0x3e8   : > { %v5477_v21 = vpop.eup %5476  ;;  %5046 = vmatmul.mubr.f32.gmra.mxu1 %v2954_v16  ;;  %v2644_v16 = vsub.f32 0.0, %v6985_v20  ;;  %v2675_v32 = vmul.f32 %v2643_v4, %v7795_v42  ;;  %v2648_v20 = vsub.f32 0.0, %v7037_v38  ;;  %v2652_v38 = vsub.f32 0.0, %v7096_v58  ;;  %v7806_v28 = vld [vmem:[#allocation25_spill] sm:$0xff]  ;;  %v7812_v42 = vld [vmem:[#allocation31_spill] sm:$0xff] }
 0x3e9   : > { %v2956_v15 = vmul.f32 %v5477_v21, %v7230_v12  ;;  %v3317_v56 = vmul.f32 %v3271_v44, %v2955_v10  ;;  %5048 = vmatprep.mubr.f32.mxu1 %v2955_v10  ;;  %v2645_v44 = vsub.f32 0.0, %v7003_v49  ;;  %v7798_v21 = vld [vmem:[#allocation16_spill] sm:$0xff]  ;;  %v2649_v49 = vsub.f32 0.0, %v7058_v55  ;;  %v7810_v4 = vld [vmem:[#allocation29_spill] sm:$0xff] }
 0x3ea   : > { %5126 = vmatmul.mubr.f32.gmra.mxu0 %v3316_v39  ;;  %v2676_v0 = vmul.f32 %v2644_v16, %v7796_v7  ;;  %v2646_v39 = vsub.f32 0.0, %v7013_v8  ;;  %v2650_v8 = vsub.f32 0.0, %v7064_v6  ;;  %v2653_v55 = vsub.f32 0.0, %v7109_v41 }
 0x3eb   : > { %v3318_v25 = vmul.f32 %v3276_v60, %v2956_v15  ;;  %5128 = vmatprep.mubr.f32.mxu0 %v3317_v56  ;;  %v7797_v60 = vld [vmem:[#allocation15_spill] sm:$0xff]  ;;  %v7799_v56 = vld [vmem:[#allocation17_spill] sm:$0xff]  ;;  %v2654_v6 = vsub.f32 0.0, %v7126_v51  ;;  %v2655_v34 = vsub.f32 0.0, %v7135_v3  ;;  %v2657_v41 = vsub.f32 0.0, %v7157_v13 }
 0x3ec   : > { %v5479_v23 = vpop.eup %5478  ;;  %5049 = vmatmul.mubr.f32.gmra.mxu1 %v2956_v15  ;;  %v2677_v10 = vmul.f32 %v2645_v44, %v7797_v60  ;;  %v2678_v15 = vmul.f32 %v2646_v39, %v7798_v21  ;;  %v2679_v37 = vmul.f32 %v2647_v22, %v7799_v56  ;;  %v2658_v51 = vsub.f32 0.0, %v7172_v59  ;;  %v7813_v44 = vld [vmem:[#allocation32_spill] sm:$0xff]  ;;  %v7815_v60 = vld [vmem:[#allocation34_spill] sm:$0xff]  ;;  %v7818_v56 = vld [vmem:[#allocation3_spill] sm:$0xff] }
 0x3ed   : > { %v5481_v19 = vpop.eup %5480  ;;  %v2958_v30 = vmul.f32 %v5479_v23, %v7234_v62  ;;  %v7801_v23 = vld [vmem:[#allocation20_spill] sm:$0xff]  ;;  %v2686_v58 = vmul.f32 %v2654_v6, %v7806_v28  ;;  %v2659_v3 = vsub.f32 0.0, %v7183_v54  ;;  %v2660_v40 = vsub.f32 0.0, %v7191_v53  ;;  %v7816_v22 = vld [vmem:[#allocation2_spill] sm:$0xff] }
 0x3ee   : > { %v2957_v36 = vmul.f32 %v5481_v19, %v7237_v63  ;;  %5129 = vmatmul.mubr.f32.gmra.mxu0 %v3318_v25  ;;  %v7800_v25 = vld [vmem:[#allocation19_spill] sm:$0xff]  ;;  %v2682_v19 = vmul.f32 %v2650_v8, %v7802_v52  ;;  %v2661_v13 = vsub.f32 0.0, %v7203_v5  ;;  %v2662_v59 = vsub.f32 0.0, %v7208_v1 }
 0x3ef   : > { %v3320_v48 = vmul.f32 %v3286_v46, %v2958_v30  ;;  %v2680_v46 = vmul.f32 %v2648_v20, %v7800_v25  ;;  %v2663_v54 = vsub.f32 0.0, %v7215_v11  ;;  %v2664_v53 = vsub.f32 0.0, %v7219_v50 }
 0x3f0   : > { %v3319_v35 = vmul.f32 %v3281_v9, %v2957_v36  ;;  %5051 = vmatprep.mubr.f32.mxu1 %v2957_v36  ;;  %v2681_v9 = vmul.f32 %v2649_v49, %v7801_v23  ;;  %v2693_v7 = vmul.f32 %v2661_v13, %v7813_v44  ;;  %v2665_v5 = vsub.f32 0.0, %v7221_v33  ;;  %v7819_v49 = vld [vmem:[#allocation4_spill] sm:$0xff]  ;;  %v7821_v23 = vld [vmem:[#allocation6_spill] sm:$0xff] }
 0x3f1   : > { %5052 = vmatmul.mubr.f32.gmra.mxu1 %v2958_v30  ;;  %v7803_v30 = vld [vmem:[#allocation22_spill] sm:$0xff]  ;;  %v2696_v21 = vmul.f32 %v2664_v53, %v7816_v22  ;;  %v2666_v1 = vsub.f32 0.0, %v7225_v45  ;;  %v2667_v11 = vsub.f32 0.0, %v7228_v57  ;;  %v2668_v50 = vsub.f32 0.0, %v7230_v12  ;;  %v7822_v57 = vld [vmem:[#allocation5_spill] sm:$0xff] }
 0x3f2   : > { %5131 = vmatprep.mubr.f32.mxu0 %v3319_v35  ;;  %5166 = vmatprep.mubr.f32.mxu1 %v2671_v17  ;;  %v2683_v36 = vmul.f32 %v2651_v18, %v7803_v30  ;;  %v7805_v35 = vld [vmem:[#allocation24_spill] sm:$0xff]  ;;  %v2656_v17 = vsub.f32 0.0, %v7142_v29  ;;  %v2690_v29 = vmul.f32 %v2658_v51, %v7810_v4  ;;  %v2669_v33 = vsub.f32 0.0, %v7237_v63 }
 0x3f3   : > { %5132 = vmatmul.mubr.f32.gmra.mxu0 %v3320_v48  ;;  %v2684_v48 = vmul.f32 %v2652_v38, %v7804_v47  ;;  %v2685_v26 = vmul.f32 %v2653_v55, %v7805_v35  ;;  %v2699_v25 = vmul.f32 %v2667_v11, %v7819_v49  ;;  %v2670_v45 = vsub.f32 0.0, %v7234_v62 }
 0x3f4   : > { %v2688_v27 = vmul.f32 %v2656_v17, %v7808_v2 }
 0x3f5   : > { %5167 = vmatmul.mubr.f32.vlgmr.msra.gmra.mxu1 %v2672_v14  ;;  %v2687_v14 = vmul.f32 %v2655_v34, %v7807_v61  ;;  %v2702_v18 = vmul.f32 %v2670_v45, %v7822_v57 }
 0x3f6   : > { %5169 = vmatprep.mubr.f32.mxu1 %v2673_v31  ;;  %v2689_v31 = vmul.f32 %v2657_v41, %v7809_v43 }
 0x3f9   : > { %5170 = vmatmul.mubr.f32.gmra.mxu1 %v2674_v24  ;;  %v7811_v24 = vld [vmem:[#allocation30_spill] sm:$0xff] }
 0x3fa   : > { %5172 = vmatprep.mubr.f32.mxu1 %v2675_v32  ;;  %v2691_v16 = vmul.f32 %v2659_v3, %v7811_v24  ;;  %v2692_v32 = vmul.f32 %v2660_v40, %v7812_v42 }
 0x3fd   : > { %5173 = vmatmul.mubr.f32.gmra.mxu1 %v2676_v0  ;;  %v7814_v0 = vld [vmem:[#allocation33_spill] sm:$0xff] }
 0x3fe   : > { %5175 = vmatprep.mubr.f32.mxu1 %v2677_v10  ;;  %v2694_v39 = vmul.f32 %v2662_v59, %v7814_v0  ;;  %v2695_v10 = vmul.f32 %v2663_v54, %v7815_v60 }
 0x401   : > { %5176 = vmatmul.mubr.f32.gmra.mxu1 %v2678_v15  ;;  %v7817_v15 = vld [vmem:[#allocation35_spill] sm:$0xff] }
 0x402   : > { %5178 = vmatprep.mubr.f32.mxu1 %v2679_v37  ;;  %v2697_v20 = vmul.f32 %v2665_v5, %v7817_v15  ;;  %v2698_v37 = vmul.f32 %v2666_v1, %v7818_v56  ;;  %v7563_v56 = vld [vmem:[%s7699_s12] ss:$0 sm:$0xff] }
 0x405   : > { %5179 = vmatmul.mubr.f32.gmra.mxu1 %v2680_v46  ;;  %v7820_v46 = vld [vmem:[#allocation36_spill] sm:$0xff] }
 0x406   : > { %5181 = vmatprep.mubr.f32.mxu1 %v2681_v9  ;;  %v2700_v8 = vmul.f32 %v2668_v50, %v7820_v46  ;;  %v2701_v9 = vmul.f32 %v2669_v33, %v7821_v23 }
 0x409   : > { %5182 = vmatmul.mubr.f32.gmra.mxu1 %v2682_v19 }
 0x40a   : > { %5184 = vmatprep.mubr.f32.mxu1 %v2683_v36 }
 0x40d   : > { %5185 = vmatmul.mubr.f32.gmra.mxu1 %v2684_v48 }
 0x40e   : > { %5187 = vmatprep.mubr.f32.mxu1 %v2685_v26 }
 0x411   : > { %5188 = vmatmul.mubr.f32.gmra.mxu1 %v2686_v58 }
 0x412   : > { %5190 = vmatprep.mubr.f32.mxu1 %v2687_v14 }
 0x415   : > { %5191 = vmatmul.mubr.f32.gmra.mxu1 %v2688_v27 }
 0x416   : > { %5193 = vmatprep.mubr.f32.mxu1 %v2689_v31 }
 0x419   : > { %5194 = vmatmul.mubr.f32.gmra.mxu1 %v2690_v29 }
 0x41a   : > { %5196 = vmatprep.mubr.f32.mxu1 %v2691_v16 }
 0x41d   : > { %5197 = vmatmul.mubr.f32.gmra.mxu1 %v2692_v32 }
 0x41e   : > { %5199 = vmatprep.mubr.f32.mxu1 %v2693_v7 }
 0x421   : > { %5200 = vmatmul.mubr.f32.gmra.mxu1 %v2694_v39 }
 0x422   : > { %5202 = vmatprep.mubr.f32.mxu1 %v2695_v10 }
 0x425   : > { %5203 = vmatmul.mubr.f32.gmra.mxu1 %v2696_v21 }
 0x426   : > { %5205 = vmatprep.mubr.f32.mxu1 %v2697_v20 }
 0x429   : > { %5206 = vmatmul.mubr.f32.gmra.mxu1 %v2698_v37 }
 0x42a   : > { %5208 = vmatprep.mubr.f32.mxu1 %v2699_v25 }
 0x42d   : > { %5209 = vmatmul.mubr.f32.gmra.mxu1 %v2700_v8 }
 0x42e   : > { %5211 = vmatprep.mubr.f32.mxu1 %v2701_v9 }
 0x431   : > { %5212 = vmatmul.mubr.f32.gmra.mxu1 %v2702_v18 }
 0x45f   : > { %v5008_v52 = vpop.f32.mrf.mxu1 }
 0x461   : > { %v3419_v19 = vpop.f32.mrf.mxu1  ;;  %v5088_v12 = vpop.f32.mrf.mxu0 }
 0x462   : > { %v3650_v20 = vadd.f32 %v5088_v12, %v5008_v52 }
 0x463   : > { %v3644_v30 = vpop.f32.mrf.mxu0 }
 0x464   : > { %v3645_v37 = vadd.f32 %v3644_v30, %v3419_v19 }
 0x475   : > { %v5011_v38 = vpop.f32.mrf.mxu1 }
 0x477   : > { %v3429_v36 = vpop.f32.mrf.mxu1  ;;  %v5091_v55 = vpop.f32.mrf.mxu0 }
 0x478   : > { %v3660_v33 = vadd.f32 %v5091_v55, %v5011_v38 }
 0x479   : > { %v5014_v63 = vpop.f32.mrf.mxu1  ;;  %v3654_v48 = vpop.f32.mrf.mxu0 }
 0x47a   : > { %v3655_v23 = vadd.f32 %v3654_v48, %v3429_v36 }
 0x47b   : > { %v7488_v47 = vpop.f32.mrf.mxu1  ;;  %v5094_v35 = vpop.f32.mrf.mxu0 }
 0x47c   : > { %v3670_v19 = vadd.f32 %v5094_v35, %v5014_v63 }
 0x47d   : > { %v3664_v17 = vpop.f32.mrf.mxu0 }
 0x47e   : > { %v3665_v55 = vadd.f32 %v3664_v17, %v7488_v47 }
 0x47f   : > { %v7490_v6 = vpop.f32.mrf.mxu1 }
 0x481   : > { %v7492_v62 = vpop.f32.mrf.mxu1  ;;  %v5097_v61 = vpop.f32.mrf.mxu0 }
 0x483   : > { %v7494_v26 = vpop.f32.mrf.mxu1  ;;  %v3674_v2 = vpop.f32.mrf.mxu0 }
 0x485   : > { %v7496_v34 = vpop.f32.mrf.mxu1  ;;  %v7510_v43 = vpop.f32.mrf.mxu0 }
 0x487   : > { %v7498_v28 = vpop.f32.mrf.mxu1  ;;  %v7516_v4 = vpop.f32.mrf.mxu0 }
 0x489   : > { %v7500_v58 = vpop.f32.mrf.mxu1  ;;  %v7522_v24 = vpop.f32.mrf.mxu0 }
 0x48b   : > { %v7502_v14 = vpop.f32.mrf.mxu1  ;;  %v7528_v42 = vpop.f32.mrf.mxu0 }
 0x48d   : > { %v7504_v41 = vpop.f32.mrf.mxu1  ;;  %v7534_v44 = vpop.f32.mrf.mxu0 }
 0x48f   : > { %v7540_v0 = vpop.f32.mrf.mxu0 }
 0x490   : > { %v7506_v27 = vpop.f32.mrf.mxu1 }
 0x492   : > { %v7508_v51 = vpop.f32.mrf.mxu1  ;;  %v7546_v60 = vpop.f32.mrf.mxu0 }
 0x494   : > { %v7512_v31 = vpop.f32.mrf.mxu1  ;;  %v7552_v22 = vpop.f32.mrf.mxu0 }
 0x496   : > { %v7514_v3 = vpop.f32.mrf.mxu1  ;;  %v7556_v1 = vpop.f32.mrf.mxu0 }
 0x498   : > { %v7518_v29 = vpop.f32.mrf.mxu1  ;;  %v7565_v49 = vpop.f32.mrf.mxu0 }
 0x49a   : > { %v7520_v40 = vpop.f32.mrf.mxu1  ;;  %v7577_v18 = vpop.f32.mrf.mxu0 }
 0x49c   : > { %v7524_v16 = vpop.f32.mrf.mxu1 }
 0x49e   : > { %v7526_v13 = vpop.f32.mrf.mxu1 }
 0x4a0   : > { %v7530_v32 = vpop.f32.mrf.mxu1 }
 0x4a2   : > { %v7532_v59 = vpop.f32.mrf.mxu1 }
 0x4a4   : > { %v7536_v7 = vpop.f32.mrf.mxu1 }
 0x4a6   : > { %v7538_v54 = vpop.f32.mrf.mxu1 }
 0x4a8   : > { %v7542_v39 = vpop.f32.mrf.mxu1 }
 0x4aa   : > { %v7544_v53 = vpop.f32.mrf.mxu1 }
 0x4ac   : > { %v7548_v10 = vpop.f32.mrf.mxu1 }
 0x4ae   : > { %v7550_v5 = vpop.f32.mrf.mxu1 }
 0x4b1   : > { %v7554_v21 = vpop.f32.mrf.mxu1 }
 0x4b3   : > { %v7558_v15 = vpop.f32.mrf.mxu1 }
 0x4b5   : > { %v5168_v11 = vpop.f32.mrf.mxu1 }
 0x4b6   : > { %v4045_v50 = vadd.f32 %v5168_v11, %v3650_v20  ;;  %v7584_v20 = vpop.f32.mrf.mxu0 }
 0x4b7   : > { %v3885_v25 = vpop.f32.mrf.mxu1 }
 0x4b8   : > { %v4084_v46 = vadd.f32 %v7563_v56, %v4045_v50  ;;  %v4044_v8 = vadd.f32 %v3885_v25, %v3645_v37  ;;  %v3680_v37 = vadd.f32 %v5097_v61, %v7490_v6  ;;  %v3675_v25 = vadd.f32 %v3674_v2, %v7492_v62 }
 0x4b9   : > { %v5171_v45 = vpop.f32.mrf.mxu1  ;;  %v3685_v62 = vadd.f32 %v7516_v4, %v7496_v34 }
 0x4ba   : > { %4116 = vst [vmem:[%s7572_s17 + $0x8] sm:$0xff] %v4084_v46  ;;  %v4083_v9 = vadd.f32 %v7563_v56, %v4044_v8  ;;  %v4047_v57 = vadd.f32 %v5171_v45, %v3660_v33  ;;  %v7592_v33 = vpop.f32.mrf.mxu0  ;;  %v3690_v8 = vadd.f32 %v7510_v43, %v7494_v26 }
 0x4bb   : > { %v3895_v52 = vpop.f32.mrf.mxu1 }
 0x4bc   : > { %4115 = vst [vmem:[%s7572_s17] sm:$0xff] %v4083_v9  ;;  %v4086_v12 = vadd.f32 %v7563_v56, %v4047_v57  ;;  %v4046_v38 = vadd.f32 %v3895_v52, %v3655_v23  ;;  %v3744_v9 = vpop.f32.mrf.mxu0  ;;  %v3700_v52 = vadd.f32 %v7522_v24, %v7498_v28 }
 0x4bd   : > { %v5174_v30 = vpop.f32.mrf.mxu1 }
 0x4be   : > { %4118 = vst [vmem:[%s7572_s17 + $0x18] sm:$0xff] %v4086_v12  ;;  %v4085_v36 = vadd.f32 %v7563_v56, %v4046_v38  ;;  %v4049_v48 = vadd.f32 %v5174_v30, %v3670_v19  ;;  %v3695_v12 = vadd.f32 %v7528_v42, %v7500_v58  ;;  %v5121_v38 = vpop.f32.mrf.mxu0 }
 0x4bf   : > { %v3905_v11 = vpop.f32.mrf.mxu1 }
 0x4c0   : > { %4117 = vst [vmem:[%s7572_s17 + $0x10] sm:$0xff] %v4085_v36  ;;  %v4088_v63 = vadd.f32 %v7563_v56, %v4049_v48  ;;  %v4048_v35 = vadd.f32 %v3905_v11, %v3665_v55  ;;  %v3710_v55 = vadd.f32 %v7534_v44, %v7502_v14  ;;  %v3705_v48 = vadd.f32 %v7540_v0, %v7504_v41  ;;  %v3754_v11 = vpop.f32.mrf.mxu0 }
 0x4c1   : > { %v5177_v50 = vpop.f32.mrf.mxu1 }
 0x4c2   : > { %4120 = vst [vmem:[%s7572_s17 + $0x28] sm:$0xff] %v4088_v63  ;;  %v4087_v47 = vadd.f32 %v7563_v56, %v4048_v35  ;;  %v4051_v17 = vadd.f32 %v5177_v50, %v3680_v37  ;;  %v3720_v63 = vadd.f32 %v7546_v60, %v7506_v27  ;;  %v3715_v50 = vadd.f32 %v7552_v22, %v7508_v51 }
 0x4c3   : > { %v3915_v46 = vpop.f32.mrf.mxu1 }
 0x4c4   : > { %4119 = vst [vmem:[%s7572_s17 + $0x20] sm:$0xff] %v4087_v47  ;;  %v4090_v6 = vadd.f32 %v7563_v56, %v4051_v17  ;;  %v4050_v61 = vadd.f32 %v3915_v46, %v3675_v25  ;;  %v5124_v25 = vpop.f32.mrf.mxu0  ;;  %v3730_v17 = vadd.f32 %v7556_v1, %v7512_v31 }
 0x4c5   : > { %v5180_v45 = vpop.f32.mrf.mxu1 }
 0x4c6   : > { %4122 = vst [vmem:[%s7572_s17 + $0x38] sm:$0xff] %v4090_v6  ;;  %v4089_v2 = vadd.f32 %v7563_v56, %v4050_v61  ;;  %v4053_v23 = vadd.f32 %v5180_v45, %v3690_v8  ;;  %v3725_v8 = vadd.f32 %v7565_v49, %v7514_v3  ;;  %v3764_v6 = vpop.f32.mrf.mxu0  ;;  %v3740_v45 = vadd.f32 %v7577_v18, %v7518_v29 }
 0x4c7   : > { %v3925_v57 = vpop.f32.mrf.mxu1 }
 0x4c8   : > { %4121 = vst [vmem:[%s7572_s17 + $0x30] sm:$0xff] %v4089_v2  ;;  %v4092_v26 = vadd.f32 %v7563_v56, %v4053_v23  ;;  %v4052_v43 = vadd.f32 %v3925_v57, %v3685_v62  ;;  %v3735_v2 = vadd.f32 %v7584_v20, %v7520_v40  ;;  %v5127_v23 = vpop.f32.mrf.mxu0 }
 0x4c9   : > { %v5183_v19 = vpop.f32.mrf.mxu1 }
 0x4ca   : > { %4124 = vst [vmem:[%s7572_s17 + $0x48] sm:$0xff] %v4092_v26  ;;  %v4091_v34 = vadd.f32 %v7563_v56, %v4052_v43  ;;  %v4055_v4 = vadd.f32 %v5183_v19, %v3700_v52  ;;  %v3750_v52 = vadd.f32 %v7592_v33, %v7524_v16  ;;  %v3745_v43 = vadd.f32 %v3744_v9, %v7526_v13  ;;  %v3774_v19 = vpop.f32.mrf.mxu0 }
 0x4cb   : > { %v3935_v30 = vpop.f32.mrf.mxu1 }
 0x4cc   : > { %4123 = vst [vmem:[%s7572_s17 + $0x40] sm:$0xff] %v4091_v34  ;;  %v4094_v28 = vadd.f32 %v7563_v56, %v4055_v4  ;;  %v4054_v24 = vadd.f32 %v3935_v30, %v3695_v12  ;;  %v3760_v34 = vadd.f32 %v5121_v38, %v7530_v32  ;;  %v3755_v30 = vadd.f32 %v3754_v11, %v7532_v59 }
 0x4cd   : > { %v5186_v36 = vpop.f32.mrf.mxu1 }
 0x4ce   : > { %4126 = vst [vmem:[%s7572_s17 + $0x58] sm:$0xff] %v4094_v28  ;;  %v4093_v58 = vadd.f32 %v7563_v56, %v4054_v24  ;;  %v4057_v42 = vadd.f32 %v5186_v36, %v3710_v55  ;;  %v5130_v55 = vpop.f32.mrf.mxu0  ;;  %v3770_v24 = vadd.f32 %v5124_v25, %v7536_v7 }
 0x4cf   : > { %v3945_v37 = vpop.f32.mrf.mxu1 }
 0x4d0   : > { %4125 = vst [vmem:[%s7572_s17 + $0x50] sm:$0xff] %v4093_v58  ;;  %v4096_v14 = vadd.f32 %v7563_v56, %v4057_v42  ;;  %v4056_v44 = vadd.f32 %v3945_v37, %v3705_v48  ;;  %v3765_v48 = vadd.f32 %v3764_v6, %v7538_v54  ;;  %v3784_v42 = vpop.f32.mrf.mxu0  ;;  %v3780_v37 = vadd.f32 %v5127_v23, %v7542_v39 }
 0x4d1   : > { %v5189_v35 = vpop.f32.mrf.mxu1 }
 0x4d2   : > { %4128 = vst [vmem:[%s7572_s17 + $0x68] sm:$0xff] %v4096_v14  ;;  %v4095_v41 = vadd.f32 %v7563_v56, %v4056_v44  ;;  %v4059_v0 = vadd.f32 %v5189_v35, %v3720_v63  ;;  %v3775_v44 = vadd.f32 %v3774_v19, %v7544_v53 }
 0x4d3   : > { %v3955_v47 = vpop.f32.mrf.mxu1 }
 0x4d4   : > { %4127 = vst [vmem:[%s7572_s17 + $0x60] sm:$0xff] %v4095_v41  ;;  %v4098_v27 = vadd.f32 %v7563_v56, %v4059_v0  ;;  %v4058_v60 = vadd.f32 %v3955_v47, %v3715_v50  ;;  %v5133_v50 = vpop.f32.mrf.mxu0  ;;  %v3790_v0 = vadd.f32 %v5130_v55, %v7548_v10 }
 0x4d5   : > { %v5192_v46 = vpop.f32.mrf.mxu1 }
 0x4d6   : > { %4130 = vst [vmem:[%s7572_s17 + $0x78] sm:$0xff] %v4098_v27  ;;  %v4097_v51 = vadd.f32 %v7563_v56, %v4058_v60  ;;  %v4061_v22 = vadd.f32 %v5192_v46, %v3730_v17  ;;  %v3785_v17 = vadd.f32 %v3784_v42, %v7550_v5  ;;  %v3794_v60 = vpop.f32.mrf.mxu0 }
 0x4d7   : > { %v3965_v61 = vpop.f32.mrf.mxu1  ;;  %v3795_v6 = vadd.f32 %v3794_v60, %v7558_v15 }
 0x4d8   : > { %4129 = vst [vmem:[%s7572_s17 + $0x70] sm:$0xff] %v4097_v51  ;;  %v4100_v31 = vadd.f32 %v7563_v56, %v4061_v22  ;;  %v4060_v1 = vadd.f32 %v3965_v61, %v3725_v8  ;;  %v3800_v8 = vadd.f32 %v5133_v50, %v7554_v21 }
 0x4d9   : > { %v5195_v62 = vpop.f32.mrf.mxu1 }
 0x4da   : > { %4132 = vst [vmem:[%s7572_s17 + $0x88] sm:$0xff] %v4100_v31  ;;  %v4099_v3 = vadd.f32 %v7563_v56, %v4060_v1  ;;  %v4063_v49 = vadd.f32 %v5195_v62, %v3740_v45 }
 0x4db   : > { %v3975_v57 = vpop.f32.mrf.mxu1 }
 0x4dc   : > { %4131 = vst [vmem:[%s7572_s17 + $0x80] sm:$0xff] %v4099_v3  ;;  %v4102_v29 = vadd.f32 %v7563_v56, %v4063_v49  ;;  %v4062_v18 = vadd.f32 %v3975_v57, %v3735_v2 }
 0x4dd   : > { %v5198_v26 = vpop.f32.mrf.mxu1 }
 0x4de   : > { %4134 = vst [vmem:[%s7572_s17 + $0x98] sm:$0xff] %v4102_v29  ;;  %v4101_v40 = vadd.f32 %v7563_v56, %v4062_v18  ;;  %v4065_v20 = vadd.f32 %v5198_v26, %v3750_v52 }
 0x4df   : > { %v3985_v12 = vpop.f32.mrf.mxu1 }
 0x4e0   : > { %4133 = vst [vmem:[%s7572_s17 + $0x90] sm:$0xff] %v4101_v40  ;;  %v4104_v16 = vadd.f32 %v7563_v56, %v4065_v20  ;;  %v4064_v33 = vadd.f32 %v3985_v12, %v3745_v43 }
 0x4e1   : > { %v5201_v4 = vpop.f32.mrf.mxu1 }
 0x4e2   : > { %4136 = vst [vmem:[%s7572_s17 + $0xa8] sm:$0xff] %v4104_v16  ;;  %v4103_v13 = vadd.f32 %v7563_v56, %v4064_v33  ;;  %v4067_v9 = vadd.f32 %v5201_v4, %v3760_v34 }
 0x4e3   : > { %v3995_v28 = vpop.f32.mrf.mxu1 }
 0x4e4   : > { %4135 = vst [vmem:[%s7572_s17 + $0xa0] sm:$0xff] %v4103_v13  ;;  %v4106_v32 = vadd.f32 %v7563_v56, %v4067_v9  ;;  %v4066_v38 = vadd.f32 %v3995_v28, %v3755_v30 }
 0x4e5   : > { %v5204_v36 = vpop.f32.mrf.mxu1 }
 0x4e6   : > { %4138 = vst [vmem:[%s7572_s17 + $0xb8] sm:$0xff] %v4106_v32  ;;  %v4105_v59 = vadd.f32 %v7563_v56, %v4066_v38  ;;  %v4069_v58 = vadd.f32 %v5204_v36, %v3770_v24 }
 0x4e7   : > { %v4005_v11 = vpop.f32.mrf.mxu1 }
 0x4e8   : > { %4137 = vst [vmem:[%s7572_s17 + $0xb0] sm:$0xff] %v4105_v59  ;;  %v4108_v7 = vadd.f32 %v7563_v56, %v4069_v58  ;;  %v4068_v63 = vadd.f32 %v4005_v11, %v3765_v48 }
 0x4e9   : > { %v5207_v14 = vpop.f32.mrf.mxu1 }
 0x4ea   : > { %4140 = vst [vmem:[%s7572_s17 + $0xc8] sm:$0xff] %v4108_v7  ;;  %v4107_v54 = vadd.f32 %v7563_v56, %v4068_v63  ;;  %v4071_v35 = vadd.f32 %v5207_v14, %v3780_v37 }
 0x4eb   : > { %v4015_v41 = vpop.f32.mrf.mxu1 }
 0x4ec   : > { %4139 = vst [vmem:[%s7572_s17 + $0xc0] sm:$0xff] %v4107_v54  ;;  %v4110_v39 = vadd.f32 %v7563_v56, %v4071_v35  ;;  %v4070_v25 = vadd.f32 %v4015_v41, %v3775_v44 }
 0x4ed   : > { %v5210_v47 = vpop.f32.mrf.mxu1 }
 0x4ee   : > { %4142 = vst [vmem:[%s7572_s17 + $0xd8] sm:$0xff] %v4110_v39  ;;  %v4109_v53 = vadd.f32 %v7563_v56, %v4070_v25  ;;  %v4073_v27 = vadd.f32 %v5210_v47, %v3790_v0 }
 0x4ef   : > { %v4025_v46 = vpop.f32.mrf.mxu1 }
 0x4f0   : > { %4141 = vst [vmem:[%s7572_s17 + $0xd0] sm:$0xff] %v4109_v53  ;;  %v4112_v10 = vadd.f32 %v7563_v56, %v4073_v27  ;;  %v4072_v51 = vadd.f32 %v4025_v46, %v3785_v17 }
 0x4f1   : > { %v5213_v22 = vpop.f32.mrf.mxu1 }
 0x4f2   : > { %4144 = vst [vmem:[%s7572_s17 + $0xe8] sm:$0xff] %v4112_v10  ;;  %v4111_v5 = vadd.f32 %v7563_v56, %v4072_v51  ;;  %v4075_v61 = vadd.f32 %v5213_v22, %v3800_v8 }
 0x4f3   : > { %v4035_v45 = vpop.f32.mrf.mxu1 }
 0x4f4   : > { %4143 = vst [vmem:[%s7572_s17 + $0xe0] sm:$0xff] %v4111_v5  ;;  %v4114_v31 = vadd.f32 %v7563_v56, %v4075_v61  ;;  %v4074_v1 = vadd.f32 %v4035_v45, %v3795_v6 }
 0x4f6   : > { %4146 = vst [vmem:[%s7572_s17 + $0xf8] sm:$0xff] %v4114_v31  ;;  %v4113_v62 = vadd.f32 %v7563_v56, %v4074_v1 }
 0x4f8   : > { %4145 = vst [vmem:[%s7572_s17 + $0xf0] sm:$0xff] %v4113_v62 }
 0x4f9 PF: > { %s23_s25 = sadd.s32 1, %s5520_s25  }
 0x4fa   : > { %p20_p4 = scmp.ge.s32.totalorder %s23_s25, 4  }
 0x4fc   :  { %22 = sbr.rel (!%p20_p4) target bundleno = 1 (0x1), region = 102 }

</bundles_post_ra>
